<compile_context>
chip_gen: v6e
topology: v6e:2x2x1
jax: 0.10.0
libtpu: 0.0.40
codegen_flags: <defaults>
</compile_context>

<pallas_src>
import functools

import jax
import jax.numpy as jnp
from jax.experimental import pallas as pl
from jax.experimental.pallas import tpu as pltpu


# ----------------------------------------------------------------------------
# helpers
# ----------------------------------------------------------------------------
def _round_up(x, m):
    return (x + m - 1) // m * m


def _pick_rows_tile(B, cap=256):
    """Largest multiple-of-16 divisor of B that is <= min(B//2, cap); else B."""
    best = None
    for d in range(16, min(B // 2, cap) + 1, 16):
        if B % d == 0:
            best = d
    return best if best is not None else B


# ----------------------------------------------------------------------------
# Pallas kernels
# ----------------------------------------------------------------------------
def _conv_block_kernel(p_ref, w_ref, b_ref, o_ref, *, apply_relu):
    # One image per grid step: (S, K) bf16 @ (K, N) bf16 -> f32 acc -> epilogue.
    x = p_ref[0]
    acc = jnp.dot(x, w_ref[...], preferred_element_type=jnp.float32)
    acc = acc + b_ref[...]
    if apply_relu:
        acc = jnp.maximum(acc, 0.0)
    o_ref[0] = acc.astype(o_ref.dtype)


def _mlp_head_kernel(x_ref, w4_ref, b4_ref, wh_ref, bh_ref, o_ref):
    # Fused fc4 (+ReLU) and head; the (tb, 512) intermediate stays on-chip.
    h = jnp.dot(x_ref[...], w4_ref[...], preferred_element_type=jnp.float32)
    h = jnp.maximum(h + b4_ref[...], 0.0)
    q = jnp.dot(h.astype(jnp.bfloat16), wh_ref[...],
                preferred_element_type=jnp.float32)
    o_ref[...] = q + bh_ref[...]


# ----------------------------------------------------------------------------
# Pallas wrappers
# ----------------------------------------------------------------------------
def conv_dense(patches, w, b, *, relu=True):
    """relu(patches @ w + b), gridded over the batch.

    patches: (B, S, K) bf16 (per-image im2col rows), w: (K, N) bf16,
    b: (1, N) f32.  Block shapes equal the full (S, K)/(S, N) extents so no
    padding / tail-slice copies are needed; weights are resident across the
    grid; grid is "parallel" for megacore sharding.
    """
    B, S, K = patches.shape
    K2, N = w.shape
    assert K == K2, (K, K2)
    flops = 2 * B * S * K * N
    bytes_accessed = B * S * K * 2 + K * N * 2 + N * 4 + B * S * N * 2
    return pl.pallas_call(
        functools.partial(_conv_block_kernel, apply_relu=relu),
        out_shape=jax.ShapeDtypeStruct((B, S, N), jnp.bfloat16),
        grid=(B,),
        in_specs=[
            pl.BlockSpec((1, S, K), lambda i: (i, 0, 0)),
            pl.BlockSpec((K, N), lambda i: (0, 0)),
            pl.BlockSpec((1, N), lambda i: (0, 0)),
        ],
        out_specs=pl.BlockSpec((1, S, N), lambda i: (i, 0, 0)),
        compiler_params=pltpu.CompilerParams(
            dimension_semantics=("parallel",)),
        cost_estimate=pl.CostEstimate(flops=flops, transcendentals=0,
                                      bytes_accessed=bytes_accessed),
    )(patches.astype(jnp.bfloat16), w, b)


def mlp_head(x, w4, b4, wh, bh):
    """Fused fc4(ReLU) + head.  x: (B, 3136) bf16, w4: (3136, 512) bf16,
    wh: (512, 128) bf16 (lane-dense padded head)."""
    B, K = x.shape
    N4 = w4.shape[1]
    Nh = wh.shape[1]
    tb = _pick_rows_tile(B)
    flops = 2 * B * K * N4 + 2 * B * N4 * Nh
    bytes_accessed = (B * K * 2 + K * N4 * 2 + N4 * 4 + N4 * Nh * 2 + Nh * 4
                      + B * Nh * 4)
    return pl.pallas_call(
        _mlp_head_kernel,
        out_shape=jax.ShapeDtypeStruct((B, Nh), jnp.float32),
        grid=(B // tb,),
        in_specs=[
            pl.BlockSpec((tb, K), lambda i: (i, 0)),
            pl.BlockSpec((K, N4), lambda i: (0, 0)),
            pl.BlockSpec((1, N4), lambda i: (0, 0)),
            pl.BlockSpec((N4, Nh), lambda i: (0, 0)),
            pl.BlockSpec((1, Nh), lambda i: (0, 0)),
        ],
        out_specs=pl.BlockSpec((tb, Nh), lambda i: (i, 0)),
        compiler_params=pltpu.CompilerParams(
            dimension_semantics=("parallel",),
            vmem_limit_bytes=48 * 1024 * 1024),
        cost_estimate=pl.CostEstimate(flops=flops, transcendentals=0,
                                      bytes_accessed=bytes_accessed),
    )(x.astype(jnp.bfloat16), w4, b4, wh, bh)


# ----------------------------------------------------------------------------
# im2col via one fused XLA op (patch feature dim ordered (C_in, KH, KW))
# ----------------------------------------------------------------------------
def _patches(x_nhwc, kh, kw, stride):
    p = jax.lax.conv_general_dilated_patches(
        x_nhwc, (kh, kw), (stride, stride), "VALID",
        dimension_numbers=("NHWC", "HWIO", "NHWC"))
    b, oh, ow, k = p.shape
    return p.reshape(b, oh * ow, k), oh, ow


# ----------------------------------------------------------------------------
# parameters: torch-style init, then one-time layout preparation for kernels
# ----------------------------------------------------------------------------
def init_params(key, action_dim=2, in_channels=4):
    ks = jax.random.split(key, 10)

    def w(k, shape, fan_in):
        return jax.random.normal(k, shape, jnp.float32) * (1.0 / jnp.sqrt(fan_in))

    return {
        "conv1_w": w(ks[0], (32, in_channels, 8, 8), in_channels * 64),
        "conv1_b": w(ks[1], (32,), in_channels * 64),
        "conv2_w": w(ks[2], (64, 32, 4, 4), 32 * 16),
        "conv2_b": w(ks[3], (64,), 32 * 16),
        "conv3_w": w(ks[4], (64, 64, 3, 3), 64 * 9),
        "conv3_b": w(ks[5], (64,), 64 * 9),
        "fc4_w":   w(ks[6], (512, 7 * 7 * 64), 7 * 7 * 64),   # torch Linear (out, in)
        "fc4_b":   w(ks[7], (512,), 7 * 7 * 64),
        "head_w":  w(ks[8], (action_dim, 512), 512),
        "head_b":  w(ks[9], (action_dim,), 512),
    }


def prepare_params(params):
    """One-time layout prep (all transposes / pads / casts happen here)."""
    def conv_w(w_oihw, scale=1.0):
        o, i, kh, kw = w_oihw.shape
        # Row order (C_in, KH, KW) matches conv_general_dilated_patches.
        m = jnp.transpose(w_oihw, (1, 2, 3, 0)).reshape(i * kh * kw, o) * scale
        return m.astype(jnp.bfloat16)

    def bias_row(b):
        return b.reshape(1, -1).astype(jnp.float32)

    # fc4: torch flatten is (C,H,W); permute rows to (H,W,C) so the NHWC conv3
    # output flattens for free (no per-forward transpose).
    w4 = params["fc4_w"].T.reshape(64, 7, 7, 512)
    w4 = jnp.transpose(w4, (1, 2, 0, 3)).reshape(7 * 7 * 64, 512)

    action_dim = params["head_w"].shape[0]
    nh = max(128, _round_up(action_dim, 128))        # lane-dense head output
    wh = jnp.pad(params["head_w"].T, ((0, 0), (0, nh - action_dim)))
    bh = jnp.pad(params["head_b"], (0, nh - action_dim))

    return {
        "w1": conv_w(params["conv1_w"], scale=1.0 / 255.0),  # folds x/255
        "b1": bias_row(params["conv1_b"]),
        "w2": conv_w(params["conv2_w"]),
        "b2": bias_row(params["conv2_b"]),
        "w3": conv_w(params["conv3_w"]),
        "b3": bias_row(params["conv3_b"]),
        "w4": w4.astype(jnp.bfloat16),
        "b4": params["fc4_b"].reshape(1, -1).astype(jnp.float32),
        "wh": wh.astype(jnp.bfloat16),
        "bh": bh.reshape(1, -1).astype(jnp.float32),
    }


# ----------------------------------------------------------------------------
# forward
# ----------------------------------------------------------------------------
@functools.partial(jax.jit, static_argnames=("action_dim",))
def convolutional_qnet_forward(prepared, x_nchw, action_dim=2):
    # NCHW -> NHWC (TPU friendly), bf16 activations; x/255 is folded into w1.
    x = jnp.transpose(x_nchw, (0, 2, 3, 1)).astype(jnp.bfloat16)
    B = x.shape[0]

    p1, oh, ow = _patches(x, 8, 8, 4)                          # (B, 400, 256)
    a1 = conv_dense(p1, prepared["w1"], prepared["b1"])        # (B, 400, 32)
    a1 = a1.reshape(B, oh, ow, 32)

    p2, oh, ow = _patches(a1, 4, 4, 2)                         # (B, 81, 512)
    a2 = conv_dense(p2, prepared["w2"], prepared["b2"])        # (B, 81, 64)
    a2 = a2.reshape(B, oh, ow, 64)

    p3, oh, ow = _patches(a2, 3, 3, 1)                         # (B, 49, 576)
    a3 = conv_dense(p3, prepared["w3"], prepared["b3"])        # (B, 49, 64)

    flat = a3.reshape(B, oh * ow * 64)        # free reshape; (H,W,C) order
    q = mlp_head(flat, prepared["w4"], prepared["b4"],
                 prepared["wh"], prepared["bh"])               # (B, 128) f32
    return q[:, :action_dim]


# ----------------------------------------------------------------------------
# pure-JAX f32 reference (standard DQN semantics: (C,H,W) flatten before fc4)
# ----------------------------------------------------------------------------
def reference_forward(params, x_nchw):
    x = x_nchw.astype(jnp.float32) / 255.0

    def conv(h, w, b, stride):
        y = jax.lax.conv_general_dilated(
            h, w, (stride, stride), "VALID",
            dimension_numbers=("NCHW", "OIHW", "NCHW"),
            precision=jax.lax.Precision.HIGHEST)
        return jax.nn.relu(y + b[None, :, None, None])

    h = conv(x, params["conv1_w"], params["conv1_b"], 4)
    h = conv(h, params["conv2_w"], params["conv2_b"], 2)
    h = conv(h, params["conv3_w"], params["conv3_b"], 1)
    h = h.reshape(h.shape[0], -1)                              # (C,H,W) flatten
    h = jax.nn.relu(
        jnp.dot(h, params["fc4_w"].T, precision=jax.lax.Precision.HIGHEST)
        + params["fc4_b"])
    return (jnp.dot(h, params["head_w"].T, precision=jax.lax.Precision.HIGHEST)
            + params["head_b"])


if __name__ == "__main__":
    action_dim = 2          # CartPole-v1 action space
    in_channels = 4
    batch = 2

    key = jax.random.PRNGKey(0)
    k_params, k_x = jax.random.split(key)
    params = init_params(k_params, action_dim=action_dim, in_channels=in_channels)
    prepared = prepare_params(params)
    # Pixel-like input in [0, 255], NCHW as in PyTorch; 84x84 is required by
    # fc4's 7*7*64 input dimension.
    x = jax.random.uniform(k_x, (batch, in_channels, 84, 84),
                           minval=0.0, maxval=255.0, dtype=jnp.float32)

    out = convolutional_qnet_forward(prepared, x, action_dim=action_dim)
    out = jax.block_until_ready(out)
    assert out.shape == (batch, action_dim), out.shape
    assert bool(jnp.all(jnp.isfinite(out)))

    # Tolerance check against the f32 reference (bf16 activations/weights in
    # the Pallas path -> small numeric drift is expected).
    ref = jax.block_until_ready(reference_forward(params, x))
    max_err = float(jnp.max(jnp.abs(out.astype(jnp.float32) - ref)))
    assert max_err < 1e-1, f"mismatch vs reference: max abs err = {max_err}"

    print("KERNEL_OK")
</pallas_src>

<mosaic_0001>
module attributes {stable_mosaic.version = 11 : i64} {
  func.func @_conv_block_kernel(%arg0: i32, %arg1: memref<1x400x256xbf16, #tpu.memory_space<vmem>>, %arg2: memref<256x32xbf16, #tpu.memory_space<vmem>>, %arg3: memref<1x32xf32, #tpu.memory_space<vmem>>, %arg4: memref<1x400x32xbf16, #tpu.memory_space<vmem>>) attributes {dimension_semantics = [#tpu.dimension_semantics<parallel>], iteration_bounds = array<i64: 2>, scalar_prefetch = 0 : i64, scratch_operands = 0 : i64, tpu.core_type = #tpu.core_type<tc>, window_params = [{transform_indices = @transform_0, window_bounds = array<i64: 1, 400, 256>}, {pipeline_mode = #tpu.pipeline_mode<synchronous>, transform_indices = @transform_1, window_bounds = array<i64: 256, 32>}, {pipeline_mode = #tpu.pipeline_mode<synchronous>, transform_indices = @transform_2, window_bounds = array<i64: 1, 32>}, {transform_indices = @transform_3, window_bounds = array<i64: 1, 400, 32>}]} {
    %c0 = arith.constant 0 : index
    %c0_0 = arith.constant 0 : index
    %c0_1 = arith.constant 0 : index
    %0 = vector.load %arg1[%c0, %c0_0, %c0_1] : memref<1x400x256xbf16, #tpu.memory_space<vmem>>, vector<1x400x256xbf16>
    %1 = vector.shape_cast %0 : vector<1x400x256xbf16> to vector<400x256xbf16>
    %c0_2 = arith.constant 0 : index
    %c0_3 = arith.constant 0 : index
    %2 = vector.load %arg2[%c0_2, %c0_3] : memref<256x32xbf16, #tpu.memory_space<vmem>>, vector<256x32xbf16>
    %cst = arith.constant dense<0.000000e+00> : vector<400x32xf32>
    %3 = tpu.matmul %1, %2, %cst {dimension_numbers = #tpu.dot_dimension_numbers<[1], [0], [0], [1], [0, 0, 1, 1], [], []>} : vector<400x256xbf16>, vector<256x32xbf16>, vector<400x32xf32> -> vector<400x32xf32>
    %c0_4 = arith.constant 0 : index
    %c0_5 = arith.constant 0 : index
    %4 = vector.load %arg3[%c0_4, %c0_5] : memref<1x32xf32, #tpu.memory_space<vmem>>, vector<1x32xf32>
    %5 = vector.broadcast %4 : vector<1x32xf32> to vector<400x32xf32>
    %6 = arith.addf %3, %5 : vector<400x32xf32>
    %cst_6 = arith.constant 0.000000e+00 : f32
    %7 = vector.broadcast %cst_6 : f32 to vector<400x32xf32>
    %8 = arith.maximumf %6, %7 : vector<400x32xf32>
    %9 = arith.truncf %8 : vector<400x32xf32> to vector<400x32xbf16>
    %c0_7 = arith.constant 0 : index
    %c0_8 = arith.constant 0 : index
    %c0_9 = arith.constant 0 : index
    %10 = vector.load %arg4[%c0_7, %c0_8, %c0_9] : memref<1x400x32xbf16, #tpu.memory_space<vmem>>, vector<1x400x32xbf16>
    %11 = vector.shape_cast %10 : vector<1x400x32xbf16> to vector<400x32xbf16>
    %12 = vector.shape_cast %9 : vector<400x32xbf16> to vector<1x400x32xbf16>
    tpu.vector_store %arg4[%c0_7, %c0_8, %c0_9], %12 {strides = array<i32>} : memref<1x400x32xbf16, #tpu.memory_space<vmem>>, vector<1x400x32xbf16>,
    return
  }
  func.func @transform_0(%arg0: i32) -> (i32, i32, i32) {
    %c0_i32 = arith.constant 0 : i32
    %c0_i32_0 = arith.constant 0 : i32
    %c0_i32_1 = arith.constant 0 : i32
    return %arg0, %c0_i32, %c0_i32_0 : i32, i32, i32
  }
  func.func @transform_1(%arg0: i32) -> (i32, i32) {
    %c0_i32 = arith.constant 0 : i32
    %c0_i32_0 = arith.constant 0 : i32
    %c0_i32_1 = arith.constant 0 : i32
    return %c0_i32, %c0_i32_0 : i32, i32
  }
  func.func @transform_2(%arg0: i32) -> (i32, i32) {
    %c0_i32 = arith.constant 0 : i32
    %c0_i32_0 = arith.constant 0 : i32
    %c0_i32_1 = arith.constant 0 : i32
    return %c0_i32, %c0_i32_0 : i32, i32
  }
  func.func @transform_3(%arg0: i32) -> (i32, i32, i32) {
    %c0_i32 = arith.constant 0 : i32
    %c0_i32_0 = arith.constant 0 : i32
    %c0_i32_1 = arith.constant 0 : i32
    return %arg0, %c0_i32, %c0_i32_0 : i32, i32, i32
  }
}

module attributes {stable_mosaic.version = 11 : i64} {
  func.func @_conv_block_kernel(%arg0: i32, %arg1: memref<1x81x512xbf16, #tpu.memory_space<vmem>>, %arg2: memref<512x64xbf16, #tpu.memory_space<vmem>>, %arg3: memref<1x64xf32, #tpu.memory_space<vmem>>, %arg4: memref<1x81x64xbf16, #tpu.memory_space<vmem>>) attributes {dimension_semantics = [#tpu.dimension_semantics<parallel>], iteration_bounds = array<i64: 2>, scalar_prefetch = 0 : i64, scratch_operands = 0 : i64, tpu.core_type = #tpu.core_type<tc>, window_params = [{transform_indices = @transform_0, window_bounds = array<i64: 1, 81, 512>}, {pipeline_mode = #tpu.pipeline_mode<synchronous>, transform_indices = @transform_1, window_bounds = array<i64: 512, 64>}, {pipeline_mode = #tpu.pipeline_mode<synchronous>, transform_indices = @transform_2, window_bounds = array<i64: 1, 64>}, {transform_indices = @transform_3, window_bounds = array<i64: 1, 81, 64>}]} {
    %c0 = arith.constant 0 : index
    %c0_0 = arith.constant 0 : index
    %c0_1 = arith.constant 0 : index
    %0 = vector.load %arg1[%c0, %c0_0, %c0_1] : memref<1x81x512xbf16, #tpu.memory_space<vmem>>, vector<1x81x512xbf16>
    %1 = vector.shape_cast %0 : vector<1x81x512xbf16> to vector<81x512xbf16>
    %c0_2 = arith.constant 0 : index
    %c0_3 = arith.constant 0 : index
    %2 = vector.load %arg2[%c0_2, %c0_3] : memref<512x64xbf16, #tpu.memory_space<vmem>>, vector<512x64xbf16>
    %cst = arith.constant dense<0.000000e+00> : vector<81x64xf32>
    %3 = tpu.matmul %1, %2, %cst {dimension_numbers = #tpu.dot_dimension_numbers<[1], [0], [0], [1], [0, 0, 1, 1], [], []>} : vector<81x512xbf16>, vector<512x64xbf16>, vector<81x64xf32> -> vector<81x64xf32>
    %c0_4 = arith.constant 0 : index
    %c0_5 = arith.constant 0 : index
    %4 = vector.load %arg3[%c0_4, %c0_5] : memref<1x64xf32, #tpu.memory_space<vmem>>, vector<1x64xf32>
    %5 = vector.broadcast %4 : vector<1x64xf32> to vector<81x64xf32>
    %6 = arith.addf %3, %5 : vector<81x64xf32>
    %cst_6 = arith.constant 0.000000e+00 : f32
    %7 = vector.broadcast %cst_6 : f32 to vector<81x64xf32>
    %8 = arith.maximumf %6, %7 : vector<81x64xf32>
    %9 = arith.truncf %8 : vector<81x64xf32> to vector<81x64xbf16>
    %c0_7 = arith.constant 0 : index
    %c0_8 = arith.constant 0 : index
    %c0_9 = arith.constant 0 : index
    %10 = vector.load %arg4[%c0_7, %c0_8, %c0_9] : memref<1x81x64xbf16, #tpu.memory_space<vmem>>, vector<1x81x64xbf16>
    %11 = vector.shape_cast %10 : vector<1x81x64xbf16> to vector<81x64xbf16>
    %12 = vector.shape_cast %9 : vector<81x64xbf16> to vector<1x81x64xbf16>
    tpu.vector_store %arg4[%c0_7, %c0_8, %c0_9], %12 {strides = array<i32>} : memref<1x81x64xbf16, #tpu.memory_space<vmem>>, vector<1x81x64xbf16>,
    return
  }
  func.func @transform_0(%arg0: i32) -> (i32, i32, i32) {
    %c0_i32 = arith.constant 0 : i32
    %c0_i32_0 = arith.constant 0 : i32
    %c0_i32_1 = arith.constant 0 : i32
    return %arg0, %c0_i32, %c0_i32_0 : i32, i32, i32
  }
  func.func @transform_1(%arg0: i32) -> (i32, i32) {
    %c0_i32 = arith.constant 0 : i32
    %c0_i32_0 = arith.constant 0 : i32
    %c0_i32_1 = arith.constant 0 : i32
    return %c0_i32, %c0_i32_0 : i32, i32
  }
  func.func @transform_2(%arg0: i32) -> (i32, i32) {
    %c0_i32 = arith.constant 0 : i32
    %c0_i32_0 = arith.constant 0 : i32
    %c0_i32_1 = arith.constant 0 : i32
    return %c0_i32, %c0_i32_0 : i32, i32
  }
  func.func @transform_3(%arg0: i32) -> (i32, i32, i32) {
    %c0_i32 = arith.constant 0 : i32
    %c0_i32_0 = arith.constant 0 : i32
    %c0_i32_1 = arith.constant 0 : i32
    return %arg0, %c0_i32, %c0_i32_0 : i32, i32, i32
  }
}

module attributes {stable_mosaic.version = 11 : i64} {
  func.func @_conv_block_kernel(%arg0: i32, %arg1: memref<1x49x576xbf16, #tpu.memory_space<vmem>>, %arg2: memref<576x64xbf16, #tpu.memory_space<vmem>>, %arg3: memref<1x64xf32, #tpu.memory_space<vmem>>, %arg4: memref<1x49x64xbf16, #tpu.memory_space<vmem>>) attributes {dimension_semantics = [#tpu.dimension_semantics<parallel>], iteration_bounds = array<i64: 2>, scalar_prefetch = 0 : i64, scratch_operands = 0 : i64, tpu.core_type = #tpu.core_type<tc>, window_params = [{transform_indices = @transform_0, window_bounds = array<i64: 1, 49, 576>}, {pipeline_mode = #tpu.pipeline_mode<synchronous>, transform_indices = @transform_1, window_bounds = array<i64: 576, 64>}, {pipeline_mode = #tpu.pipeline_mode<synchronous>, transform_indices = @transform_2, window_bounds = array<i64: 1, 64>}, {transform_indices = @transform_3, window_bounds = array<i64: 1, 49, 64>}]} {
    %c0 = arith.constant 0 : index
    %c0_0 = arith.constant 0 : index
    %c0_1 = arith.constant 0 : index
    %0 = vector.load %arg1[%c0, %c0_0, %c0_1] : memref<1x49x576xbf16, #tpu.memory_space<vmem>>, vector<1x49x576xbf16>
    %1 = vector.shape_cast %0 : vector<1x49x576xbf16> to vector<49x576xbf16>
    %c0_2 = arith.constant 0 : index
    %c0_3 = arith.constant 0 : index
    %2 = vector.load %arg2[%c0_2, %c0_3] : memref<576x64xbf16, #tpu.memory_space<vmem>>, vector<576x64xbf16>
    %cst = arith.constant dense<0.000000e+00> : vector<49x64xf32>
    %3 = tpu.matmul %1, %2, %cst {dimension_numbers = #tpu.dot_dimension_numbers<[1], [0], [0], [1], [0, 0, 1, 1], [], []>} : vector<49x576xbf16>, vector<576x64xbf16>, vector<49x64xf32> -> vector<49x64xf32>
    %c0_4 = arith.constant 0 : index
    %c0_5 = arith.constant 0 : index
    %4 = vector.load %arg3[%c0_4, %c0_5] : memref<1x64xf32, #tpu.memory_space<vmem>>, vector<1x64xf32>
    %5 = vector.broadcast %4 : vector<1x64xf32> to vector<49x64xf32>
    %6 = arith.addf %3, %5 : vector<49x64xf32>
    %cst_6 = arith.constant 0.000000e+00 : f32
    %7 = vector.broadcast %cst_6 : f32 to vector<49x64xf32>
    %8 = arith.maximumf %6, %7 : vector<49x64xf32>
    %9 = arith.truncf %8 : vector<49x64xf32> to vector<49x64xbf16>
    %c0_7 = arith.constant 0 : index
    %c0_8 = arith.constant 0 : index
    %c0_9 = arith.constant 0 : index
    %10 = vector.load %arg4[%c0_7, %c0_8, %c0_9] : memref<1x49x64xbf16, #tpu.memory_space<vmem>>, vector<1x49x64xbf16>
    %11 = vector.shape_cast %10 : vector<1x49x64xbf16> to vector<49x64xbf16>
    %12 = vector.shape_cast %9 : vector<49x64xbf16> to vector<1x49x64xbf16>
    tpu.vector_store %arg4[%c0_7, %c0_8, %c0_9], %12 {strides = array<i32>} : memref<1x49x64xbf16, #tpu.memory_space<vmem>>, vector<1x49x64xbf16>,
    return
  }
  func.func @transform_0(%arg0: i32) -> (i32, i32, i32) {
    %c0_i32 = arith.constant 0 : i32
    %c0_i32_0 = arith.constant 0 : i32
    %c0_i32_1 = arith.constant 0 : i32
    return %arg0, %c0_i32, %c0_i32_0 : i32, i32, i32
  }
  func.func @transform_1(%arg0: i32) -> (i32, i32) {
    %c0_i32 = arith.constant 0 : i32
    %c0_i32_0 = arith.constant 0 : i32
    %c0_i32_1 = arith.constant 0 : i32
    return %c0_i32, %c0_i32_0 : i32, i32
  }
  func.func @transform_2(%arg0: i32) -> (i32, i32) {
    %c0_i32 = arith.constant 0 : i32
    %c0_i32_0 = arith.constant 0 : i32
    %c0_i32_1 = arith.constant 0 : i32
    return %c0_i32, %c0_i32_0 : i32, i32
  }
  func.func @transform_3(%arg0: i32) -> (i32, i32, i32) {
    %c0_i32 = arith.constant 0 : i32
    %c0_i32_0 = arith.constant 0 : i32
    %c0_i32_1 = arith.constant 0 : i32
    return %arg0, %c0_i32, %c0_i32_0 : i32, i32, i32
  }
}

module attributes {stable_mosaic.version = 11 : i64} {
  func.func @_mlp_head_kernel(%arg0: i32, %arg1: memref<2x3136xbf16, #tpu.memory_space<vmem>>, %arg2: memref<3136x512xbf16, #tpu.memory_space<vmem>>, %arg3: memref<1x512xf32, #tpu.memory_space<vmem>>, %arg4: memref<512x128xbf16, #tpu.memory_space<vmem>>, %arg5: memref<1x128xf32, #tpu.memory_space<vmem>>, %arg6: memref<2x128xf32, #tpu.memory_space<vmem>>) attributes {dimension_semantics = [#tpu.dimension_semantics<parallel>], iteration_bounds = array<i64: 1>, scalar_prefetch = 0 : i64, scratch_operands = 0 : i64, tpu.core_type = #tpu.core_type<tc>, window_params = [{transform_indices = @transform_0, window_bounds = array<i64: 2, 3136>}, {pipeline_mode = #tpu.pipeline_mode<synchronous>, transform_indices = @transform_1, window_bounds = array<i64: 3136, 512>}, {pipeline_mode = #tpu.pipeline_mode<synchronous>, transform_indices = @transform_2, window_bounds = array<i64: 1, 512>}, {pipeline_mode = #tpu.pipeline_mode<synchronous>, transform_indices = @transform_3, window_bounds = array<i64: 512, 128>}, {pipeline_mode = #tpu.pipeline_mode<synchronous>, transform_indices = @transform_4, window_bounds = array<i64: 1, 128>}, {transform_indices = @transform_5, window_bounds = array<i64: 2, 128>}]} {
    %c0 = arith.constant 0 : index
    %c0_0 = arith.constant 0 : index
    %0 = vector.load %arg1[%c0, %c0_0] : memref<2x3136xbf16, #tpu.memory_space<vmem>>, vector<2x3136xbf16>
    %c0_1 = arith.constant 0 : index
    %c0_2 = arith.constant 0 : index
    %1 = vector.load %arg2[%c0_1, %c0_2] : memref<3136x512xbf16, #tpu.memory_space<vmem>>, vector<3136x512xbf16>
    %cst = arith.constant dense<0.000000e+00> : vector<2x512xf32>
    %2 = tpu.matmul %0, %1, %cst {dimension_numbers = #tpu.dot_dimension_numbers<[1], [0], [0], [1], [0, 0, 1, 1], [], []>} : vector<2x3136xbf16>, vector<3136x512xbf16>, vector<2x512xf32> -> vector<2x512xf32>
    %c0_3 = arith.constant 0 : index
    %c0_4 = arith.constant 0 : index
    %3 = vector.load %arg3[%c0_3, %c0_4] : memref<1x512xf32, #tpu.memory_space<vmem>>, vector<1x512xf32>
    %4 = vector.broadcast %3 : vector<1x512xf32> to vector<2x512xf32>
    %5 = arith.addf %2, %4 : vector<2x512xf32>
    %cst_5 = arith.constant 0.000000e+00 : f32
    %6 = vector.broadcast %cst_5 : f32 to vector<2x512xf32>
    %7 = arith.maximumf %5, %6 : vector<2x512xf32>
    %8 = arith.truncf %7 : vector<2x512xf32> to vector<2x512xbf16>
    %c0_6 = arith.constant 0 : index
    %c0_7 = arith.constant 0 : index
    %9 = vector.load %arg4[%c0_6, %c0_7] : memref<512x128xbf16, #tpu.memory_space<vmem>>, vector<512x128xbf16>
    %cst_8 = arith.constant dense<0.000000e+00> : vector<2x128xf32>
    %10 = tpu.matmul %8, %9, %cst_8 {dimension_numbers = #tpu.dot_dimension_numbers<[1], [0], [0], [1], [0, 0, 1, 1], [], []>} : vector<2x512xbf16>, vector<512x128xbf16>, vector<2x128xf32> -> vector<2x128xf32>
    %c0_9 = arith.constant 0 : index
    %c0_10 = arith.constant 0 : index
    %11 = vector.load %arg5[%c0_9, %c0_10] : memref<1x128xf32, #tpu.memory_space<vmem>>, vector<1x128xf32>
    %12 = vector.broadcast %11 : vector<1x128xf32> to vector<2x128xf32>
    %13 = arith.addf %10, %12 : vector<2x128xf32>
    %c0_11 = arith.constant 0 : index
    %c0_12 = arith.constant 0 : index
    %14 = vector.load %arg6[%c0_11, %c0_12] : memref<2x128xf32, #tpu.memory_space<vmem>>, vector<2x128xf32>
    tpu.vector_store %arg6[%c0_11, %c0_12], %13 {strides = array<i32>} : memref<2x128xf32, #tpu.memory_space<vmem>>, vector<2x128xf32>,
    return
  }
  func.func @transform_0(%arg0: i32) -> (i32, i32) {
    %c0_i32 = arith.constant 0 : i32
    %c0_i32_0 = arith.constant 0 : i32
    return %arg0, %c0_i32 : i32, i32
  }
  func.func @transform_1(%arg0: i32) -> (i32, i32) {
    %c0_i32 = arith.constant 0 : i32
    %c0_i32_0 = arith.constant 0 : i32
    %c0_i32_1 = arith.constant 0 : i32
    return %c0_i32, %c0_i32_0 : i32, i32
  }
  func.func @transform_2(%arg0: i32) -> (i32, i32) {
    %c0_i32 = arith.constant 0 : i32
    %c0_i32_0 = arith.constant 0 : i32
    %c0_i32_1 = arith.constant 0 : i32
    return %c0_i32, %c0_i32_0 : i32, i32
  }
  func.func @transform_3(%arg0: i32) -> (i32, i32) {
    %c0_i32 = arith.constant 0 : i32
    %c0_i32_0 = arith.constant 0 : i32
    %c0_i32_1 = arith.constant 0 : i32
    return %c0_i32, %c0_i32_0 : i32, i32
  }
  func.func @transform_4(%arg0: i32) -> (i32, i32) {
    %c0_i32 = arith.constant 0 : i32
    %c0_i32_0 = arith.constant 0 : i32
    %c0_i32_1 = arith.constant 0 : i32
    return %c0_i32, %c0_i32_0 : i32, i32
  }
  func.func @transform_5(%arg0: i32) -> (i32, i32) {
    %c0_i32 = arith.constant 0 : i32
    %c0_i32_0 = arith.constant 0 : i32
    return %arg0, %c0_i32 : i32, i32
  }
}

</mosaic_0001>

<bundles_post_ra>
// kernel: convolutional_qnet_forward.4
= control target key start
LH: loop header
LB: loop body
LE: loop exit
PB: predicated region body
PF: predicated region fallthrough
CT: control target
= control target key end

     0   :  { %s1535_s12 = smov 0   ;;  %s1845_s0 = inlined_call_operand.vmem [shape: bf16[2,400,256], index: 0, kind: input, shape index: {}]   ;;  %s1846_s1 = inlined_call_operand.vmem [shape: bf16[256,32], index: 1, kind: input, shape index: {}]   ;;  %s1847_s2 = inlined_call_operand.vmem [shape: f32[1,32], index: 2, kind: input, shape index: {}]   ;;  %s1848_s3 = inlined_call_operand.vmem [shape: bf16[2,400,32], index: 3, kind: output, shape index: {}]  }
   0x1 LB: > { %s1196_s13 = sadd.s32 4294967295, %s1512_s12   ;;  %p1200_p0 = scmp.ge.s32.totalorder %s1512_s12, 1  ;;  %s1512_s12 = sphi %s1535_s12, %s13_s12  }
   0x2   : > { %p137_p1 = scmp.lt.s32.totalorder %s1512_s12, 3 }
   0x4   : > { %p138_p2 = pnand %p1200_p0, %p137_p1 }
   0x5   : > { %p161_p3 = scmp.lt.s32.totalorder (!%p138_p2), %s1196_s13, 1 }
   0x6   : > { %141 = sbr.rel (%p138_p2) target bundleno = 376 (0x178), region = 32 }
   0xb   : > { %v1415_v0 = vld [vmem:[%s1846_s1 + $0x38] sm:$0xff]   ;;  %v1514_v1 = vmov 0   ;;  %v1416_v2 = vld [vmem:[%s1846_s1 + $0x30] sm:$0xff]   ;;  %v1417_v3 = vld [vmem:[%s1846_s1 + $0x28] sm:$0xff]   ;;  %s1850_s13 = smov (!%p161_p3, %s1196_s13), 1  ;;  %vm1090_vm0 = vcmask 257024  }
   0xc   : > { %607 = vmatprep.subr.bf16.mxu0 %v1514_v1  ;;  %1372 = vmatprep.subr.bf16.mxu1 %v1514_v1  ;;  %v1418_v4 = vld [vmem:[%s1846_s1 + $0x20] sm:$0xff]   ;;  %s1404_s22 = smul.u32 400, %s1850_s13  ;;  %v1419_v5 = vld [vmem:[%s1846_s1 + $0x18] sm:$0xff]   ;;  %v1420_v7 = vld [vmem:[%s1846_s1 + $0x10] sm:$0xff]  }
   0xd   : > { %608 = vmatpush1.bf16.msra.mxu0 %v1415_v0  ;;  %1388 = vmatpush1.bf16.msra.mxu1 %v1415_v0  ;;  %v1421_v9 = vld [vmem:[%s1846_s1 + $0x8] sm:$0xff]   ;;  %v1422_v10 = vld [vmem:[%s1846_s1] sm:$0xff]   ;;  %v1423_v11 = vld [vmem:[%s1846_s1 + $0x78] sm:$0xff]   ;;  %s1405_s28 = smul.u32 200, %s1850_s13 }
   0xe   : > { %609 = vmatprep.subr.bf16.mxu0 %v1514_v1  ;;  %1373 = vmatprep.subr.bf16.mxu1 %v1514_v1  ;;  %s1572_s27 = scalar_lea.vmem %s1845_s0, %s1404_s22  ;;  %v1424_v12 = vld [vmem:[%s1846_s1 + $0x70] sm:$0xff]   ;;  %v1425_v13 = vld [vmem:[%s1846_s1 + $0x68] sm:$0xff]   ;;  %v1426_v14 = vld [vmem:[%s1846_s1 + $0x60] sm:$0xff]  }
   0xf   : > { %v1433_v6 = vld [vmem:[%s1572_s27 + $0x4] ss:$8 sps:$4 sm:$0xff]   ;;  %v1436_v8 = vld [vmem:[%s1572_s27 + $0xd4] ss:$8 sps:$4 sm:$0xff]   ;;  %v1431_v19 = vld [vmem:[%s1572_s27] ss:$8 sps:$4 sm:$0xff]  }
  0x10   : > { %639 = vmatprep.mubr.bf16.mxu0 %v1433_v6  ;;  %743 = vmatprep.mubr.bf16.mxu1 %v1436_v8  ;;  %v1427_v15 = vld [vmem:[%s1846_s1 + $0x58] sm:$0xff]   ;;  %v1428_v16 = vld [vmem:[%s1846_s1 + $0x50] sm:$0xff]   ;;  %v1429_v17 = vld [vmem:[%s1846_s1 + $0x48] sm:$0xff]  }
  0x11   : > { %610 = vmatpush1.bf16.msra.mxu0 %v1416_v2  ;;  %1389 = vmatpush1.bf16.msra.mxu1 %v1416_v2  ;;  %v1430_v18 = vld [vmem:[%s1846_s1 + $0x40] sm:$0xff]   ;;  %v1434_v20 = vld [vmem:[%s1572_s27 + $0xd0] ss:$8 sps:$4 sm:$0xff]   ;;  %v1437_v21 = vld [vmem:[%s1572_s27 + $0x14] ss:$8 sps:$4 sm:$0xff]  }
  0x12   : > { %611 = vmatprep.subr.bf16.mxu0 %v1514_v1  ;;  %1374 = vmatprep.subr.bf16.mxu1 %v1514_v1  ;;  %v1440_v22 = vld [vmem:[%s1572_s27 + $0xe4] ss:$8 sps:$4 sm:$0xff]   ;;  %v1439_v23 = vld [vmem:[%s1572_s27 + $0x10] ss:$8 sps:$4 sm:$0xff]   ;;  %v1442_v24 = vld [vmem:[%s1572_s27 + $0xe0] ss:$8 sps:$4 sm:$0xff]  }
  0x13   : > { %v1443_v25 = vld [vmem:[%s1572_s27 + $0x24] ss:$8 sps:$4 sm:$0xff]   ;;  %v1446_v26 = vld [vmem:[%s1572_s27 + $0xf4] ss:$8 sps:$4 sm:$0xff]   ;;  %v1445_v27 = vld [vmem:[%s1572_s27 + $0x20] ss:$8 sps:$4 sm:$0xff]  }
  0x14   : > { %v1448_v28 = vld [vmem:[%s1572_s27 + $0xf0] ss:$8 sps:$4 sm:$0xff]   ;;  %v1449_v29 = vld [vmem:[%s1572_s27 + $0x34] ss:$8 sps:$4 sm:$0xff]   ;;  %v1452_v30 = vld [vmem:[%s1572_s27 + $0x104] ss:$8 sps:$4 sm:$0xff]  }
  0x15   : > { %612 = vmatpush1.bf16.msra.mxu0 %v1417_v3  ;;  %1390 = vmatpush1.bf16.msra.mxu1 %v1417_v3  ;;  %v1451_v31 = vld [vmem:[%s1572_s27 + $0x30] ss:$8 sps:$4 sm:$0xff]   ;;  %v1454_v32 = vld [vmem:[%s1572_s27 + $0x100] ss:$8 sps:$4 sm:$0xff]   ;;  %v1455_v33 = vld [vmem:[%s1572_s27 + $0x44] ss:$8 sps:$4 sm:$0xff]  }
  0x16   : > { %613 = vmatprep.subr.bf16.mxu0 %v1514_v1  ;;  %1375 = vmatprep.subr.bf16.mxu1 %v1514_v1  ;;  %v1458_v34 = vld [vmem:[%s1572_s27 + $0x114] ss:$8 sps:$4 sm:$0xff]   ;;  %v1457_v35 = vld [vmem:[%s1572_s27 + $0x40] ss:$8 sps:$4 sm:$0xff]   ;;  %v1460_v36 = vld [vmem:[%s1572_s27 + $0x110] ss:$8 sps:$4 sm:$0xff]  }
  0x17   : > { %v1461_v37 = vld [vmem:[%s1572_s27 + $0x54] ss:$8 sps:$4 sm:$0xff]   ;;  %v1464_v38 = vld [vmem:[%s1572_s27 + $0x124] ss:$8 sps:$4 sm:$0xff]   ;;  %v1463_v39 = vld [vmem:[%s1572_s27 + $0x50] ss:$8 sps:$4 sm:$0xff]  }
  0x18   : > { %v1466_v40 = vld [vmem:[%s1572_s27 + $0x120] ss:$8 sps:$4 sm:$0xff]   ;;  %v1467_v41 = vld [vmem:[%s1572_s27 + $0x64] ss:$8 sps:$4 sm:$0xff]   ;;  %v1470_v42 = vld [vmem:[%s1572_s27 + $0x134] ss:$8 sps:$4 sm:$0xff]  }
  0x19   : > { %614 = vmatpush1.bf16.msra.mxu0 %v1418_v4  ;;  %1391 = vmatpush1.bf16.msra.mxu1 %v1418_v4  ;;  %v1469_v43 = vld [vmem:[%s1572_s27 + $0x60] ss:$8 sps:$4 sm:$0xff]   ;;  %v1472_v44 = vld [vmem:[%s1572_s27 + $0x130] ss:$8 sps:$4 sm:$0xff]   ;;  %v1473_v45 = vld [vmem:[%s1572_s27 + $0x74] ss:$8 sps:$4 sm:$0xff]  }
  0x1a   : > { %615 = vmatprep.subr.bf16.mxu0 %v1514_v1  ;;  %1376 = vmatprep.subr.bf16.mxu1 %v1514_v1  ;;  %v1476_v46 = vld [vmem:[%s1572_s27 + $0x144] ss:$8 sps:$4 sm:$0xff]   ;;  %v1475_v47 = vld [vmem:[%s1572_s27 + $0x70] ss:$8 sps:$4 sm:$0xff]   ;;  %v1478_v48 = vld [vmem:[%s1572_s27 + $0x140] ss:$8 sps:$4 sm:$0xff]  }
  0x1b   : > { %v1479_v49 = vld [vmem:[%s1572_s27 + $0x84] ss:$8 sps:$4 sm:$0xff]   ;;  %v1482_v50 = vld [vmem:[%s1572_s27 + $0x154] ss:$8 sps:$4 sm:$0xff]   ;;  %v1481_v51 = vld [vmem:[%s1572_s27 + $0x80] ss:$8 sps:$4 sm:$0xff]  }
  0x1c   : > { %v1484_v52 = vld [vmem:[%s1572_s27 + $0x150] ss:$8 sps:$4 sm:$0xff]   ;;  %v1485_v53 = vld [vmem:[%s1572_s27 + $0x94] ss:$8 sps:$4 sm:$0xff]   ;;  %v1488_v54 = vld [vmem:[%s1572_s27 + $0x164] ss:$8 sps:$4 sm:$0xff]  }
  0x1d   : > { %616 = vmatpush1.bf16.msra.mxu0 %v1419_v5  ;;  %1392 = vmatpush1.bf16.msra.mxu1 %v1419_v5  ;;  %v1487_v55 = vld [vmem:[%s1572_s27 + $0x90] ss:$8 sps:$4 sm:$0xff]   ;;  %v1490_v56 = vld [vmem:[%s1572_s27 + $0x160] ss:$8 sps:$4 sm:$0xff]   ;;  %v1491_v57 = vld [vmem:[%s1572_s27 + $0xa4] ss:$8 sps:$4 sm:$0xff]  }
  0x1e   : > { %617 = vmatprep.subr.bf16.mxu0 %v1514_v1  ;;  %1377 = vmatprep.subr.bf16.mxu1 %v1514_v1  ;;  %v1494_v58 = vld [vmem:[%s1572_s27 + $0x174] ss:$8 sps:$4 sm:$0xff]   ;;  %v1493_v59 = vld [vmem:[%s1572_s27 + $0xa0] ss:$8 sps:$4 sm:$0xff]   ;;  %v1496_v60 = vld [vmem:[%s1572_s27 + $0x170] ss:$8 sps:$4 sm:$0xff]  }
  0x1f   : > { %v1497_v61 = vld [vmem:[%s1572_s27 + $0xb4] ss:$8 sps:$4 sm:$0xff]   ;;  %v1500_v62 = vld [vmem:[%s1572_s27 + $0x184] ss:$8 sps:$4 sm:$0xff]   ;;  %v1499_v63 = vld [vmem:[%s1572_s27 + $0xb0] ss:$8 sps:$4 sm:$0xff]  }
  0x20   : > { %v1502_v0 = vld [vmem:[%s1572_s27 + $0x180] ss:$8 sps:$4 sm:$0xff]  }
  0x21   : > { %618 = vmatpush1.bf16.msra.mxu0 %v1420_v7  ;;  %1393 = vmatpush1.bf16.msra.mxu1 %v1420_v7  ;;  %v1505_v2 = vld [vmem:[%s1572_s27 + $0xc0] ss:$8 sps:$4 sm:$0xff]  }
  0x22   : > { %619 = vmatprep.subr.bf16.mxu0 %v1514_v1  ;;  %1378 = vmatprep.subr.bf16.mxu1 %v1514_v1  ;;  %v1684_v3 = vld [vmem:[%s1847_s2] ss:$0 sm:$0xff] }
  0x25   : > { %620 = vmatpush1.bf16.msra.mxu0 %v1421_v9  ;;  %1394 = vmatpush1.bf16.msra.mxu1 %v1421_v9 }
  0x26   : > { %621 = vmatprep.subr.bf16.mxu0 %v1514_v1  ;;  %1379 = vmatprep.subr.bf16.mxu1 %v1514_v1 }
  0x29   : > { %622 = vmatpush1.bf16.msra.mxu0 %v1422_v10  ;;  %1395 = vmatpush1.bf16.msra.mxu1 %v1422_v10 }
  0x2a   : > { %623 = vmatprep.subr.bf16.mxu0 %v1514_v1  ;;  %1380 = vmatprep.subr.bf16.mxu1 %v1514_v1 }
  0x2d   : > { %624 = vmatpush2.bf16.msra.mxu0 %v1423_v11  ;;  %1396 = vmatpush2.bf16.msra.mxu1 %v1423_v11 }
  0x2e   : > { %625 = vmatprep.subr.bf16.mxu0 %v1514_v1  ;;  %1381 = vmatprep.subr.bf16.mxu1 %v1514_v1 }
  0x31   : > { %626 = vmatpush2.bf16.msra.mxu0 %v1424_v12  ;;  %1397 = vmatpush2.bf16.msra.mxu1 %v1424_v12 }
  0x32   : > { %627 = vmatprep.subr.bf16.mxu0 %v1514_v1  ;;  %1382 = vmatprep.subr.bf16.mxu1 %v1514_v1 }
  0x35   : > { %628 = vmatpush2.bf16.msra.mxu0 %v1425_v13  ;;  %1398 = vmatpush2.bf16.msra.mxu1 %v1425_v13 }
  0x36   : > { %629 = vmatprep.subr.bf16.mxu0 %v1514_v1  ;;  %1383 = vmatprep.subr.bf16.mxu1 %v1514_v1 }
  0x39   : > { %630 = vmatpush2.bf16.msra.mxu0 %v1426_v14  ;;  %1399 = vmatpush2.bf16.msra.mxu1 %v1426_v14 }
  0x3a   : > { %631 = vmatprep.subr.bf16.mxu0 %v1514_v1  ;;  %1384 = vmatprep.subr.bf16.mxu1 %v1514_v1 }
  0x3d   : > { %632 = vmatpush2.bf16.msra.mxu0 %v1427_v15  ;;  %1400 = vmatpush2.bf16.msra.mxu1 %v1427_v15 }
  0x3e   : > { %633 = vmatprep.subr.bf16.mxu0 %v1514_v1  ;;  %1385 = vmatprep.subr.bf16.mxu1 %v1514_v1 }
  0x41   : > { %634 = vmatpush2.bf16.msra.mxu0 %v1428_v16  ;;  %1401 = vmatpush2.bf16.msra.mxu1 %v1428_v16 }
  0x42   : > { %635 = vmatprep.subr.bf16.mxu0 %v1514_v1  ;;  %1386 = vmatprep.subr.bf16.mxu1 %v1514_v1 }
  0x45   : > { %636 = vmatpush2.bf16.msra.mxu0 %v1429_v17  ;;  %1402 = vmatpush2.bf16.msra.mxu1 %v1429_v17 }
  0x46   : > { %637 = vmatprep.subr.bf16.mxu0 %v1514_v1  ;;  %1387 = vmatprep.subr.bf16.mxu1 %v1514_v1  ;;  %v1503_v1 = vld [vmem:[%s1572_s27 + $0xc4] ss:$8 sps:$4 sm:$0xff]   ;;  %s1692_s27 = scalar_lea.vmem %s1848_s3, %s1405_s28 }
  0x49   : > { %638 = vmatpush2.bf16.msra.mxu0 %v1430_v18  ;;  %1403 = vmatpush2.bf16.msra.mxu1 %v1430_v18 }
  0x4c   : > { %640 = vmatmul.mubr.bf16.vlgmr.msra.gmra.mxu0 %v1431_v19  ;;  %744 = vmatmul.mubr.bf16.vlgmr.msra.gmra.mxu1 %v1434_v20 }
  0x4d   : > { %647 = vmatprep.mubr.bf16.mxu0 %v1437_v21  ;;  %751 = vmatprep.mubr.bf16.mxu1 %v1440_v22 }
  0x54   : > { %648 = vmatmul.mubr.bf16.gmra.mxu0 %v1439_v23  ;;  %752 = vmatmul.mubr.bf16.gmra.mxu1 %v1442_v24 }
  0x55   : > { %655 = vmatprep.mubr.bf16.mxu0 %v1443_v25  ;;  %759 = vmatprep.mubr.bf16.mxu1 %v1446_v26 }
  0x5c   : > { %656 = vmatmul.mubr.bf16.gmra.mxu0 %v1445_v27  ;;  %760 = vmatmul.mubr.bf16.gmra.mxu1 %v1448_v28 }
  0x5d   : > { %663 = vmatprep.mubr.bf16.mxu0 %v1449_v29  ;;  %767 = vmatprep.mubr.bf16.mxu1 %v1452_v30 }
  0x64   : > { %664 = vmatmul.mubr.bf16.gmra.mxu0 %v1451_v31  ;;  %768 = vmatmul.mubr.bf16.gmra.mxu1 %v1454_v32 }
  0x65   : > { %671 = vmatprep.mubr.bf16.mxu0 %v1455_v33  ;;  %775 = vmatprep.mubr.bf16.mxu1 %v1458_v34 }
  0x6c   : > { %672 = vmatmul.mubr.bf16.gmra.mxu0 %v1457_v35  ;;  %776 = vmatmul.mubr.bf16.gmra.mxu1 %v1460_v36 }
  0x6d   : > { %679 = vmatprep.mubr.bf16.mxu0 %v1461_v37  ;;  %783 = vmatprep.mubr.bf16.mxu1 %v1464_v38 }
  0x74   : > { %680 = vmatmul.mubr.bf16.gmra.mxu0 %v1463_v39  ;;  %784 = vmatmul.mubr.bf16.gmra.mxu1 %v1466_v40 }
  0x75   : > { %687 = vmatprep.mubr.bf16.mxu0 %v1467_v41  ;;  %791 = vmatprep.mubr.bf16.mxu1 %v1470_v42 }
  0x7c   : > { %688 = vmatmul.mubr.bf16.gmra.mxu0 %v1469_v43  ;;  %792 = vmatmul.mubr.bf16.gmra.mxu1 %v1472_v44 }
  0x7d   : > { %695 = vmatprep.mubr.bf16.mxu0 %v1473_v45  ;;  %799 = vmatprep.mubr.bf16.mxu1 %v1476_v46 }
  0x84   : > { %696 = vmatmul.mubr.bf16.gmra.mxu0 %v1475_v47  ;;  %800 = vmatmul.mubr.bf16.gmra.mxu1 %v1478_v48 }
  0x85   : > { %703 = vmatprep.mubr.bf16.mxu0 %v1479_v49  ;;  %807 = vmatprep.mubr.bf16.mxu1 %v1482_v50 }
  0x8c   : > { %704 = vmatmul.mubr.bf16.gmra.mxu0 %v1481_v51  ;;  %808 = vmatmul.mubr.bf16.gmra.mxu1 %v1484_v52 }
  0x8d   : > { %711 = vmatprep.mubr.bf16.mxu0 %v1485_v53  ;;  %815 = vmatprep.mubr.bf16.mxu1 %v1488_v54 }
  0x94   : > { %712 = vmatmul.mubr.bf16.gmra.mxu0 %v1487_v55  ;;  %816 = vmatmul.mubr.bf16.gmra.mxu1 %v1490_v56 }
  0x95   : > { %719 = vmatprep.mubr.bf16.mxu0 %v1491_v57  ;;  %823 = vmatprep.mubr.bf16.mxu1 %v1494_v58 }
  0x9c   : > { %720 = vmatmul.mubr.bf16.gmra.mxu0 %v1493_v59  ;;  %824 = vmatmul.mubr.bf16.gmra.mxu1 %v1496_v60 }
  0x9d   : > { %727 = vmatprep.mubr.bf16.mxu0 %v1497_v61  ;;  %831 = vmatprep.mubr.bf16.mxu1 %v1500_v62 }
  0xa4   : > { %728 = vmatmul.mubr.bf16.gmra.mxu0 %v1499_v63  ;;  %832 = vmatmul.mubr.bf16.gmra.mxu1 %v1502_v0 }
  0xa5   : > { %735 = vmatprep.mubr.bf16.mxu0 %v1503_v1 }
  0xac   : > { %736 = vmatmul.mubr.bf16.gmra.mxu0 %v1505_v2 }
 0x10c   : > { %v641_v4 = vpop.f32.mrf.mxu0  ;;  %v745_v5 = vpop.f32.mrf.mxu1 }
 0x10d   : > { %v642_v6 = vadd.f32 %v1684_v3, %v641_v4  ;;  %v746_v7 = vadd.f32 %v1684_v3, %v745_v5 }
 0x10e   : > { %v643_v8 = vpop.f32.mrf.mxu0  ;;  %v747_v9 = vpop.f32.mrf.mxu1 }
 0x10f   : > { %v840_v10 = vmax.f32 %v642_v6, 0.0  ;;  %v866_v11 = vmax.f32 %v746_v7, 0.0 }
 0x110   : > { %v644_v12 = vpop.f32.mrf.mxu0  ;;  %v748_v13 = vpop.f32.mrf.mxu1 }
 0x111   : > { %v1322_v14 = vpack.c.bf16 %v840_v10, %v840_v10  ;;  %v1348_v15 = vpack.c.bf16 %v866_v11, %v866_v11  ;;  %v645_v16 = vadd.f32 %v1684_v3, %v644_v12  ;;  %v749_v17 = vadd.f32 %v1684_v3, %v748_v13 }
 0x112   : > { %v646_v18 = vpop.f32.mrf.mxu0  ;;  %v750_v19 = vpop.f32.mrf.mxu1 }
 0x113   : > { %1091 = vst.msk [vmem:[%s1692_s27] sm:$0xf] %vm1090_vm0, %v1322_v14  ;;  %1117 = vst.msk [vmem:[%s1692_s27 + $0x68] sm:$0xf] %vm1090_vm0, %v1348_v15  ;;  %v841_v20 = vmax.f32 %v645_v16, 0.0  ;;  %v867_v21 = vmax.f32 %v749_v17, 0.0 }
 0x114   : > { %v649_v22 = vpop.f32.mrf.mxu0  ;;  %v753_v23 = vpop.f32.mrf.mxu1 }
 0x115   : > { %v1323_v24 = vpack.c.bf16 %v841_v20, %v841_v20  ;;  %v1349_v25 = vpack.c.bf16 %v867_v21, %v867_v21  ;;  %v650_v26 = vadd.f32 %v1684_v3, %v649_v22  ;;  %v754_v27 = vadd.f32 %v1684_v3, %v753_v23 }
 0x116   : > { %v651_v28 = vpop.f32.mrf.mxu0  ;;  %v755_v29 = vpop.f32.mrf.mxu1 }
 0x117   : > { %1092 = vst.msk [vmem:[%s1692_s27 + $0x4] sm:$0xf] %vm1090_vm0, %v1323_v24  ;;  %1118 = vst.msk [vmem:[%s1692_s27 + $0x6c] sm:$0xf] %vm1090_vm0, %v1349_v25  ;;  %v842_v30 = vmax.f32 %v650_v26, 0.0  ;;  %v868_v31 = vmax.f32 %v754_v27, 0.0 }
 0x118   : > { %v652_v32 = vpop.f32.mrf.mxu0  ;;  %v756_v33 = vpop.f32.mrf.mxu1 }
 0x119   : > { %v1324_v34 = vpack.c.bf16 %v842_v30, %v842_v30  ;;  %v1350_v35 = vpack.c.bf16 %v868_v31, %v868_v31  ;;  %v653_v36 = vadd.f32 %v1684_v3, %v652_v32  ;;  %v757_v37 = vadd.f32 %v1684_v3, %v756_v33 }
 0x11a   : > { %v654_v38 = vpop.f32.mrf.mxu0  ;;  %v758_v39 = vpop.f32.mrf.mxu1 }
 0x11b   : > { %1093 = vst.msk [vmem:[%s1692_s27 + $0x8] sm:$0xf] %vm1090_vm0, %v1324_v34  ;;  %1119 = vst.msk [vmem:[%s1692_s27 + $0x70] sm:$0xf] %vm1090_vm0, %v1350_v35  ;;  %v843_v40 = vmax.f32 %v653_v36, 0.0  ;;  %v869_v41 = vmax.f32 %v757_v37, 0.0 }
 0x11c   : > { %v657_v42 = vpop.f32.mrf.mxu0  ;;  %v761_v43 = vpop.f32.mrf.mxu1 }
 0x11d   : > { %v1325_v44 = vpack.c.bf16 %v843_v40, %v843_v40  ;;  %v1351_v45 = vpack.c.bf16 %v869_v41, %v869_v41  ;;  %v658_v46 = vadd.f32 %v1684_v3, %v657_v42  ;;  %v762_v47 = vadd.f32 %v1684_v3, %v761_v43 }
 0x11e   : > { %v659_v48 = vpop.f32.mrf.mxu0  ;;  %v763_v49 = vpop.f32.mrf.mxu1 }
 0x11f   : > { %1094 = vst.msk [vmem:[%s1692_s27 + $0xc] sm:$0xf] %vm1090_vm0, %v1325_v44  ;;  %1120 = vst.msk [vmem:[%s1692_s27 + $0x74] sm:$0xf] %vm1090_vm0, %v1351_v45  ;;  %v844_v50 = vmax.f32 %v658_v46, 0.0  ;;  %v870_v51 = vmax.f32 %v762_v47, 0.0 }
 0x120   : > { %v660_v52 = vpop.f32.mrf.mxu0  ;;  %v764_v53 = vpop.f32.mrf.mxu1 }
 0x121   : > { %v1326_v54 = vpack.c.bf16 %v844_v50, %v844_v50  ;;  %v1352_v55 = vpack.c.bf16 %v870_v51, %v870_v51  ;;  %v661_v56 = vadd.f32 %v1684_v3, %v660_v52  ;;  %v765_v57 = vadd.f32 %v1684_v3, %v764_v53 }
 0x122   : > { %v662_v58 = vpop.f32.mrf.mxu0  ;;  %v766_v59 = vpop.f32.mrf.mxu1 }
 0x123   : > { %1095 = vst.msk [vmem:[%s1692_s27 + $0x10] sm:$0xf] %vm1090_vm0, %v1326_v54  ;;  %1121 = vst.msk [vmem:[%s1692_s27 + $0x78] sm:$0xf] %vm1090_vm0, %v1352_v55  ;;  %v845_v60 = vmax.f32 %v661_v56, 0.0  ;;  %v871_v61 = vmax.f32 %v765_v57, 0.0 }
 0x124   : > { %v665_v62 = vpop.f32.mrf.mxu0  ;;  %v769_v63 = vpop.f32.mrf.mxu1 }
 0x125   : > { %v1327_v0 = vpack.c.bf16 %v845_v60, %v845_v60  ;;  %v1353_v1 = vpack.c.bf16 %v871_v61, %v871_v61  ;;  %v666_v2 = vadd.f32 %v1684_v3, %v665_v62  ;;  %v770_v4 = vadd.f32 %v1684_v3, %v769_v63 }
 0x126   : > { %v667_v5 = vpop.f32.mrf.mxu0  ;;  %v771_v6 = vpop.f32.mrf.mxu1 }
 0x127   : > { %1096 = vst.msk [vmem:[%s1692_s27 + $0x14] sm:$0xf] %vm1090_vm0, %v1327_v0  ;;  %1122 = vst.msk [vmem:[%s1692_s27 + $0x7c] sm:$0xf] %vm1090_vm0, %v1353_v1  ;;  %v846_v7 = vmax.f32 %v666_v2, 0.0  ;;  %v872_v8 = vmax.f32 %v770_v4, 0.0 }
 0x128   : > { %v668_v9 = vpop.f32.mrf.mxu0  ;;  %v772_v10 = vpop.f32.mrf.mxu1 }
 0x129   : > { %v1328_v11 = vpack.c.bf16 %v846_v7, %v846_v7  ;;  %v1354_v12 = vpack.c.bf16 %v872_v8, %v872_v8  ;;  %v669_v13 = vadd.f32 %v1684_v3, %v668_v9  ;;  %v773_v14 = vadd.f32 %v1684_v3, %v772_v10 }
 0x12a   : > { %v670_v15 = vpop.f32.mrf.mxu0  ;;  %v774_v16 = vpop.f32.mrf.mxu1 }
 0x12b   : > { %1097 = vst.msk [vmem:[%s1692_s27 + $0x18] sm:$0xf] %vm1090_vm0, %v1328_v11  ;;  %1123 = vst.msk [vmem:[%s1692_s27 + $0x80] sm:$0xf] %vm1090_vm0, %v1354_v12  ;;  %v847_v17 = vmax.f32 %v669_v13, 0.0  ;;  %v873_v18 = vmax.f32 %v773_v14, 0.0 }
 0x12c   : > { %v673_v19 = vpop.f32.mrf.mxu0  ;;  %v777_v20 = vpop.f32.mrf.mxu1 }
 0x12d   : > { %v1329_v21 = vpack.c.bf16 %v847_v17, %v847_v17  ;;  %v1355_v22 = vpack.c.bf16 %v873_v18, %v873_v18  ;;  %v674_v23 = vadd.f32 %v1684_v3, %v673_v19  ;;  %v778_v24 = vadd.f32 %v1684_v3, %v777_v20 }
 0x12e   : > { %v675_v25 = vpop.f32.mrf.mxu0  ;;  %v779_v26 = vpop.f32.mrf.mxu1 }
 0x12f   : > { %1098 = vst.msk [vmem:[%s1692_s27 + $0x1c] sm:$0xf] %vm1090_vm0, %v1329_v21  ;;  %1124 = vst.msk [vmem:[%s1692_s27 + $0x84] sm:$0xf] %vm1090_vm0, %v1355_v22  ;;  %v848_v27 = vmax.f32 %v674_v23, 0.0  ;;  %v874_v28 = vmax.f32 %v778_v24, 0.0 }
 0x130   : > { %v676_v29 = vpop.f32.mrf.mxu0  ;;  %v780_v30 = vpop.f32.mrf.mxu1 }
 0x131   : > { %v1330_v31 = vpack.c.bf16 %v848_v27, %v848_v27  ;;  %v1356_v32 = vpack.c.bf16 %v874_v28, %v874_v28  ;;  %v677_v33 = vadd.f32 %v1684_v3, %v676_v29  ;;  %v781_v34 = vadd.f32 %v1684_v3, %v780_v30 }
 0x132   : > { %v678_v35 = vpop.f32.mrf.mxu0  ;;  %v782_v36 = vpop.f32.mrf.mxu1 }
 0x133   : > { %1099 = vst.msk [vmem:[%s1692_s27 + $0x20] sm:$0xf] %vm1090_vm0, %v1330_v31  ;;  %1125 = vst.msk [vmem:[%s1692_s27 + $0x88] sm:$0xf] %vm1090_vm0, %v1356_v32  ;;  %v849_v37 = vmax.f32 %v677_v33, 0.0  ;;  %v875_v38 = vmax.f32 %v781_v34, 0.0 }
 0x134   : > { %v681_v39 = vpop.f32.mrf.mxu0  ;;  %v785_v40 = vpop.f32.mrf.mxu1 }
 0x135   : > { %v1331_v41 = vpack.c.bf16 %v849_v37, %v849_v37  ;;  %v1357_v42 = vpack.c.bf16 %v875_v38, %v875_v38  ;;  %v682_v43 = vadd.f32 %v1684_v3, %v681_v39  ;;  %v786_v44 = vadd.f32 %v1684_v3, %v785_v40 }
 0x136   : > { %v683_v45 = vpop.f32.mrf.mxu0  ;;  %v787_v46 = vpop.f32.mrf.mxu1 }
 0x137   : > { %1100 = vst.msk [vmem:[%s1692_s27 + $0x24] sm:$0xf] %vm1090_vm0, %v1331_v41  ;;  %1126 = vst.msk [vmem:[%s1692_s27 + $0x8c] sm:$0xf] %vm1090_vm0, %v1357_v42  ;;  %v850_v47 = vmax.f32 %v682_v43, 0.0  ;;  %v876_v48 = vmax.f32 %v786_v44, 0.0 }
 0x138   : > { %v684_v49 = vpop.f32.mrf.mxu0  ;;  %v788_v50 = vpop.f32.mrf.mxu1 }
 0x139   : > { %v1332_v51 = vpack.c.bf16 %v850_v47, %v850_v47  ;;  %v1358_v52 = vpack.c.bf16 %v876_v48, %v876_v48  ;;  %v685_v53 = vadd.f32 %v1684_v3, %v684_v49  ;;  %v789_v54 = vadd.f32 %v1684_v3, %v788_v50 }
 0x13a   : > { %v686_v55 = vpop.f32.mrf.mxu0  ;;  %v790_v56 = vpop.f32.mrf.mxu1 }
 0x13b   : > { %1101 = vst.msk [vmem:[%s1692_s27 + $0x28] sm:$0xf] %vm1090_vm0, %v1332_v51  ;;  %1127 = vst.msk [vmem:[%s1692_s27 + $0x90] sm:$0xf] %vm1090_vm0, %v1358_v52  ;;  %v851_v57 = vmax.f32 %v685_v53, 0.0  ;;  %v877_v58 = vmax.f32 %v789_v54, 0.0 }
 0x13c   : > { %v689_v59 = vpop.f32.mrf.mxu0  ;;  %v793_v60 = vpop.f32.mrf.mxu1 }
 0x13d   : > { %v1333_v61 = vpack.c.bf16 %v851_v57, %v851_v57  ;;  %v1359_v62 = vpack.c.bf16 %v877_v58, %v877_v58  ;;  %v690_v63 = vadd.f32 %v1684_v3, %v689_v59  ;;  %v794_v0 = vadd.f32 %v1684_v3, %v793_v60 }
 0x13e   : > { %v691_v1 = vpop.f32.mrf.mxu0  ;;  %v795_v2 = vpop.f32.mrf.mxu1 }
 0x13f   : > { %1102 = vst.msk [vmem:[%s1692_s27 + $0x2c] sm:$0xf] %vm1090_vm0, %v1333_v61  ;;  %1128 = vst.msk [vmem:[%s1692_s27 + $0x94] sm:$0xf] %vm1090_vm0, %v1359_v62  ;;  %v852_v4 = vmax.f32 %v690_v63, 0.0  ;;  %v878_v5 = vmax.f32 %v794_v0, 0.0 }
 0x140   : > { %v692_v6 = vpop.f32.mrf.mxu0  ;;  %v796_v7 = vpop.f32.mrf.mxu1 }
 0x141   : > { %v1334_v8 = vpack.c.bf16 %v852_v4, %v852_v4  ;;  %v1360_v9 = vpack.c.bf16 %v878_v5, %v878_v5  ;;  %v693_v10 = vadd.f32 %v1684_v3, %v692_v6  ;;  %v797_v11 = vadd.f32 %v1684_v3, %v796_v7 }
 0x142   : > { %v694_v12 = vpop.f32.mrf.mxu0  ;;  %v798_v13 = vpop.f32.mrf.mxu1 }
 0x143   : > { %1103 = vst.msk [vmem:[%s1692_s27 + $0x30] sm:$0xf] %vm1090_vm0, %v1334_v8  ;;  %1129 = vst.msk [vmem:[%s1692_s27 + $0x98] sm:$0xf] %vm1090_vm0, %v1360_v9  ;;  %v853_v14 = vmax.f32 %v693_v10, 0.0  ;;  %v879_v15 = vmax.f32 %v797_v11, 0.0 }
 0x144   : > { %v697_v16 = vpop.f32.mrf.mxu0  ;;  %v801_v17 = vpop.f32.mrf.mxu1 }
 0x145   : > { %v1335_v18 = vpack.c.bf16 %v853_v14, %v853_v14  ;;  %v1361_v19 = vpack.c.bf16 %v879_v15, %v879_v15  ;;  %v698_v20 = vadd.f32 %v1684_v3, %v697_v16  ;;  %v802_v21 = vadd.f32 %v1684_v3, %v801_v17 }
 0x146   : > { %v699_v22 = vpop.f32.mrf.mxu0  ;;  %v803_v23 = vpop.f32.mrf.mxu1 }
 0x147   : > { %1104 = vst.msk [vmem:[%s1692_s27 + $0x34] sm:$0xf] %vm1090_vm0, %v1335_v18  ;;  %1130 = vst.msk [vmem:[%s1692_s27 + $0x9c] sm:$0xf] %vm1090_vm0, %v1361_v19  ;;  %v854_v24 = vmax.f32 %v698_v20, 0.0  ;;  %v880_v25 = vmax.f32 %v802_v21, 0.0 }
 0x148   : > { %v700_v26 = vpop.f32.mrf.mxu0  ;;  %v804_v27 = vpop.f32.mrf.mxu1 }
 0x149   : > { %v1336_v28 = vpack.c.bf16 %v854_v24, %v854_v24  ;;  %v1362_v29 = vpack.c.bf16 %v880_v25, %v880_v25  ;;  %v701_v30 = vadd.f32 %v1684_v3, %v700_v26  ;;  %v805_v31 = vadd.f32 %v1684_v3, %v804_v27 }
 0x14a   : > { %v702_v32 = vpop.f32.mrf.mxu0  ;;  %v806_v33 = vpop.f32.mrf.mxu1 }
 0x14b   : > { %1105 = vst.msk [vmem:[%s1692_s27 + $0x38] sm:$0xf] %vm1090_vm0, %v1336_v28  ;;  %1131 = vst.msk [vmem:[%s1692_s27 + $0xa0] sm:$0xf] %vm1090_vm0, %v1362_v29  ;;  %v855_v34 = vmax.f32 %v701_v30, 0.0  ;;  %v881_v35 = vmax.f32 %v805_v31, 0.0 }
 0x14c   : > { %v705_v36 = vpop.f32.mrf.mxu0  ;;  %v809_v37 = vpop.f32.mrf.mxu1 }
 0x14d   : > { %v1337_v38 = vpack.c.bf16 %v855_v34, %v855_v34  ;;  %v1363_v39 = vpack.c.bf16 %v881_v35, %v881_v35  ;;  %v706_v40 = vadd.f32 %v1684_v3, %v705_v36  ;;  %v810_v41 = vadd.f32 %v1684_v3, %v809_v37 }
 0x14e   : > { %v707_v42 = vpop.f32.mrf.mxu0  ;;  %v811_v43 = vpop.f32.mrf.mxu1 }
 0x14f   : > { %1106 = vst.msk [vmem:[%s1692_s27 + $0x3c] sm:$0xf] %vm1090_vm0, %v1337_v38  ;;  %1132 = vst.msk [vmem:[%s1692_s27 + $0xa4] sm:$0xf] %vm1090_vm0, %v1363_v39  ;;  %v856_v44 = vmax.f32 %v706_v40, 0.0  ;;  %v882_v45 = vmax.f32 %v810_v41, 0.0 }
 0x150   : > { %v708_v46 = vpop.f32.mrf.mxu0  ;;  %v812_v47 = vpop.f32.mrf.mxu1 }
 0x151   : > { %v1338_v48 = vpack.c.bf16 %v856_v44, %v856_v44  ;;  %v1364_v49 = vpack.c.bf16 %v882_v45, %v882_v45  ;;  %v709_v50 = vadd.f32 %v1684_v3, %v708_v46  ;;  %v813_v51 = vadd.f32 %v1684_v3, %v812_v47 }
 0x152   : > { %v710_v52 = vpop.f32.mrf.mxu0  ;;  %v814_v53 = vpop.f32.mrf.mxu1 }
 0x153   : > { %1107 = vst.msk [vmem:[%s1692_s27 + $0x40] sm:$0xf] %vm1090_vm0, %v1338_v48  ;;  %1133 = vst.msk [vmem:[%s1692_s27 + $0xa8] sm:$0xf] %vm1090_vm0, %v1364_v49  ;;  %v857_v54 = vmax.f32 %v709_v50, 0.0  ;;  %v883_v55 = vmax.f32 %v813_v51, 0.0 }
 0x154   : > { %v713_v56 = vpop.f32.mrf.mxu0  ;;  %v817_v57 = vpop.f32.mrf.mxu1 }
 0x155   : > { %v1339_v58 = vpack.c.bf16 %v857_v54, %v857_v54  ;;  %v1365_v59 = vpack.c.bf16 %v883_v55, %v883_v55  ;;  %v714_v60 = vadd.f32 %v1684_v3, %v713_v56  ;;  %v818_v61 = vadd.f32 %v1684_v3, %v817_v57 }
 0x156   : > { %v715_v62 = vpop.f32.mrf.mxu0  ;;  %v819_v63 = vpop.f32.mrf.mxu1 }
 0x157   : > { %1108 = vst.msk [vmem:[%s1692_s27 + $0x44] sm:$0xf] %vm1090_vm0, %v1339_v58  ;;  %1134 = vst.msk [vmem:[%s1692_s27 + $0xac] sm:$0xf] %vm1090_vm0, %v1365_v59  ;;  %v858_v0 = vmax.f32 %v714_v60, 0.0  ;;  %v884_v1 = vmax.f32 %v818_v61, 0.0 }
 0x158   : > { %v716_v2 = vpop.f32.mrf.mxu0  ;;  %v820_v4 = vpop.f32.mrf.mxu1 }
 0x159   : > { %v1340_v5 = vpack.c.bf16 %v858_v0, %v858_v0  ;;  %v1366_v6 = vpack.c.bf16 %v884_v1, %v884_v1  ;;  %v717_v7 = vadd.f32 %v1684_v3, %v716_v2  ;;  %v821_v8 = vadd.f32 %v1684_v3, %v820_v4 }
 0x15a   : > { %v718_v9 = vpop.f32.mrf.mxu0  ;;  %v822_v10 = vpop.f32.mrf.mxu1 }
 0x15b   : > { %1109 = vst.msk [vmem:[%s1692_s27 + $0x48] sm:$0xf] %vm1090_vm0, %v1340_v5  ;;  %1135 = vst.msk [vmem:[%s1692_s27 + $0xb0] sm:$0xf] %vm1090_vm0, %v1366_v6  ;;  %v859_v11 = vmax.f32 %v717_v7, 0.0  ;;  %v885_v12 = vmax.f32 %v821_v8, 0.0 }
 0x15c   : > { %v721_v13 = vpop.f32.mrf.mxu0  ;;  %v825_v14 = vpop.f32.mrf.mxu1 }
 0x15d   : > { %v1341_v15 = vpack.c.bf16 %v859_v11, %v859_v11  ;;  %v1367_v16 = vpack.c.bf16 %v885_v12, %v885_v12  ;;  %v722_v17 = vadd.f32 %v1684_v3, %v721_v13  ;;  %v826_v18 = vadd.f32 %v1684_v3, %v825_v14 }
 0x15e   : > { %v723_v19 = vpop.f32.mrf.mxu0  ;;  %v827_v20 = vpop.f32.mrf.mxu1 }
 0x15f   : > { %1110 = vst.msk [vmem:[%s1692_s27 + $0x4c] sm:$0xf] %vm1090_vm0, %v1341_v15  ;;  %1136 = vst.msk [vmem:[%s1692_s27 + $0xb4] sm:$0xf] %vm1090_vm0, %v1367_v16  ;;  %v860_v21 = vmax.f32 %v722_v17, 0.0  ;;  %v886_v22 = vmax.f32 %v826_v18, 0.0 }
 0x160   : > { %v724_v23 = vpop.f32.mrf.mxu0  ;;  %v828_v24 = vpop.f32.mrf.mxu1 }
 0x161   : > { %v1342_v25 = vpack.c.bf16 %v860_v21, %v860_v21  ;;  %v1368_v26 = vpack.c.bf16 %v886_v22, %v886_v22  ;;  %v725_v27 = vadd.f32 %v1684_v3, %v724_v23  ;;  %v829_v28 = vadd.f32 %v1684_v3, %v828_v24 }
 0x162   : > { %v726_v29 = vpop.f32.mrf.mxu0  ;;  %v830_v30 = vpop.f32.mrf.mxu1 }
 0x163   : > { %1111 = vst.msk [vmem:[%s1692_s27 + $0x50] sm:$0xf] %vm1090_vm0, %v1342_v25  ;;  %1137 = vst.msk [vmem:[%s1692_s27 + $0xb8] sm:$0xf] %vm1090_vm0, %v1368_v26  ;;  %v861_v31 = vmax.f32 %v725_v27, 0.0  ;;  %v887_v32 = vmax.f32 %v829_v28, 0.0 }
 0x164   : > { %v729_v33 = vpop.f32.mrf.mxu0  ;;  %v833_v34 = vpop.f32.mrf.mxu1 }
 0x165   : > { %v1343_v35 = vpack.c.bf16 %v861_v31, %v861_v31  ;;  %v1369_v36 = vpack.c.bf16 %v887_v32, %v887_v32  ;;  %v730_v37 = vadd.f32 %v1684_v3, %v729_v33  ;;  %v834_v38 = vadd.f32 %v1684_v3, %v833_v34 }
 0x166   : > { %v731_v39 = vpop.f32.mrf.mxu0  ;;  %v835_v40 = vpop.f32.mrf.mxu1 }
 0x167   : > { %1112 = vst.msk [vmem:[%s1692_s27 + $0x54] sm:$0xf] %vm1090_vm0, %v1343_v35  ;;  %1138 = vst.msk [vmem:[%s1692_s27 + $0xbc] sm:$0xf] %vm1090_vm0, %v1369_v36  ;;  %v862_v41 = vmax.f32 %v730_v37, 0.0  ;;  %v888_v42 = vmax.f32 %v834_v38, 0.0 }
 0x168   : > { %v732_v43 = vpop.f32.mrf.mxu0  ;;  %v836_v44 = vpop.f32.mrf.mxu1 }
 0x169   : > { %v1344_v45 = vpack.c.bf16 %v862_v41, %v862_v41  ;;  %v1370_v46 = vpack.c.bf16 %v888_v42, %v888_v42  ;;  %v733_v47 = vadd.f32 %v1684_v3, %v732_v43  ;;  %v837_v48 = vadd.f32 %v1684_v3, %v836_v44 }
 0x16a   : > { %v734_v49 = vpop.f32.mrf.mxu0  ;;  %v838_v50 = vpop.f32.mrf.mxu1 }
 0x16b   : > { %1113 = vst.msk [vmem:[%s1692_s27 + $0x58] sm:$0xf] %vm1090_vm0, %v1344_v45  ;;  %1139 = vst.msk [vmem:[%s1692_s27 + $0xc0] sm:$0xf] %vm1090_vm0, %v1370_v46  ;;  %v863_v51 = vmax.f32 %v733_v47, 0.0  ;;  %v889_v52 = vmax.f32 %v837_v48, 0.0 }
 0x16c   : > { %v737_v53 = vpop.f32.mrf.mxu0 }
 0x16d   : > { %v1345_v54 = vpack.c.bf16 %v863_v51, %v863_v51  ;;  %v1371_v55 = vpack.c.bf16 %v889_v52, %v889_v52  ;;  %v738_v56 = vadd.f32 %v1684_v3, %v737_v53 }
 0x16e   : > { %v739_v57 = vpop.f32.mrf.mxu0 }
 0x16f   : > { %1114 = vst.msk [vmem:[%s1692_s27 + $0x5c] sm:$0xf] %vm1090_vm0, %v1345_v54  ;;  %1140 = vst.msk [vmem:[%s1692_s27 + $0xc4] sm:$0xf] %vm1090_vm0, %v1371_v55  ;;  %v864_v58 = vmax.f32 %v738_v56, 0.0 }
 0x170   : > { %v740_v59 = vpop.f32.mrf.mxu0 }
 0x171   : > { %v1346_v60 = vpack.c.bf16 %v864_v58, %v864_v58  ;;  %v741_v61 = vadd.f32 %v1684_v3, %v740_v59 }
 0x172   : > { %v742_v62 = vpop.f32.mrf.mxu0 }
 0x173   : > { %1115 = vst.msk [vmem:[%s1692_s27 + $0x60] sm:$0xf] %vm1090_vm0, %v1346_v60  ;;  %v865_v63 = vmax.f32 %v741_v61, 0.0 }
 0x175   : > { %v1347_v0 = vpack.c.bf16 %v865_v63, %v865_v63 }
 0x177   : > { %1116 = vst.msk [vmem:[%s1692_s27 + $0x64] sm:$0xf] %vm1090_vm0, %v1347_v0 }
 0x178 PF: > { %s13_s12 = sadd.s32 1, %s1512_s12  }
 0x179   : > { %p10_p4 = scmp.ge.s32.totalorder %s13_s12, 4  }
 0x17b   :  { %12 = sbr.rel (!%p10_p4) target bundleno = 1 (0x1), region = 62 }

// kernel: convolutional_qnet_forward.5
= control target key start
LH: loop header
LB: loop body
LE: loop exit
PB: predicated region body
PF: predicated region fallthrough
CT: control target
= control target key end

     0   :  { %s1155_s12 = smov 0   ;;  %s1340_s0 = inlined_call_operand.vmem [shape: bf16[2,81,512], index: 0, kind: input, shape index: {}]   ;;  %s1341_s1 = inlined_call_operand.vmem [shape: bf16[512,64], index: 1, kind: input, shape index: {}]   ;;  %s1342_s2 = inlined_call_operand.vmem [shape: f32[1,64], index: 2, kind: input, shape index: {}]   ;;  %s1343_s3 = inlined_call_operand.vmem [shape: bf16[2,81,64], index: 3, kind: output, shape index: {}]  }
   0x1 LB: > { %s859_s13 = sadd.s32 4294967295, %s1133_s12   ;;  %p863_p0 = scmp.ge.s32.totalorder %s1133_s12, 1  ;;  %s1133_s12 = sphi %s1155_s12, %s13_s12  }
   0x2   : > { %p137_p1 = scmp.lt.s32.totalorder %s1133_s12, 3 }
   0x4   : > { %p138_p2 = pnand %p863_p0, %p137_p1 }
   0x5   : > { %p161_p3 = scmp.lt.s32.totalorder (!%p138_p2), %s859_s13, 1 }
   0x6   : > { %141 = sbr.rel (%p138_p2) target bundleno = 292 (0x124), region = 32 }
   0xb   : > { %v1061_v0 = vld [vmem:[%s1341_s1 + $0x78] sm:$0xff]   ;;  %v1065_v4 = vld [vmem:[%s1341_s1 + $0x70] sm:$0xff]   ;;  %v1069_v8 = vld [vmem:[%s1341_s1 + $0x68] sm:$0xff]   ;;  %s1345_s13 = smov (!%p161_p3, %s859_s13), 1  ;;  %vm787_vm0 = vcmask 519168   ;;  %vm798_vm1 = vcmask 516096  }
   0xc   : > { %v1062_v1 = vld [vmem:[%s1341_s1 + $0xf8] sm:$0xff]   ;;  %947 = vmatprep.subr.bf16.mxu0 %v1061_v0  ;;  %v1066_v5 = vld [vmem:[%s1341_s1 + $0xf0] sm:$0xff]   ;;  %v1070_v9 = vld [vmem:[%s1341_s1 + $0xe8] sm:$0xff]   ;;  %s1051_s16 = smul.u32 176, %s1345_s13  ;;  %vm799_vm2 = vsmask.f32 256 }
   0xd   : > { %v1063_v2 = vld [vmem:[%s1341_s1 + $0x38] sm:$0xff]   ;;  %999 = vmatprep.subr.bf16.mxu1 %v1062_v1  ;;  %v1067_v6 = vld [vmem:[%s1341_s1 + $0x30] sm:$0xff]   ;;  %v1071_v10 = vld [vmem:[%s1341_s1 + $0x28] sm:$0xff]   ;;  %s1052_s7 = smul.u32 44, %s1345_s13 }
   0xe   : > { %v1064_v3 = vld [vmem:[%s1341_s1 + $0xb8] sm:$0xff]   ;;  %948 = vmatpush3.bf16.msra.mxu0 %v1063_v2  ;;  %v1068_v7 = vld [vmem:[%s1341_s1 + $0xb0] sm:$0xff]   ;;  %v1072_v11 = vld [vmem:[%s1341_s1 + $0xa8] sm:$0xff]   ;;  %s1263_s27 = scalar_lea.vmem %s1340_s0, %s1051_s16 }
   0xf   : > { %1000 = vmatpush3.bf16.msra.mxu1 %v1064_v3  ;;  %949 = vmatprep.subr.bf16.mxu0 %v1065_v4  ;;  %v1073_v12 = vld [vmem:[%s1341_s1 + $0x60] sm:$0xff]   ;;  %v1077_v16 = vld [vmem:[%s1341_s1 + $0x58] sm:$0xff]   ;;  %v1081_v20 = vld [vmem:[%s1341_s1 + $0x50] sm:$0xff]   ;;  %s1304_s10 = scalar_lea.vmem %s1343_s3, %s1052_s7 }
  0x10   : > { %1001 = vmatprep.subr.bf16.mxu1 %v1066_v5  ;;  %v1074_v13 = vld [vmem:[%s1341_s1 + $0xe0] sm:$0xff]   ;;  %v1078_v17 = vld [vmem:[%s1341_s1 + $0xd8] sm:$0xff]   ;;  %v1082_v21 = vld [vmem:[%s1341_s1 + $0xd0] sm:$0xff]  }
  0x11   : > { %v1075_v14 = vld [vmem:[%s1341_s1 + $0x20] sm:$0xff]   ;;  %v1079_v18 = vld [vmem:[%s1341_s1 + $0x18] sm:$0xff]   ;;  %v1083_v22 = vld [vmem:[%s1341_s1 + $0x10] sm:$0xff]  }
  0x12   : > { %950 = vmatpush3.bf16.msra.mxu0 %v1067_v6  ;;  %v1076_v15 = vld [vmem:[%s1341_s1 + $0xa0] sm:$0xff]   ;;  %v1080_v19 = vld [vmem:[%s1341_s1 + $0x98] sm:$0xff]   ;;  %v1084_v23 = vld [vmem:[%s1341_s1 + $0x90] sm:$0xff]  }
  0x13   : > { %1002 = vmatpush3.bf16.msra.mxu1 %v1068_v7  ;;  %951 = vmatprep.subr.bf16.mxu0 %v1069_v8  ;;  %v1085_v24 = vld [vmem:[%s1341_s1 + $0x48] sm:$0xff]   ;;  %v1089_v28 = vld [vmem:[%s1341_s1 + $0x40] sm:$0xff]   ;;  %vm800_vm3 = vmand %vm798_vm1, %vm799_vm2 }
  0x14   : > { %1003 = vmatprep.subr.bf16.mxu1 %v1070_v9  ;;  %v1086_v25 = vld [vmem:[%s1341_s1 + $0xc8] sm:$0xff]   ;;  %v1090_v29 = vld [vmem:[%s1341_s1 + $0xc0] sm:$0xff]  }
  0x15   : > { %v1087_v26 = vld [vmem:[%s1341_s1 + $0x8] sm:$0xff]   ;;  %v1091_v30 = vld [vmem:[%s1341_s1] sm:$0xff]  }
  0x16   : > { %952 = vmatpush3.bf16.msra.mxu0 %v1071_v10  ;;  %v1088_v27 = vld [vmem:[%s1341_s1 + $0x88] sm:$0xff]   ;;  %v1092_v31 = vld [vmem:[%s1341_s1 + $0x80] sm:$0xff]  }
  0x17   : > { %1004 = vmatpush3.bf16.msra.mxu1 %v1072_v11  ;;  %953 = vmatprep.subr.bf16.mxu0 %v1073_v12  ;;  %v1093_v32 = vld [vmem:[%s1263_s27] ss:$16 sps:$4 sm:$0xff]   ;;  %v1095_v33 = vld [vmem:[%s1263_s27 + $0x4] ss:$16 sps:$4 sm:$0xff]   ;;  %v1096_v34 = vld [vmem:[%s1263_s27 + $0x8] ss:$16 sps:$4 sm:$0xff]  }
  0x18   : > { %1005 = vmatprep.subr.bf16.mxu1 %v1074_v13  ;;  %v1098_v35 = vld [vmem:[%s1263_s27 + $0xc] ss:$16 sps:$4 sm:$0xff]   ;;  %603 = vmatprep.mubr.bf16.mxu0 %v1095_v33  ;;  %v1099_v36 = vld [vmem:[%s1263_s27 + $0x24] ss:$16 sps:$4 sm:$0xff]   ;;  %v1103_v38 = vld [vmem:[%s1263_s27 + $0x20] ss:$16 sps:$4 sm:$0xff]  }
  0x19   : > { %683 = vmatprep.mubr.bf16.mxu1 %v1098_v35  ;;  %v1101_v37 = vld [vmem:[%s1263_s27 + $0x2c] ss:$16 sps:$4 sm:$0xff]   ;;  %v1104_v39 = vld [vmem:[%s1263_s27 + $0x28] ss:$16 sps:$4 sm:$0xff]   ;;  %v1105_v40 = vld [vmem:[%s1263_s27 + $0x44] ss:$16 sps:$4 sm:$0xff]  }
  0x1a   : > { %954 = vmatpush3.bf16.msra.mxu0 %v1075_v14  ;;  %v1107_v41 = vld [vmem:[%s1263_s27 + $0x4c] ss:$16 sps:$4 sm:$0xff]   ;;  %v1109_v42 = vld [vmem:[%s1263_s27 + $0x40] ss:$16 sps:$4 sm:$0xff]   ;;  %v1110_v43 = vld [vmem:[%s1263_s27 + $0x48] ss:$16 sps:$4 sm:$0xff]  }
  0x1b   : > { %1006 = vmatpush3.bf16.msra.mxu1 %v1076_v15  ;;  %955 = vmatprep.subr.bf16.mxu0 %v1077_v16  ;;  %v1111_v44 = vld [vmem:[%s1263_s27 + $0x64] ss:$16 sps:$4 sm:$0xff]   ;;  %v1113_v45 = vld [vmem:[%s1263_s27 + $0x6c] ss:$16 sps:$4 sm:$0xff]   ;;  %v1115_v46 = vld [vmem:[%s1263_s27 + $0x60] ss:$16 sps:$4 sm:$0xff]  }
  0x1c   : > { %1007 = vmatprep.subr.bf16.mxu1 %v1078_v17  ;;  %v1116_v47 = vld [vmem:[%s1263_s27 + $0x68] ss:$16 sps:$4 sm:$0xff]   ;;  %v1117_v48 = vld [vmem:[%s1263_s27 + $0x84] ss:$16 sps:$4 sm:$0xff]   ;;  %v1119_v49 = vld [vmem:[%s1263_s27 + $0x8c] ss:$16 sps:$4 sm:$0xff]  }
  0x1d   : > { %v192_v50 = vld [vmem:[%s1263_s27 + $0xa0] sm:$0x11]  ;;  %v193_v51 = vld [vmem:[%s1263_s27 + $0xa8] sm:$0x11] }
  0x1e   : > { %956 = vmatpush3.bf16.msra.mxu0 %v1079_v18  ;;  %v1121_v52 = vld [vmem:[%s1263_s27 + $0x80] ss:$16 sps:$4 sm:$0xff]   ;;  %v1122_v53 = vld [vmem:[%s1263_s27 + $0x88] ss:$16 sps:$4 sm:$0xff]   ;;  %v888_v54 = vcombine.high %v192_v50, %v192_v50  ;;  %v890_v55 = vcombine.high %v193_v51, %v193_v51  ;;  %v887_v56 = vcombine.low %v192_v50, %v192_v50  ;;  %v889_v57 = vcombine.low %v193_v51, %v193_v51 }
  0x1f   : > { %1008 = vmatpush3.bf16.msra.mxu1 %v1080_v19  ;;  %957 = vmatprep.subr.bf16.mxu0 %v1081_v20  ;;  %v1296_v60 = vld [vmem:[%s1342_s2] ss:$0 sm:$0xff] }
  0x20   : > { %1009 = vmatprep.subr.bf16.mxu1 %v1082_v21 }
  0x22   : > { %958 = vmatpush3.bf16.msra.mxu0 %v1083_v22 }
  0x23   : > { %1010 = vmatpush3.bf16.msra.mxu1 %v1084_v23  ;;  %959 = vmatprep.subr.bf16.mxu0 %v1085_v24 }
  0x24   : > { %1011 = vmatprep.subr.bf16.mxu1 %v1086_v25 }
  0x26   : > { %960 = vmatpush3.bf16.msra.mxu0 %v1087_v26 }
  0x27   : > { %1012 = vmatpush3.bf16.msra.mxu1 %v1088_v27  ;;  %961 = vmatprep.subr.bf16.mxu0 %v1089_v28 }
  0x28   : > { %1013 = vmatprep.subr.bf16.mxu1 %v1090_v29 }
  0x2a   : > { %962 = vmatpush3.bf16.msra.mxu0 %v1091_v30 }
  0x2b   : > { %1014 = vmatpush3.bf16.msra.mxu1 %v1092_v31 }
  0x2d   : > { %604 = vmatmul.mubr.bf16.vlgmr.msra.gmra.mxu0 %v1093_v32 }
  0x2e   : > { %684 = vmatmul.mubr.bf16.vlgmr.msra.gmra.mxu1 %v1096_v34  ;;  %611 = vmatprep.mubr.bf16.mxu0 %v1099_v36 }
  0x2f   : > { %691 = vmatprep.mubr.bf16.mxu1 %v1101_v37 }
  0x35   : > { %612 = vmatmul.mubr.bf16.gmra.mxu0 %v1103_v38 }
  0x36   : > { %692 = vmatmul.mubr.bf16.gmra.mxu1 %v1104_v39  ;;  %619 = vmatprep.mubr.bf16.mxu0 %v1105_v40 }
  0x37   : > { %699 = vmatprep.mubr.bf16.mxu1 %v1107_v41 }
  0x3d   : > { %620 = vmatmul.mubr.bf16.gmra.mxu0 %v1109_v42 }
  0x3e   : > { %700 = vmatmul.mubr.bf16.gmra.mxu1 %v1110_v43  ;;  %627 = vmatprep.mubr.bf16.mxu0 %v1111_v44 }
  0x3f   : > { %707 = vmatprep.mubr.bf16.mxu1 %v1113_v45 }
  0x45   : > { %628 = vmatmul.mubr.bf16.gmra.mxu0 %v1115_v46 }
  0x46   : > { %708 = vmatmul.mubr.bf16.gmra.mxu1 %v1116_v47  ;;  %635 = vmatprep.mubr.bf16.mxu0 %v1117_v48 }
  0x47   : > { %715 = vmatprep.mubr.bf16.mxu1 %v1119_v49 }
  0x4d   : > { %636 = vmatmul.mubr.bf16.gmra.mxu0 %v1121_v52 }
  0x4e   : > { %716 = vmatmul.mubr.bf16.gmra.mxu1 %v1122_v53  ;;  %643 = vmatprep.mubr.bf16.mxu0 %v888_v54 }
  0x4f   : > { %723 = vmatprep.mubr.bf16.mxu1 %v890_v55 }
  0x55   : > { %644 = vmatmul.mubr.bf16.gmra.mxu0 %v887_v56 }
  0x56   : > { %724 = vmatmul.mubr.bf16.gmra.mxu1 %v889_v57 }
  0xed   : > { %v963_v58 = vpop.f32.mrf.mxu0 }
  0xee   : > { %v1015_v59 = vpop.f32.mrf.mxu1 }
  0xef   : > { %v964_v61 = vpop.f32.mrf.mxu0 }
  0xf0   : > { %v965_v62 = vadd.f32 %v964_v61, %v963_v58  ;;  %v1016_v63 = vpop.f32.mrf.mxu1 }
  0xf1   : > { %v966_v0 = vpop.f32.mrf.mxu0  ;;  %v1017_v2 = vadd.f32 %v1016_v63, %v1015_v59 }
  0xf2   : > { %v606_v1 = vadd.f32 %v965_v62, %v1296_v60  ;;  %v1018_v3 = vpop.f32.mrf.mxu1 }
  0xf3   : > { %v967_v4 = vpop.f32.mrf.mxu0 }
  0xf4   : > { %v686_v5 = vadd.f32 %v1017_v2, %v606_v1  ;;  %v968_v6 = vadd.f32 %v967_v4, %v966_v0  ;;  %v1019_v7 = vpop.f32.mrf.mxu1 }
  0xf5   : > { %v969_v8 = vpop.f32.mrf.mxu0  ;;  %v1020_v11 = vadd.f32 %v1019_v7, %v1018_v3 }
  0xf6   : > { %v731_v9 = vmax.f32 %v686_v5, 0.0  ;;  %v609_v10 = vadd.f32 %v968_v6, %v1296_v60  ;;  %v1021_v12 = vpop.f32.mrf.mxu1 }
  0xf7   : > { %v970_v13 = vpop.f32.mrf.mxu0 }
  0xf8   : > { %v936_v14 = vpack.c.bf16 %v731_v9, %v731_v9  ;;  %v689_v15 = vadd.f32 %v1020_v11, %v609_v10  ;;  %v971_v16 = vadd.f32 %v970_v13, %v969_v8  ;;  %v1022_v17 = vpop.f32.mrf.mxu1 }
  0xf9   : > { %v972_v18 = vpop.f32.mrf.mxu0  ;;  %v1023_v21 = vadd.f32 %v1022_v17, %v1021_v12 }
  0xfa   : > { %788 = vst.msk [vmem:[%s1304_s10] sm:$0xf] %vm787_vm0, %v936_v14  ;;  %v732_v19 = vmax.f32 %v689_v15, 0.0  ;;  %v614_v20 = vadd.f32 %v971_v16, %v1296_v60  ;;  %v1024_v22 = vpop.f32.mrf.mxu1 }
  0xfb   : > { %v973_v23 = vpop.f32.mrf.mxu0 }
  0xfc   : > { %v937_v24 = vpack.c.bf16 %v732_v19, %v732_v19  ;;  %v694_v25 = vadd.f32 %v1023_v21, %v614_v20  ;;  %v974_v26 = vadd.f32 %v973_v23, %v972_v18  ;;  %v1025_v27 = vpop.f32.mrf.mxu1 }
  0xfd   : > { %v975_v28 = vpop.f32.mrf.mxu0  ;;  %v1026_v31 = vadd.f32 %v1025_v27, %v1024_v22 }
  0xfe   : > { %789 = vst.msk [vmem:[%s1304_s10 + $0x4] sm:$0xf] %vm787_vm0, %v937_v24  ;;  %v733_v29 = vmax.f32 %v694_v25, 0.0  ;;  %v617_v30 = vadd.f32 %v974_v26, %v1296_v60  ;;  %v1027_v32 = vpop.f32.mrf.mxu1 }
  0xff   : > { %v976_v33 = vpop.f32.mrf.mxu0 }
 0x100   : > { %v938_v34 = vpack.c.bf16 %v733_v29, %v733_v29  ;;  %v697_v35 = vadd.f32 %v1026_v31, %v617_v30  ;;  %v977_v36 = vadd.f32 %v976_v33, %v975_v28  ;;  %v1028_v37 = vpop.f32.mrf.mxu1 }
 0x101   : > { %v978_v38 = vpop.f32.mrf.mxu0  ;;  %v1029_v41 = vadd.f32 %v1028_v37, %v1027_v32 }
 0x102   : > { %790 = vst.msk [vmem:[%s1304_s10 + $0x8] sm:$0xf] %vm787_vm0, %v938_v34  ;;  %v734_v39 = vmax.f32 %v697_v35, 0.0  ;;  %v622_v40 = vadd.f32 %v977_v36, %v1296_v60  ;;  %v1030_v42 = vpop.f32.mrf.mxu1 }
 0x103   : > { %v979_v43 = vpop.f32.mrf.mxu0 }
 0x104   : > { %v939_v44 = vpack.c.bf16 %v734_v39, %v734_v39  ;;  %v702_v45 = vadd.f32 %v1029_v41, %v622_v40  ;;  %v980_v46 = vadd.f32 %v979_v43, %v978_v38  ;;  %v1031_v47 = vpop.f32.mrf.mxu1 }
 0x105   : > { %v981_v48 = vpop.f32.mrf.mxu0  ;;  %v1032_v51 = vadd.f32 %v1031_v47, %v1030_v42 }
 0x106   : > { %791 = vst.msk [vmem:[%s1304_s10 + $0xc] sm:$0xf] %vm787_vm0, %v939_v44  ;;  %v735_v49 = vmax.f32 %v702_v45, 0.0  ;;  %v625_v50 = vadd.f32 %v980_v46, %v1296_v60  ;;  %v1033_v52 = vpop.f32.mrf.mxu1  ;;  %v801_v45 = vld [vmem:[%s1304_s10 + $0x28] sm:$0x1] }
 0x107   : > { %v982_v53 = vpop.f32.mrf.mxu0 }
 0x108   : > { %v940_v54 = vpack.c.bf16 %v735_v49, %v735_v49  ;;  %v705_v55 = vadd.f32 %v1032_v51, %v625_v50  ;;  %v983_v56 = vadd.f32 %v982_v53, %v981_v48  ;;  %v1034_v57 = vpop.f32.mrf.mxu1 }
 0x109   : > { %v984_v58 = vpop.f32.mrf.mxu0  ;;  %v1035_v62 = vadd.f32 %v1034_v57, %v1033_v52 }
 0x10a   : > { %792 = vst.msk [vmem:[%s1304_s10 + $0x10] sm:$0xf] %vm787_vm0, %v940_v54  ;;  %v736_v59 = vmax.f32 %v705_v55, 0.0  ;;  %v630_v61 = vadd.f32 %v983_v56, %v1296_v60  ;;  %v1036_v63 = vpop.f32.mrf.mxu1 }
 0x10b   : > { %v985_v0 = vpop.f32.mrf.mxu0 }
 0x10c   : > { %v941_v1 = vpack.c.bf16 %v736_v59, %v736_v59  ;;  %v710_v2 = vadd.f32 %v1035_v62, %v630_v61  ;;  %v986_v3 = vadd.f32 %v985_v0, %v984_v58  ;;  %v1037_v4 = vpop.f32.mrf.mxu1 }
 0x10d   : > { %v987_v5 = vpop.f32.mrf.mxu0  ;;  %v1038_v8 = vadd.f32 %v1037_v4, %v1036_v63 }
 0x10e   : > { %793 = vst.msk [vmem:[%s1304_s10 + $0x14] sm:$0xf] %vm787_vm0, %v941_v1  ;;  %v737_v6 = vmax.f32 %v710_v2, 0.0  ;;  %v633_v7 = vadd.f32 %v986_v3, %v1296_v60  ;;  %v1039_v9 = vpop.f32.mrf.mxu1 }
 0x10f   : > { %v988_v10 = vpop.f32.mrf.mxu0 }
 0x110   : > { %v942_v11 = vpack.c.bf16 %v737_v6, %v737_v6  ;;  %v713_v12 = vadd.f32 %v1038_v8, %v633_v7  ;;  %v989_v13 = vadd.f32 %v988_v10, %v987_v5  ;;  %v1040_v14 = vpop.f32.mrf.mxu1 }
 0x111   : > { %v990_v15 = vpop.f32.mrf.mxu0  ;;  %v1041_v18 = vadd.f32 %v1040_v14, %v1039_v9 }
 0x112   : > { %794 = vst.msk [vmem:[%s1304_s10 + $0x18] sm:$0xf] %vm787_vm0, %v942_v11  ;;  %v738_v16 = vmax.f32 %v713_v12, 0.0  ;;  %v638_v17 = vadd.f32 %v989_v13, %v1296_v60  ;;  %v1042_v19 = vpop.f32.mrf.mxu1 }
 0x113   : > { %v991_v20 = vpop.f32.mrf.mxu0 }
 0x114   : > { %v943_v21 = vpack.c.bf16 %v738_v16, %v738_v16  ;;  %v718_v22 = vadd.f32 %v1041_v18, %v638_v17  ;;  %v992_v23 = vadd.f32 %v991_v20, %v990_v15  ;;  %v1043_v24 = vpop.f32.mrf.mxu1 }
 0x115   : > { %v993_v25 = vpop.f32.mrf.mxu0  ;;  %v1044_v28 = vadd.f32 %v1043_v24, %v1042_v19 }
 0x116   : > { %795 = vst.msk [vmem:[%s1304_s10 + $0x1c] sm:$0xf] %vm787_vm0, %v943_v21  ;;  %v739_v26 = vmax.f32 %v718_v22, 0.0  ;;  %v641_v27 = vadd.f32 %v992_v23, %v1296_v60  ;;  %v1045_v29 = vpop.f32.mrf.mxu1 }
 0x117   : > { %v994_v30 = vpop.f32.mrf.mxu0 }
 0x118   : > { %v944_v31 = vpack.c.bf16 %v739_v26, %v739_v26  ;;  %v721_v32 = vadd.f32 %v1044_v28, %v641_v27  ;;  %v995_v33 = vadd.f32 %v994_v30, %v993_v25  ;;  %v1046_v34 = vpop.f32.mrf.mxu1 }
 0x119   : > { %v996_v35 = vpop.f32.mrf.mxu0  ;;  %v1047_v38 = vadd.f32 %v1046_v34, %v1045_v29 }
 0x11a   : > { %796 = vst.msk [vmem:[%s1304_s10 + $0x20] sm:$0xf] %vm787_vm0, %v944_v31  ;;  %v740_v36 = vmax.f32 %v721_v32, 0.0  ;;  %v646_v37 = vadd.f32 %v995_v33, %v1296_v60  ;;  %v1048_v39 = vpop.f32.mrf.mxu1 }
 0x11b   : > { %v997_v40 = vpop.f32.mrf.mxu0 }
 0x11c   : > { %v945_v41 = vpack.c.bf16 %v740_v36, %v740_v36  ;;  %v726_v42 = vadd.f32 %v1047_v38, %v646_v37  ;;  %v1049_v43 = vpop.f32.mrf.mxu1 }
 0x11e   : > { %797 = vst.msk [vmem:[%s1304_s10 + $0x24] sm:$0xf] %vm787_vm0, %v945_v41  ;;  %v741_v44 = vmax.f32 %v726_v42, 0.0 }
 0x120   : > { %v946_v46 = vpack.c.bf16 %v741_v44, %v741_v44 }
 0x122   : > { %v802_v47 = vsel %vm800_vm3, %v946_v46, %v801_v45 }
 0x123   : > { %803 = vst [vmem:[%s1304_s10 + $0x28] sm:$0x1] %v802_v47 }
 0x124 PF: > { %s13_s12 = sadd.s32 1, %s1133_s12  }
 0x125   : > { %p10_p4 = scmp.ge.s32.totalorder %s13_s12, 4  }
 0x127   :  { %12 = sbr.rel (!%p10_p4) target bundleno = 1 (0x1), region = 62 }

// kernel: convolutional_qnet_forward.6
= control target key start
LH: loop header
LB: loop body
LE: loop exit
PB: predicated region body
PF: predicated region fallthrough
CT: control target
= control target key end

     0   :  { %s1185_s12 = smov 0   ;;  %s1364_s0 = inlined_call_operand.vmem [shape: bf16[2,49,576], index: 0, kind: input, shape index: {}]   ;;  %s1365_s1 = inlined_call_operand.vmem [shape: bf16[576,64], index: 1, kind: input, shape index: {}]   ;;  %s1366_s2 = inlined_call_operand.vmem [shape: f32[1,64], index: 2, kind: input, shape index: {}]   ;;  %s1367_s3 = inlined_call_operand.vmem [shape: bf16[2,49,64], index: 3, kind: output, shape index: {}]  }
   0x1 LB: > { %s889_s13 = sadd.s32 4294967295, %s1163_s12   ;;  %p893_p0 = scmp.ge.s32.totalorder %s1163_s12, 1  ;;  %s1163_s12 = sphi %s1185_s12, %s13_s12  }
   0x2   : > { %p137_p1 = scmp.lt.s32.totalorder %s1163_s12, 3 }
   0x4   : > { %p138_p2 = pnand %p893_p0, %p137_p1 }
   0x5   : > { %p161_p3 = scmp.lt.s32.totalorder (!%p138_p2), %s889_s13, 1 }
   0x6   : > { %141 = sbr.rel (%p138_p2) target bundleno = 284 (0x11c), region = 32 }
   0xb   : > { %v1095_v0 = vld [vmem:[%s1365_s1 + $0x78] sm:$0xff]   ;;  %v1099_v4 = vld [vmem:[%s1365_s1 + $0x70] sm:$0xff]   ;;  %v1103_v8 = vld [vmem:[%s1365_s1 + $0x68] sm:$0xff]   ;;  %s1371_s13 = smov (!%p161_p3, %s889_s13), 1  ;;  %vm580_vm0 = vcmask 523264   ;;  %vm828_vm1 = vcmask 516096  }
   0xc   : > { %v1096_v1 = vld [vmem:[%s1365_s1 + $0xf8] sm:$0xff]   ;;  %973 = vmatprep.subr.bf16.mxu0 %v1095_v0  ;;  %v1100_v5 = vld [vmem:[%s1365_s1 + $0xf0] sm:$0xff]   ;;  %v1104_v9 = vld [vmem:[%s1365_s1 + $0xe8] sm:$0xff]   ;;  %s1085_s16 = smul.u32 140, %s1371_s13  ;;  %vm829_vm2 = vsmask.f32 256 }
   0xd   : > { %v1097_v2 = vld [vmem:[%s1365_s1 + $0x38] sm:$0xff]   ;;  %1013 = vmatprep.subr.bf16.mxu1 %v1096_v1  ;;  %v1101_v6 = vld [vmem:[%s1365_s1 + $0x30] sm:$0xff]   ;;  %v1105_v10 = vld [vmem:[%s1365_s1 + $0x28] sm:$0xff]   ;;  %s1086_s17 = smul.u32 28, %s1371_s13  ;;  %vm821_vm3 = vcmask 519168  }
   0xe   : > { %v1098_v3 = vld [vmem:[%s1365_s1 + $0xb8] sm:$0xff]   ;;  %974 = vmatpush3.bf16.msra.mxu0 %v1097_v2  ;;  %v1102_v7 = vld [vmem:[%s1365_s1 + $0xb0] sm:$0xff]   ;;  %v1106_v11 = vld [vmem:[%s1365_s1 + $0xa8] sm:$0xff]   ;;  %s1293_s27 = scalar_lea.vmem %s1364_s0, %s1085_s16 }
   0xf   : > { %1014 = vmatpush3.bf16.msra.mxu1 %v1098_v3  ;;  %975 = vmatprep.subr.bf16.mxu0 %v1099_v4  ;;  %v1107_v12 = vld [vmem:[%s1365_s1 + $0x60] sm:$0xff]   ;;  %v1111_v16 = vld [vmem:[%s1365_s1 + $0x58] sm:$0xff]   ;;  %v1115_v20 = vld [vmem:[%s1365_s1 + $0x50] sm:$0xff]   ;;  %s1338_s20 = scalar_lea.vmem %s1367_s3, %s1086_s17 }
  0x10   : > { %1015 = vmatprep.subr.bf16.mxu1 %v1100_v5  ;;  %v1108_v13 = vld [vmem:[%s1365_s1 + $0xe0] sm:$0xff]   ;;  %v1112_v17 = vld [vmem:[%s1365_s1 + $0xd8] sm:$0xff]   ;;  %v1116_v21 = vld [vmem:[%s1365_s1 + $0xd0] sm:$0xff]  }
  0x11   : > { %v1109_v14 = vld [vmem:[%s1365_s1 + $0x20] sm:$0xff]   ;;  %v1113_v18 = vld [vmem:[%s1365_s1 + $0x18] sm:$0xff]   ;;  %v1117_v22 = vld [vmem:[%s1365_s1 + $0x10] sm:$0xff]  }
  0x12   : > { %976 = vmatpush3.bf16.msra.mxu0 %v1101_v6  ;;  %v1110_v15 = vld [vmem:[%s1365_s1 + $0xa0] sm:$0xff]   ;;  %v1114_v19 = vld [vmem:[%s1365_s1 + $0x98] sm:$0xff]   ;;  %v1118_v23 = vld [vmem:[%s1365_s1 + $0x90] sm:$0xff]  }
  0x13   : > { %1016 = vmatpush3.bf16.msra.mxu1 %v1102_v7  ;;  %977 = vmatprep.subr.bf16.mxu0 %v1103_v8  ;;  %v1119_v24 = vld [vmem:[%s1365_s1 + $0x48] sm:$0xff]   ;;  %v1123_v28 = vld [vmem:[%s1365_s1 + $0x40] sm:$0xff]   ;;  %v1133_v36 = vld [vmem:[%s1365_s1 + $0x118] sm:$0xff]  }
  0x14   : > { %1017 = vmatprep.subr.bf16.mxu1 %v1104_v9  ;;  %v1120_v25 = vld [vmem:[%s1365_s1 + $0xc8] sm:$0xff]   ;;  %v1124_v29 = vld [vmem:[%s1365_s1 + $0xc0] sm:$0xff]   ;;  %v1140_v39 = vld [vmem:[%s1365_s1 + $0x110] sm:$0xff]  }
  0x15   : > { %v1121_v26 = vld [vmem:[%s1365_s1 + $0x8] sm:$0xff]   ;;  %v1125_v30 = vld [vmem:[%s1365_s1] sm:$0xff]   ;;  %v1143_v43 = vld [vmem:[%s1293_s27 + $0x5c] ss:$20 sps:$4 sm:$0xff]  }
  0x16   : > { %978 = vmatpush3.bf16.msra.mxu0 %v1105_v10  ;;  %v1122_v27 = vld [vmem:[%s1365_s1 + $0x88] sm:$0xff]   ;;  %v1126_v31 = vld [vmem:[%s1365_s1 + $0x80] sm:$0xff]   ;;  %v190_v46 = vld [vmem:[%s1293_s27 + $0x78] sm:$0x11] }
  0x17   : > { %1018 = vmatpush3.bf16.msra.mxu1 %v1106_v11  ;;  %979 = vmatprep.subr.bf16.mxu0 %v1107_v12  ;;  %v1127_v32 = vld [vmem:[%s1293_s27] ss:$20 sps:$4 sm:$0xff]   ;;  %v1129_v33 = vld [vmem:[%s1293_s27 + $0x4] ss:$20 sps:$4 sm:$0xff]   ;;  %v1130_v34 = vld [vmem:[%s1293_s27 + $0x8] ss:$20 sps:$4 sm:$0xff]   ;;  %v913_v50 = vcombine.high %v190_v46, %v190_v46  ;;  %v912_v52 = vcombine.low %v190_v46, %v190_v46 }
  0x18   : > { %1019 = vmatprep.subr.bf16.mxu1 %v1108_v13  ;;  %v1132_v35 = vld [vmem:[%s1293_s27 + $0xc] ss:$20 sps:$4 sm:$0xff]   ;;  %625 = vmatprep.mubr.bf16.mxu0 %v1129_v33  ;;  %v1136_v38 = vld [vmem:[%s1293_s27 + $0x34] ss:$20 sps:$4 sm:$0xff]   ;;  %v1139_v41 = vld [vmem:[%s1293_s27 + $0x30] ss:$20 sps:$4 sm:$0xff]  }
  0x19   : > { %689 = vmatprep.mubr.bf16.mxu1 %v1132_v35  ;;  %v1134_v37 = vld [vmem:[%s1293_s27 + $0x2c] ss:$20 sps:$4 sm:$0xff]   ;;  %v1138_v40 = vld [vmem:[%s1293_s27 + $0x28] ss:$20 sps:$4 sm:$0xff]   ;;  %v1145_v48 = vld [vmem:[%s1293_s27 + $0x50] ss:$20 sps:$4 sm:$0xff]  }
  0x1a   : > { %980 = vmatpush3.bf16.msra.mxu0 %v1109_v14  ;;  %v1141_v42 = vld [vmem:[%s1293_s27 + $0x54] ss:$20 sps:$4 sm:$0xff]   ;;  %v1152_v45 = vld [vmem:[%s1365_s1 + $0x100] sm:$0xff]   ;;  %v1146_v49 = vld [vmem:[%s1293_s27 + $0x58] ss:$20 sps:$4 sm:$0xff]  }
  0x1b   : > { %1020 = vmatpush3.bf16.msra.mxu1 %v1110_v15  ;;  %981 = vmatprep.subr.bf16.mxu0 %v1111_v16  ;;  %v1147_v44 = vld [vmem:[%s1365_s1 + $0x108] sm:$0xff]   ;;  %v191_v47 = vld [vmem:[%s1293_s27 + $0x80] sm:$0x11]  ;;  %vm1341_vm4 = vmand %vm828_vm1, %vm829_vm2 }
  0x1c   : > { %1021 = vmatprep.subr.bf16.mxu1 %v1112_v17  ;;  %v915_v51 = vcombine.high %v191_v47, %v191_v47  ;;  %v914_v53 = vcombine.low %v191_v47, %v191_v47  ;;  %v1153_v54 = vld [vmem:[%s1293_s27 + $0x10] ss:$20 sps:$4 sm:$0xff]   ;;  %v1154_v55 = vld [vmem:[%s1293_s27 + $0x60] ss:$20 sps:$4 sm:$0xff]   ;;  %v1155_v56 = vld [vmem:[%s1293_s27 + $0x38] ss:$20 sps:$4 sm:$0xff]  }
  0x1d   : > { %v1156_v57 = vld [vmem:[%s1293_s27 + $0x88] ss:$0 sps:$4 sm:$0x11]  }
  0x1e   : > { %982 = vmatpush3.bf16.msra.mxu0 %v1113_v18 }
  0x1f   : > { %1022 = vmatpush3.bf16.msra.mxu1 %v1114_v19  ;;  %983 = vmatprep.subr.bf16.mxu0 %v1115_v20 }
  0x20   : > { %1023 = vmatprep.subr.bf16.mxu1 %v1116_v21  ;;  %v896_v21 = vld [vmem:[%s1366_s2] ss:$0 sm:$0xff] }
  0x22   : > { %984 = vmatpush3.bf16.msra.mxu0 %v1117_v22 }
  0x23   : > { %1024 = vmatpush3.bf16.msra.mxu1 %v1118_v23  ;;  %985 = vmatprep.subr.bf16.mxu0 %v1119_v24 }
  0x24   : > { %1025 = vmatprep.subr.bf16.mxu1 %v1120_v25 }
  0x26   : > { %986 = vmatpush3.bf16.msra.mxu0 %v1121_v26 }
  0x27   : > { %1026 = vmatpush3.bf16.msra.mxu1 %v1122_v27  ;;  %987 = vmatprep.subr.bf16.mxu0 %v1123_v28 }
  0x28   : > { %1027 = vmatprep.subr.bf16.mxu1 %v1124_v29 }
  0x2a   : > { %988 = vmatpush3.bf16.msra.mxu0 %v1125_v30 }
  0x2b   : > { %1028 = vmatpush3.bf16.msra.mxu1 %v1126_v31  ;;  %1061 = vmatprep.subr.bf16.mxu0 %v1133_v36 }
  0x2c   : > { %1077 = vmatprep.subr.bf16.mxu1 %v1133_v36 }
  0x2d   : > { %626 = vmatmul.mubr.bf16.vlgmr.msra.gmra.mxu0 %v1127_v32 }
  0x2e   : > { %690 = vmatmul.mubr.bf16.vlgmr.msra.gmra.mxu1 %v1130_v34  ;;  %1062 = vmatpush3.bf16.msra.mxu0 %v1133_v36 }
  0x2f   : > { %1081 = vmatpush3.bf16.msra.mxu1 %v1133_v36  ;;  %633 = vmatprep.mubr.bf16.mxu0 %v1134_v37 }
  0x30   : > { %697 = vmatprep.mubr.bf16.mxu1 %v1136_v38  ;;  %1063 = vmatprep.subr.bf16.mxu0 %v1140_v39 }
  0x31   : > { %1078 = vmatprep.subr.bf16.mxu1 %v1140_v39 }
  0x32   : > { %1064 = vmatpush3.bf16.msra.mxu0 %v1140_v39 }
  0x33   : > { %1082 = vmatpush3.bf16.msra.mxu1 %v1140_v39  ;;  %1065 = vmatprep.subr.bf16.mxu0 %v1147_v44 }
  0x34   : > { %1079 = vmatprep.subr.bf16.mxu1 %v1147_v44 }
  0x35   : > { %634 = vmatmul.mubr.bf16.gmra.mxu0 %v1138_v40 }
  0x36   : > { %698 = vmatmul.mubr.bf16.gmra.mxu1 %v1139_v41  ;;  %641 = vmatprep.mubr.bf16.mxu0 %v1141_v42 }
  0x37   : > { %705 = vmatprep.mubr.bf16.mxu1 %v1143_v43  ;;  %1066 = vmatpush3.bf16.msra.mxu0 %v1147_v44 }
  0x38   : > { %1083 = vmatpush3.bf16.msra.mxu1 %v1147_v44  ;;  %1067 = vmatprep.subr.bf16.mxu0 %v1152_v45 }
  0x39   : > { %1080 = vmatprep.subr.bf16.mxu1 %v1152_v45 }
  0x3b   : > { %1068 = vmatpush3.bf16.msra.mxu0 %v1152_v45 }
  0x3c   : > { %1084 = vmatpush3.bf16.msra.mxu1 %v1152_v45 }
  0x3d   : > { %642 = vmatmul.mubr.bf16.gmra.mxu0 %v1145_v48 }
  0x3e   : > { %706 = vmatmul.mubr.bf16.gmra.mxu1 %v1146_v49  ;;  %649 = vmatprep.mubr.bf16.mxu0 %v913_v50 }
  0x3f   : > { %713 = vmatprep.mubr.bf16.mxu1 %v915_v51 }
  0x45   : > { %650 = vmatmul.mubr.bf16.gmra.mxu0 %v912_v52 }
  0x46   : > { %714 = vmatmul.mubr.bf16.gmra.mxu1 %v914_v53  ;;  %1069 = vmatprep.mubr.msk.bf16.mxu0 %vm580_vm0, %v1153_v54 }
  0x47   : > { %1073 = vmatprep.mubr.msk.bf16.mxu1 %vm580_vm0, %v1154_v55 }
  0x4d   : > { %1070 = vmatmul.mubr.msk.bf16.vlgmr.msra.gmra.mxu0 %vm580_vm0, %v1155_v56 }
  0x4e   : > { %1074 = vmatmul.mubr.msk.bf16.vlgmr.msra.gmra.mxu1 %vm580_vm0, %v1156_v57 }
  0xed   : > { %v989_v58 = vpop.f32.mrf.mxu0 }
  0xee   : > { %v1029_v59 = vpop.f32.mrf.mxu1 }
  0xef   : > { %v990_v60 = vpop.f32.mrf.mxu0 }
  0xf0   : > { %v1030_v61 = vpop.f32.mrf.mxu1  ;;  %v991_v19 = vadd.f32 %v990_v60, %v989_v58 }
  0xf1   : > { %v992_v62 = vpop.f32.mrf.mxu0  ;;  %v1031_v39 = vadd.f32 %v1030_v61, %v1029_v59 }
  0xf2   : > { %v1032_v63 = vpop.f32.mrf.mxu1  ;;  %v628_v29 = vadd.f32 %v991_v19, %v896_v21 }
  0xf3   : > { %v993_v0 = vpop.f32.mrf.mxu0 }
  0xf4   : > { %v1033_v1 = vpop.f32.mrf.mxu1  ;;  %v994_v31 = vadd.f32 %v993_v0, %v992_v62  ;;  %v692_v50 = vadd.f32 %v1031_v39, %v628_v29 }
  0xf5   : > { %v995_v2 = vpop.f32.mrf.mxu0  ;;  %v1034_v55 = vadd.f32 %v1033_v1, %v1032_v63 }
  0xf6   : > { %v1035_v3 = vpop.f32.mrf.mxu1  ;;  %v631_v46 = vadd.f32 %v994_v31, %v896_v21 }
  0xf7   : > { %v996_v4 = vpop.f32.mrf.mxu0 }
  0xf8   : > { %v1036_v5 = vpop.f32.mrf.mxu1  ;;  %v997_v17 = vadd.f32 %v996_v4, %v995_v2  ;;  %v831_v4 = vld [vmem:[%s1338_s20 + $0x18] sm:$0x1] }
  0xf9   : > { %v998_v6 = vpop.f32.mrf.mxu0  ;;  %v1037_v32 = vadd.f32 %v1036_v5, %v1035_v3 }
  0xfa   : > { %v1038_v7 = vpop.f32.mrf.mxu1  ;;  %v636_v25 = vadd.f32 %v997_v17, %v896_v21 }
  0xfb   : > { %v999_v8 = vpop.f32.mrf.mxu0 }
  0xfc   : > { %v1039_v9 = vpop.f32.mrf.mxu1  ;;  %v1000_v26 = vadd.f32 %v999_v8, %v998_v6  ;;  %v700_v42 = vadd.f32 %v1037_v32, %v636_v25  ;;  %v695_v6 = vadd.f32 %v1034_v55, %v631_v46 }
  0xfd   : > { %v1001_v10 = vpop.f32.mrf.mxu0  ;;  %v1040_v47 = vadd.f32 %v1039_v9, %v1038_v7 }
  0xfe   : > { %v1041_v11 = vpop.f32.mrf.mxu1  ;;  %v639_v40 = vadd.f32 %v1000_v26, %v896_v21 }
  0xff   : > { %v1002_v12 = vpop.f32.mrf.mxu0 }
 0x100   : > { %v1042_v13 = vpop.f32.mrf.mxu1  ;;  %v1003_v23 = vadd.f32 %v1002_v12, %v1001_v10  ;;  %v703_v59 = vadd.f32 %v1040_v47, %v639_v40 }
 0x101   : > { %v1004_v14 = vpop.f32.mrf.mxu0  ;;  %v1043_v44 = vadd.f32 %v1042_v13, %v1041_v11 }
 0x102   : > { %v1044_v15 = vpop.f32.mrf.mxu1  ;;  %v644_v36 = vadd.f32 %v1003_v23, %v896_v21 }
 0x103   : > { %v1005_v16 = vpop.f32.mrf.mxu0 }
 0x104   : > { %v1045_v18 = vpop.f32.mrf.mxu1  ;;  %v1006_v37 = vadd.f32 %v1005_v16, %v1004_v14  ;;  %v708_v54 = vadd.f32 %v1043_v44, %v644_v36 }
 0x105   : > { %v1007_v20 = vpop.f32.mrf.mxu0  ;;  %v1046_v60 = vadd.f32 %v1045_v18, %v1044_v15 }
 0x106   : > { %v1047_v22 = vpop.f32.mrf.mxu1  ;;  %v647_v51 = vadd.f32 %v1006_v37, %v896_v21 }
 0x107   : > { %v1008_v24 = vpop.f32.mrf.mxu0 }
 0x108   : > { %v1009_v27 = vadd.f32 %v1008_v24, %v1007_v20  ;;  %v1048_v28 = vpop.f32.mrf.mxu1  ;;  %v711_v10 = vadd.f32 %v1046_v60, %v647_v51 }
 0x109   : > { %v1010_v30 = vpop.f32.mrf.mxu0  ;;  %v1049_v34 = vadd.f32 %v1048_v28, %v1047_v22 }
 0x10a   : > { %v652_v33 = vadd.f32 %v1009_v27, %v896_v21  ;;  %v1050_v35 = vpop.f32.mrf.mxu1 }
 0x10b   : > { %v1011_v38 = vpop.f32.mrf.mxu0 }
 0x10c   : > { %v1051_v41 = vpop.f32.mrf.mxu1  ;;  %v716_v43 = vadd.f32 %v1049_v34, %v652_v33 }
 0x10d   : > { %v1071_v45 = vpop.f32.mrf.mxu0 }
 0x10e   : > { %v764_v48 = vadd.f32 %v1071_v45, %v700_v42  ;;  %v1075_v49 = vpop.f32.mrf.mxu1 }
 0x10f   : > { %v780_v52 = vadd.f32 %v1075_v49, %v716_v43  ;;  %v755_v53 = vpop.f32.mrf.mxu0 }
 0x110   : > { %v787_v56 = vmax.f32 %v764_v48, 0.0  ;;  %v756_v57 = vadd.f32 %v755_v53, %v692_v50  ;;  %v771_v58 = vpop.f32.mrf.mxu1 }
 0x111   : > { %v791_v61 = vmax.f32 %v780_v52, 0.0  ;;  %v772_v62 = vadd.f32 %v771_v58, %v708_v54  ;;  %v1072_v0 = vpop.f32.mrf.mxu0 }
 0x112   : > { %v968_v2 = vpack.c.bf16 %v787_v56, %v787_v56  ;;  %v785_v5 = vmax.f32 %v756_v57, 0.0  ;;  %v767_v63 = vadd.f32 %v1072_v0, %v703_v59  ;;  %v1076_v1 = vpop.f32.mrf.mxu1 }
 0x113   : > { %v972_v7 = vpack.c.bf16 %v791_v61, %v791_v61  ;;  %v789_v8 = vmax.f32 %v772_v62, 0.0  ;;  %v758_v9 = vpop.f32.mrf.mxu0 }
 0x114   : > { %824 = vst.msk [vmem:[%s1338_s20 + $0x8] sm:$0xf] %vm821_vm3, %v968_v2  ;;  %v966_v11 = vpack.c.bf16 %v785_v5, %v785_v5  ;;  %v788_v12 = vmax.f32 %v767_v63, 0.0  ;;  %v759_v13 = vadd.f32 %v758_v9, %v695_v6  ;;  %v774_v14 = vpop.f32.mrf.mxu1 }
 0x115   : > { %v832_v15 = vsel %vm1341_vm4, %v972_v7, %v831_v4  ;;  %v970_v16 = vpack.c.bf16 %v789_v8, %v789_v8  ;;  %v775_v17 = vadd.f32 %v774_v14, %v711_v10 }
 0x116   : > { %833 = vst [vmem:[%s1338_s20 + $0x18] sm:$0x1] %v832_v15  ;;  %822 = vst.msk [vmem:[%s1338_s20] sm:$0xf] %vm821_vm3, %v966_v11  ;;  %v969_v18 = vpack.c.bf16 %v788_v12, %v788_v12  ;;  %v786_v19 = vmax.f32 %v759_v13, 0.0 }
 0x117   : > { %826 = vst.msk [vmem:[%s1338_s20 + $0x10] sm:$0xf] %vm821_vm3, %v970_v16  ;;  %v790_v20 = vmax.f32 %v775_v17, 0.0 }
 0x118   : > { %825 = vst.msk [vmem:[%s1338_s20 + $0xc] sm:$0xf] %vm821_vm3, %v969_v18  ;;  %v967_v21 = vpack.c.bf16 %v786_v19, %v786_v19 }
 0x119   : > { %v971_v22 = vpack.c.bf16 %v790_v20, %v790_v20 }
 0x11a   : > { %823 = vst.msk [vmem:[%s1338_s20 + $0x4] sm:$0xf] %vm821_vm3, %v967_v21 }
 0x11b   : > { %827 = vst.msk [vmem:[%s1338_s20 + $0x14] sm:$0xf] %vm821_vm3, %v971_v22 }
 0x11c PF: > { %s13_s12 = sadd.s32 1, %s1163_s12  }
 0x11d   : > { %p10_p4 = scmp.ge.s32.totalorder %s13_s12, 4  }
 0x11f   :  { %12 = sbr.rel (!%p10_p4) target bundleno = 1 (0x1), region = 62 }

// kernel: convolutional_qnet_forward.7
= control target key start
LH: loop header
LB: loop body
LE: loop exit
PB: predicated region body
PF: predicated region fallthrough
CT: control target
= control target key end

     0   :  { %v812_v36 = vlaneseq  ;;  %v8478_v37 = vmov 1966171168   ;;  %vm4941_vm0 = vcmask 523264   ;;  %s11222_s0 = inlined_call_operand.vmem [shape: bf16[2,3136], index: 0, kind: input, shape index: {}]   ;;  %s11223_s1 = inlined_call_operand.vmem [shape: bf16[3136,512], index: 1, kind: input, shape index: {}]   ;;  %s11224_s2 = inlined_call_operand.vmem [shape: f32[1,512], index: 2, kind: input, shape index: {}]   ;;  %s11225_s3 = inlined_call_operand.vmem [shape: bf16[512,128], index: 3, kind: input, shape index: {}]   ;;  %s11226_s4 = inlined_call_operand.vmem [shape: f32[1,128], index: 4, kind: input, shape index: {}]   ;;  %s11227_s5 = inlined_call_operand.hbm [shape: f32[2,128], index: 5, kind: output, shape index: {}]  }
   0x1   :  { %v7244_v0 = vld [vmem:[%s11223_s1 + $0xe4] ss:$16 sps:$4 sm:$0xff]   ;;  %v7248_v2 = vld [vmem:[%s11223_s1 + $0xe0] ss:$16 sps:$4 sm:$0xff]   ;;  %v838_v38 = vunpack.c.l.s4 %v8478_v37 }
   0x2   :  { %v7246_v1 = vld [vmem:[%s11223_s1 + $0x2e4] ss:$16 sps:$4 sm:$0xff]   ;;  %4945 = vmatprep.subr.bf16.mxu0 %v7244_v0  ;;  %v7249_v3 = vld [vmem:[%s11223_s1 + $0x2e0] ss:$16 sps:$4 sm:$0xff]   ;;  %v8628_v42 = vshrl.u32 %v812_v36, 7 }
   0x3   :  { %4986 = vmatprep.subr.bf16.mxu1 %v7246_v1  ;;  %v7250_v4 = vld [vmem:[%s11223_s1 + $0xc4] ss:$16 sps:$4 sm:$0xff]   ;;  %4946 = vmatpush1.bf16.msra.mxu0 %v7248_v2  ;;  %v7254_v6 = vld [vmem:[%s11223_s1 + $0xc0] ss:$16 sps:$4 sm:$0xff]   ;;  %v839_v43 = vunpack.c.0.s8 %v838_v38 }
   0x4   :  { %4987 = vmatpush1.bf16.msra.mxu1 %v7249_v3  ;;  %v7252_v5 = vld [vmem:[%s11223_s1 + $0x2c4] ss:$16 sps:$4 sm:$0xff]   ;;  %4947 = vmatprep.subr.bf16.mxu0 %v7250_v4  ;;  %v7255_v7 = vld [vmem:[%s11223_s1 + $0x2c0] ss:$16 sps:$4 sm:$0xff]  }
   0x5   :  { %4988 = vmatprep.subr.bf16.mxu1 %v7252_v5  ;;  %v7256_v8 = vld [vmem:[%s11223_s1 + $0xa4] ss:$16 sps:$4 sm:$0xff]   ;;  %v7260_v10 = vld [vmem:[%s11223_s1 + $0xa0] ss:$16 sps:$4 sm:$0xff]   ;;  %v8646_v49 = vsub.s32 %v839_v43, %v8628_v42 }
   0x6   :  { %v7258_v9 = vld [vmem:[%s11223_s1 + $0x2a4] ss:$16 sps:$4 sm:$0xff]   ;;  %v7261_v11 = vld [vmem:[%s11223_s1 + $0x2a0] ss:$16 sps:$4 sm:$0xff]  }
   0x7   :  { %4948 = vmatpush1.bf16.msra.mxu0 %v7254_v6  ;;  %v7262_v12 = vld [vmem:[%s11223_s1 + $0x84] ss:$16 sps:$4 sm:$0xff]   ;;  %v7266_v14 = vld [vmem:[%s11223_s1 + $0x80] ss:$16 sps:$4 sm:$0xff]  }
   0x8   :  { %4989 = vmatpush1.bf16.msra.mxu1 %v7255_v7  ;;  %4949 = vmatprep.subr.bf16.mxu0 %v7256_v8  ;;  %v7264_v13 = vld [vmem:[%s11223_s1 + $0x284] ss:$16 sps:$4 sm:$0xff]   ;;  %v7267_v15 = vld [vmem:[%s11223_s1 + $0x280] ss:$16 sps:$4 sm:$0xff]  }
   0x9   :  { %4990 = vmatprep.subr.bf16.mxu1 %v7258_v9  ;;  %v7268_v16 = vld [vmem:[%s11223_s1 + $0x64] ss:$16 sps:$4 sm:$0xff]   ;;  %v7272_v18 = vld [vmem:[%s11223_s1 + $0x60] ss:$16 sps:$4 sm:$0xff]  }
   0xa   :  { %v7270_v17 = vld [vmem:[%s11223_s1 + $0x264] ss:$16 sps:$4 sm:$0xff]   ;;  %v7273_v19 = vld [vmem:[%s11223_s1 + $0x260] ss:$16 sps:$4 sm:$0xff]  }
   0xb   :  { %4950 = vmatpush1.bf16.msra.mxu0 %v7260_v10  ;;  %v7274_v20 = vld [vmem:[%s11223_s1 + $0x44] ss:$16 sps:$4 sm:$0xff]   ;;  %v7278_v22 = vld [vmem:[%s11223_s1 + $0x40] ss:$16 sps:$4 sm:$0xff]  }
   0xc   :  { %4991 = vmatpush1.bf16.msra.mxu1 %v7261_v11  ;;  %4951 = vmatprep.subr.bf16.mxu0 %v7262_v12  ;;  %v7276_v21 = vld [vmem:[%s11223_s1 + $0x244] ss:$16 sps:$4 sm:$0xff]   ;;  %v7279_v23 = vld [vmem:[%s11223_s1 + $0x240] ss:$16 sps:$4 sm:$0xff]  }
   0xd   :  { %4992 = vmatprep.subr.bf16.mxu1 %v7264_v13  ;;  %v7280_v24 = vld [vmem:[%s11223_s1 + $0x24] ss:$16 sps:$4 sm:$0xff]   ;;  %v7284_v26 = vld [vmem:[%s11223_s1 + $0x20] ss:$16 sps:$4 sm:$0xff]  }
   0xe   :  { %v7282_v25 = vld [vmem:[%s11223_s1 + $0x224] ss:$16 sps:$4 sm:$0xff]   ;;  %v7285_v27 = vld [vmem:[%s11223_s1 + $0x220] ss:$16 sps:$4 sm:$0xff]  }
   0xf   :  { %4952 = vmatpush1.bf16.msra.mxu0 %v7266_v14  ;;  %v7286_v28 = vld [vmem:[%s11223_s1 + $0x4] ss:$16 sps:$4 sm:$0xff]   ;;  %v7290_v30 = vld [vmem:[%s11223_s1] ss:$16 sps:$4 sm:$0xff]  }
  0x10   :  { %4993 = vmatpush1.bf16.msra.mxu1 %v7267_v15  ;;  %4953 = vmatprep.subr.bf16.mxu0 %v7268_v16  ;;  %v7288_v29 = vld [vmem:[%s11223_s1 + $0x204] ss:$16 sps:$4 sm:$0xff]   ;;  %v7291_v31 = vld [vmem:[%s11223_s1 + $0x200] ss:$16 sps:$4 sm:$0xff]  }
  0x11   :  { %4994 = vmatprep.subr.bf16.mxu1 %v7270_v17  ;;  %v7292_v32 = vld [vmem:[%s11223_s1 + $0x1e4] ss:$16 sps:$4 sm:$0xff]   ;;  %v7296_v34 = vld [vmem:[%s11223_s1 + $0x1e0] ss:$16 sps:$4 sm:$0xff]  }
  0x12   :  { %v7294_v33 = vld [vmem:[%s11223_s1 + $0x3e4] ss:$16 sps:$4 sm:$0xff]   ;;  %v7297_v35 = vld [vmem:[%s11223_s1 + $0x3e0] ss:$16 sps:$4 sm:$0xff]  }
  0x13   :  { %4954 = vmatpush1.bf16.msra.mxu0 %v7272_v18  ;;  %v7298_v39 = vld [vmem:[%s11223_s1 + $0x1c4] ss:$16 sps:$4 sm:$0xff]   ;;  %v7302_v41 = vld [vmem:[%s11223_s1 + $0x1c0] ss:$16 sps:$4 sm:$0xff]  }
  0x14   :  { %4995 = vmatpush1.bf16.msra.mxu1 %v7273_v19  ;;  %4955 = vmatprep.subr.bf16.mxu0 %v7274_v20  ;;  %v7300_v40 = vld [vmem:[%s11223_s1 + $0x3c4] ss:$16 sps:$4 sm:$0xff]   ;;  %v7303_v44 = vld [vmem:[%s11223_s1 + $0x3c0] ss:$16 sps:$4 sm:$0xff]  }
  0x15   :  { %4996 = vmatprep.subr.bf16.mxu1 %v7276_v21  ;;  %v7304_v45 = vld [vmem:[%s11223_s1 + $0x1a4] ss:$16 sps:$4 sm:$0xff]   ;;  %v7308_v47 = vld [vmem:[%s11223_s1 + $0x1a0] ss:$16 sps:$4 sm:$0xff]  }
  0x16   :  { %v7306_v46 = vld [vmem:[%s11223_s1 + $0x3a4] ss:$16 sps:$4 sm:$0xff]   ;;  %v7309_v48 = vld [vmem:[%s11223_s1 + $0x3a0] ss:$16 sps:$4 sm:$0xff]  }
  0x17   :  { %4956 = vmatpush1.bf16.msra.mxu0 %v7278_v22  ;;  %v7310_v50 = vld [vmem:[%s11223_s1 + $0x184] ss:$16 sps:$4 sm:$0xff]   ;;  %v7314_v53 = vld [vmem:[%s11223_s1 + $0x180] ss:$16 sps:$4 sm:$0xff]  }
  0x18   :  { %4997 = vmatpush1.bf16.msra.mxu1 %v7279_v23  ;;  %4957 = vmatprep.subr.bf16.mxu0 %v7280_v24  ;;  %v7312_v51 = vld [vmem:[%s11223_s1 + $0x384] ss:$16 sps:$4 sm:$0xff]   ;;  %v7315_v55 = vld [vmem:[%s11223_s1 + $0x380] ss:$16 sps:$4 sm:$0xff]  }
  0x19   :  { %4998 = vmatprep.subr.bf16.mxu1 %v7282_v25  ;;  %v22_v52 = vld [vmem:[%s11222_s0] sm:$0xff] }
  0x1a   :  { %v843_v54 = vrot.slane %v22_v52, %v8646_v49  ;;  %v7316_v56 = vld [vmem:[%s11223_s1 + $0x164] ss:$16 sps:$4 sm:$0xff]   ;;  %v7320_v59 = vld [vmem:[%s11223_s1 + $0x160] ss:$16 sps:$4 sm:$0xff]   ;;  %v836_v1 = vcombine.high %v22_v52, %v22_v52 }
  0x1b   :  { %4958 = vmatpush1.bf16.msra.mxu0 %v7284_v26  ;;  %v7318_v57 = vld [vmem:[%s11223_s1 + $0x364] ss:$16 sps:$4 sm:$0xff]   ;;  %v7321_v61 = vld [vmem:[%s11223_s1 + $0x360] ss:$16 sps:$4 sm:$0xff]  }
  0x1c   :  { %4999 = vmatpush1.bf16.msra.mxu1 %v7285_v27  ;;  %4959 = vmatprep.subr.bf16.mxu0 %v7286_v28  ;;  %v851_v58 = vcombine.high %v843_v54, %v843_v54  ;;  %v7322_v62 = vld [vmem:[%s11223_s1 + $0x144] ss:$16 sps:$4 sm:$0xff]   ;;  %v7326_v2 = vld [vmem:[%s11223_s1 + $0x140] ss:$16 sps:$4 sm:$0xff]   ;;  %v8704_v6 = vrot.slane %v836_v1, %v8646_v49  ;;  %v8724_v13 = vrot.slane %v843_v54, %v8646_v49 }
  0x1d   :  { %5000 = vmatprep.subr.bf16.mxu1 %v7288_v29  ;;  %v7324_v63 = vld [vmem:[%s11223_s1 + $0x344] ss:$16 sps:$4 sm:$0xff]   ;;  %v7327_v3 = vld [vmem:[%s11223_s1 + $0x340] ss:$16 sps:$4 sm:$0xff]  }
  0x1e   :  { %v8674_v60 = vrot.slane %v851_v58, %v8646_v49  ;;  %v7328_v4 = vld [vmem:[%s11223_s1 + $0x124] ss:$16 sps:$4 sm:$0xff]   ;;  %v7332_v7 = vld [vmem:[%s11223_s1 + $0x120] ss:$16 sps:$4 sm:$0xff]   ;;  %v852_v11 = vcombine.high %v8704_v6, %v8704_v6  ;;  %v8740_v18 = vcombine.high %v8724_v13, %v8724_v13 }
  0x1f   :  { %4960 = vmatpush1.bf16.msra.mxu0 %v7290_v30  ;;  %v7330_v5 = vld [vmem:[%s11223_s1 + $0x324] ss:$16 sps:$4 sm:$0xff]   ;;  %v7333_v8 = vld [vmem:[%s11223_s1 + $0x320] ss:$16 sps:$4 sm:$0xff]  }
  0x20   :  { %5001 = vmatpush1.bf16.msra.mxu1 %v7291_v31  ;;  %4961 = vmatprep.subr.bf16.mxu0 %v7292_v32  ;;  %v8687_v0 = vcombine.high %v8674_v60, %v8674_v60  ;;  %v7334_v9 = vld [vmem:[%s11223_s1 + $0x104] ss:$16 sps:$4 sm:$0xff]   ;;  %v7338_v12 = vld [vmem:[%s11223_s1 + $0x100] ss:$16 sps:$4 sm:$0xff]   ;;  %v8736_v17 = vrot.slane %v852_v11, %v8646_v49 }
  0x21   :  { %5002 = vmatprep.subr.bf16.mxu1 %v7294_v33  ;;  %4977 = vmatprep.mubr.bf16.mxu0 %v8674_v60  ;;  %v7336_v10 = vld [vmem:[%s11223_s1 + $0x304] ss:$16 sps:$4 sm:$0xff]   ;;  %v7339_v14 = vld [vmem:[%s11223_s1 + $0x300] ss:$16 sps:$4 sm:$0xff]  }
  0x22   :  { %5018 = vmatprep.mubr.bf16.mxu1 %v8687_v0  ;;  %v7342_v15 = vld [vmem:[%s11223_s1 + $0x4e4] ss:$16 sps:$4 sm:$0xff]   ;;  %v7340_v19 = vld [vmem:[%s11223_s1 + $0x4e0] ss:$16 sps:$4 sm:$0xff]   ;;  %v8756_v23 = vcombine.high %v8736_v17, %v8736_v17 }
  0x23   :  { %4962 = vmatpush2.bf16.msra.mxu0 %v7296_v34  ;;  %v7345_v16 = vld [vmem:[%s11223_s1 + $0x6e4] ss:$16 sps:$4 sm:$0xff]   ;;  %v7343_v20 = vld [vmem:[%s11223_s1 + $0x6e0] ss:$16 sps:$4 sm:$0xff]  }
  0x24   :  { %5003 = vmatpush2.bf16.msra.mxu1 %v7297_v35  ;;  %4963 = vmatprep.subr.bf16.mxu0 %v7298_v39  ;;  %v7348_v21 = vld [vmem:[%s11223_s1 + $0x4c4] ss:$16 sps:$4 sm:$0xff]   ;;  %v7346_v24 = vld [vmem:[%s11223_s1 + $0x4c0] ss:$16 sps:$4 sm:$0xff]  }
  0x25   :  { %5004 = vmatprep.subr.bf16.mxu1 %v7300_v40  ;;  %v7351_v22 = vld [vmem:[%s11223_s1 + $0x6c4] ss:$16 sps:$4 sm:$0xff]   ;;  %v7349_v25 = vld [vmem:[%s11223_s1 + $0x6c0] ss:$16 sps:$4 sm:$0xff]  }
  0x26   :  { %v7354_v26 = vld [vmem:[%s11223_s1 + $0x4a4] ss:$16 sps:$4 sm:$0xff]   ;;  %v7352_v28 = vld [vmem:[%s11223_s1 + $0x4a0] ss:$16 sps:$4 sm:$0xff]  }
  0x27   :  { %4964 = vmatpush2.bf16.msra.mxu0 %v7302_v41  ;;  %v7357_v27 = vld [vmem:[%s11223_s1 + $0x6a4] ss:$16 sps:$4 sm:$0xff]   ;;  %v7355_v29 = vld [vmem:[%s11223_s1 + $0x6a0] ss:$16 sps:$4 sm:$0xff]  }
  0x28   :  { %5005 = vmatpush2.bf16.msra.mxu1 %v7303_v44  ;;  %4965 = vmatprep.subr.bf16.mxu0 %v7304_v45  ;;  %v7360_v30 = vld [vmem:[%s11223_s1 + $0x484] ss:$16 sps:$4 sm:$0xff]   ;;  %v7358_v32 = vld [vmem:[%s11223_s1 + $0x480] ss:$16 sps:$4 sm:$0xff]  }
  0x29   :  { %5006 = vmatprep.subr.bf16.mxu1 %v7306_v46  ;;  %v7363_v31 = vld [vmem:[%s11223_s1 + $0x684] ss:$16 sps:$4 sm:$0xff]   ;;  %v7361_v33 = vld [vmem:[%s11223_s1 + $0x680] ss:$16 sps:$4 sm:$0xff]  }
  0x2a   :  { %v7366_v34 = vld [vmem:[%s11223_s1 + $0x464] ss:$16 sps:$4 sm:$0xff]   ;;  %v7364_v36 = vld [vmem:[%s11223_s1 + $0x460] ss:$16 sps:$4 sm:$0xff]  }
  0x2b   :  { %4966 = vmatpush2.bf16.msra.mxu0 %v7308_v47  ;;  %v7369_v35 = vld [vmem:[%s11223_s1 + $0x664] ss:$16 sps:$4 sm:$0xff]   ;;  %v7367_v37 = vld [vmem:[%s11223_s1 + $0x660] ss:$16 sps:$4 sm:$0xff]  }
  0x2c   :  { %5007 = vmatpush2.bf16.msra.mxu1 %v7309_v48  ;;  %4967 = vmatprep.subr.bf16.mxu0 %v7310_v50  ;;  %v7372_v38 = vld [vmem:[%s11223_s1 + $0x444] ss:$16 sps:$4 sm:$0xff]   ;;  %v7370_v40 = vld [vmem:[%s11223_s1 + $0x440] ss:$16 sps:$4 sm:$0xff]  }
  0x2d   :  { %5008 = vmatprep.subr.bf16.mxu1 %v7312_v51  ;;  %v7375_v39 = vld [vmem:[%s11223_s1 + $0x644] ss:$16 sps:$4 sm:$0xff]   ;;  %v7373_v41 = vld [vmem:[%s11223_s1 + $0x640] ss:$16 sps:$4 sm:$0xff]  }
  0x2e   :  { %v7378_v43 = vld [vmem:[%s11223_s1 + $0x424] ss:$16 sps:$4 sm:$0xff]   ;;  %v7376_v45 = vld [vmem:[%s11223_s1 + $0x420] ss:$16 sps:$4 sm:$0xff]  }
  0x2f   :  { %4968 = vmatpush2.bf16.msra.mxu0 %v7314_v53  ;;  %v7381_v44 = vld [vmem:[%s11223_s1 + $0x624] ss:$16 sps:$4 sm:$0xff]   ;;  %v7379_v46 = vld [vmem:[%s11223_s1 + $0x620] ss:$16 sps:$4 sm:$0xff]  }
  0x30   :  { %5009 = vmatpush2.bf16.msra.mxu1 %v7315_v55  ;;  %4969 = vmatprep.subr.bf16.mxu0 %v7316_v56  ;;  %v7384_v47 = vld [vmem:[%s11223_s1 + $0x404] ss:$16 sps:$4 sm:$0xff]   ;;  %v7382_v50 = vld [vmem:[%s11223_s1 + $0x400] ss:$16 sps:$4 sm:$0xff]  }
  0x31   :  { %5010 = vmatprep.subr.bf16.mxu1 %v7318_v57  ;;  %v7387_v48 = vld [vmem:[%s11223_s1 + $0x604] ss:$16 sps:$4 sm:$0xff]   ;;  %v7385_v51 = vld [vmem:[%s11223_s1 + $0x600] ss:$16 sps:$4 sm:$0xff]  }
  0x32   :  { %v7390_v52 = vld [vmem:[%s11223_s1 + $0x5e4] ss:$16 sps:$4 sm:$0xff]   ;;  %v7388_v54 = vld [vmem:[%s11223_s1 + $0x5e0] ss:$16 sps:$4 sm:$0xff]  }
  0x33   :  { %4970 = vmatpush2.bf16.msra.mxu0 %v7320_v59  ;;  %v7393_v53 = vld [vmem:[%s11223_s1 + $0x7e4] ss:$16 sps:$4 sm:$0xff]   ;;  %v7391_v55 = vld [vmem:[%s11223_s1 + $0x7e0] ss:$16 sps:$4 sm:$0xff]  }
  0x34   :  { %5011 = vmatpush2.bf16.msra.mxu1 %v7321_v61  ;;  %4971 = vmatprep.subr.bf16.mxu0 %v7322_v62  ;;  %v7396_v56 = vld [vmem:[%s11223_s1 + $0x5c4] ss:$16 sps:$4 sm:$0xff]   ;;  %v7394_v58 = vld [vmem:[%s11223_s1 + $0x5c0] ss:$16 sps:$4 sm:$0xff]  }
  0x35   :  { %5012 = vmatprep.subr.bf16.mxu1 %v7324_v63  ;;  %v7399_v57 = vld [vmem:[%s11223_s1 + $0x7c4] ss:$16 sps:$4 sm:$0xff]   ;;  %v7397_v59 = vld [vmem:[%s11223_s1 + $0x7c0] ss:$16 sps:$4 sm:$0xff]  }
  0x36   :  { %v7402_v61 = vld [vmem:[%s11223_s1 + $0x5a4] ss:$16 sps:$4 sm:$0xff]   ;;  %v7400_v63 = vld [vmem:[%s11223_s1 + $0x5a0] ss:$16 sps:$4 sm:$0xff]  }
  0x37   :  { %4972 = vmatpush2.bf16.msra.mxu0 %v7326_v2  ;;  %v7405_v62 = vld [vmem:[%s11223_s1 + $0x7a4] ss:$16 sps:$4 sm:$0xff]   ;;  %v7403_v1 = vld [vmem:[%s11223_s1 + $0x7a0] ss:$16 sps:$4 sm:$0xff]  }
  0x38   :  { %5013 = vmatpush2.bf16.msra.mxu1 %v7327_v3  ;;  %4973 = vmatprep.subr.bf16.mxu0 %v7328_v4  ;;  %v7408_v2 = vld [vmem:[%s11223_s1 + $0x584] ss:$16 sps:$4 sm:$0xff]   ;;  %v7406_v4 = vld [vmem:[%s11223_s1 + $0x580] ss:$16 sps:$4 sm:$0xff]  }
  0x39   :  { %5014 = vmatprep.subr.bf16.mxu1 %v7330_v5  ;;  %v7411_v3 = vld [vmem:[%s11223_s1 + $0x784] ss:$16 sps:$4 sm:$0xff]   ;;  %v7409_v5 = vld [vmem:[%s11223_s1 + $0x780] ss:$16 sps:$4 sm:$0xff]  }
  0x3a   :  { %v7420_v11 = vld [vmem:[%s11223_s1 + $0x544] ss:$16 sps:$4 sm:$0xff]  }
  0x3b   :  { %4974 = vmatpush2.bf16.msra.mxu0 %v7332_v7  ;;  %v7414_v7 = vld [vmem:[%s11223_s1 + $0x564] ss:$16 sps:$4 sm:$0xff]  }
  0x3c   :  { %5015 = vmatpush2.bf16.msra.mxu1 %v7333_v8  ;;  %4975 = vmatprep.subr.bf16.mxu0 %v7334_v9  ;;  %v7417_v8 = vld [vmem:[%s11223_s1 + $0x764] ss:$16 sps:$4 sm:$0xff]   ;;  %v7412_v9 = vld [vmem:[%s11223_s1 + $0x560] ss:$16 sps:$4 sm:$0xff]  }
  0x3d   :  { %5016 = vmatprep.subr.bf16.mxu1 %v7336_v10  ;;  %v7415_v10 = vld [vmem:[%s11223_s1 + $0x760] ss:$16 sps:$4 sm:$0xff]  }
  0x3f   :  { %4976 = vmatpush2.bf16.msra.mxu0 %v7338_v12  ;;  %v7423_v12 = vld [vmem:[%s11223_s1 + $0x744] ss:$16 sps:$4 sm:$0xff]  }
  0x40   :  { %5017 = vmatpush2.bf16.msra.mxu1 %v7339_v14  ;;  %5027 = vmatprep.subr.bf16.mxu0 %v7342_v15  ;;  %v7418_v14 = vld [vmem:[%s11223_s1 + $0x540] ss:$16 sps:$4 sm:$0xff]  }
  0x41   :  { %5068 = vmatprep.subr.bf16.mxu1 %v7345_v16  ;;  %v7421_v15 = vld [vmem:[%s11223_s1 + $0x740] ss:$16 sps:$4 sm:$0xff]   ;;  %v7426_v16 = vld [vmem:[%s11223_s1 + $0x524] ss:$16 sps:$4 sm:$0xff]  }
  0x42   :  { %4978 = vmatmul.mubr.bf16.vlgmr.msra.gmra.mxu0 %v8724_v13 }
  0x43   :  { %5019 = vmatmul.mubr.bf16.vlgmr.msra.gmra.mxu1 %v8740_v18  ;;  %5028 = vmatpush1.bf16.msra.mxu0 %v7340_v19  ;;  %v7429_v19 = vld [vmem:[%s11223_s1 + $0x724] ss:$16 sps:$4 sm:$0xff]  }
  0x44   :  { %5069 = vmatpush1.bf16.msra.mxu1 %v7343_v20  ;;  %5029 = vmatprep.subr.bf16.mxu0 %v7348_v21  ;;  %v7424_v20 = vld [vmem:[%s11223_s1 + $0x520] ss:$16 sps:$4 sm:$0xff]  }
  0x45   :  { %5070 = vmatprep.subr.bf16.mxu1 %v7351_v22  ;;  %5059 = vmatprep.mubr.bf16.mxu0 %v8736_v17  ;;  %v7427_v21 = vld [vmem:[%s11223_s1 + $0x720] ss:$16 sps:$4 sm:$0xff]   ;;  %v7432_v22 = vld [vmem:[%s11223_s1 + $0x504] ss:$16 sps:$4 sm:$0xff]  }
  0x46   :  { %5100 = vmatprep.mubr.bf16.mxu1 %v8756_v23 }
  0x47   :  { %5030 = vmatpush1.bf16.msra.mxu0 %v7346_v24  ;;  %v7435_v24 = vld [vmem:[%s11223_s1 + $0x704] ss:$16 sps:$4 sm:$0xff]  }
  0x48   :  { %5071 = vmatpush1.bf16.msra.mxu1 %v7349_v25  ;;  %5031 = vmatprep.subr.bf16.mxu0 %v7354_v26  ;;  %v7430_v25 = vld [vmem:[%s11223_s1 + $0x500] ss:$16 sps:$4 sm:$0xff]   ;;  %v8935_v26 = vrot.slane %v8704_v6, %v8646_v49 }
  0x49   :  { %5072 = vmatprep.subr.bf16.mxu1 %v7357_v27  ;;  %v7433_v27 = vld [vmem:[%s11223_s1 + $0x700] ss:$16 sps:$4 sm:$0xff]  }
  0x4a   :  { %v8948_v6 = vcombine.high %v8935_v26, %v8935_v26 }
  0x4b   :  { %5032 = vmatpush1.bf16.msra.mxu0 %v7352_v28  ;;  %v7439_v28 = vld [vmem:[%s11223_s1 + $0x8e4] ss:$16 sps:$4 sm:$0xff]  }
  0x4c   :  { %5073 = vmatpush1.bf16.msra.mxu1 %v7355_v29  ;;  %5033 = vmatprep.subr.bf16.mxu0 %v7360_v30  ;;  %v7442_v29 = vld [vmem:[%s11223_s1 + $0xae4] ss:$16 sps:$4 sm:$0xff]   ;;  %v7437_v30 = vld [vmem:[%s11223_s1 + $0x8e0] ss:$16 sps:$4 sm:$0xff]  }
  0x4d   :  { %5074 = vmatprep.subr.bf16.mxu1 %v7363_v31  ;;  %v7440_v31 = vld [vmem:[%s11223_s1 + $0xae0] ss:$16 sps:$4 sm:$0xff]  }
  0x4f   :  { %5034 = vmatpush1.bf16.msra.mxu0 %v7358_v32  ;;  %v8959_v32 = vld [vmem:[%s11222_s0 + $0x8] sm:$0xff] }
  0x50   :  { %5075 = vmatpush1.bf16.msra.mxu1 %v7361_v33  ;;  %5035 = vmatprep.subr.bf16.mxu0 %v7366_v34  ;;  %v7445_v33 = vld [vmem:[%s11223_s1 + $0x8c4] ss:$16 sps:$4 sm:$0xff]  }
  0x51   :  { %5076 = vmatprep.subr.bf16.mxu1 %v7369_v35  ;;  %v7448_v34 = vld [vmem:[%s11223_s1 + $0xac4] ss:$16 sps:$4 sm:$0xff]   ;;  %v8969_v35 = vrot.slane %v8959_v32, %v8646_v49 }
  0x53   :  { %5036 = vmatpush1.bf16.msra.mxu0 %v7364_v36  ;;  %v900_v36 = vcombine.high %v8969_v35, %v8969_v35 }
  0x54   :  { %5077 = vmatpush1.bf16.msra.mxu1 %v7367_v37  ;;  %5037 = vmatprep.subr.bf16.mxu0 %v7372_v38  ;;  %v7443_v37 = vld [vmem:[%s11223_s1 + $0x8c0] ss:$16 sps:$4 sm:$0xff]  }
  0x55   :  { %5078 = vmatprep.subr.bf16.mxu1 %v7375_v39  ;;  %v7446_v38 = vld [vmem:[%s11223_s1 + $0xac0] ss:$16 sps:$4 sm:$0xff]   ;;  %v7451_v39 = vld [vmem:[%s11223_s1 + $0x8a4] ss:$16 sps:$4 sm:$0xff]  }
  0x57   :  { %5038 = vmatpush1.bf16.msra.mxu0 %v7370_v40  ;;  %v7454_v40 = vld [vmem:[%s11223_s1 + $0xaa4] ss:$16 sps:$4 sm:$0xff]  }
  0x58   :  { %5079 = vmatpush1.bf16.msra.mxu1 %v7373_v41  ;;  %5039 = vmatprep.subr.bf16.mxu0 %v7378_v43  ;;  %v8988_v41 = vrot.slane %v900_v36, %v8646_v49  ;;  %v7515_v36 = vld [vmem:[%s11223_s1 + $0x940] ss:$16 sps:$4 sm:$0xff]  }
  0x59   :  { %5080 = vmatprep.subr.bf16.mxu1 %v7381_v44  ;;  %v7449_v44 = vld [vmem:[%s11223_s1 + $0x8a0] ss:$16 sps:$4 sm:$0xff]  }
  0x5a   :  { %v8993_v43 = vcombine.high %v8988_v41, %v8988_v41 }
  0x5b   :  { %5040 = vmatpush1.bf16.msra.mxu0 %v7376_v45  ;;  %v7452_v45 = vld [vmem:[%s11223_s1 + $0xaa0] ss:$16 sps:$4 sm:$0xff]  }
  0x5c   :  { %5081 = vmatpush1.bf16.msra.mxu1 %v7379_v46  ;;  %5041 = vmatprep.subr.bf16.mxu0 %v7384_v47  ;;  %v7457_v46 = vld [vmem:[%s11223_s1 + $0x884] ss:$16 sps:$4 sm:$0xff]  }
  0x5d   :  { %5082 = vmatprep.subr.bf16.mxu1 %v7387_v48  ;;  %v7460_v47 = vld [vmem:[%s11223_s1 + $0xa84] ss:$16 sps:$4 sm:$0xff]   ;;  %v7455_v48 = vld [vmem:[%s11223_s1 + $0x880] ss:$16 sps:$4 sm:$0xff]  }
  0x5f   :  { %5042 = vmatpush1.bf16.msra.mxu0 %v7382_v50  ;;  %v7458_v50 = vld [vmem:[%s11223_s1 + $0xa80] ss:$16 sps:$4 sm:$0xff]  }
  0x60   :  { %5083 = vmatpush1.bf16.msra.mxu1 %v7385_v51  ;;  %5043 = vmatprep.subr.bf16.mxu0 %v7390_v52  ;;  %v7463_v51 = vld [vmem:[%s11223_s1 + $0x864] ss:$16 sps:$4 sm:$0xff]  }
  0x61   :  { %5084 = vmatprep.subr.bf16.mxu1 %v7393_v53  ;;  %v7466_v52 = vld [vmem:[%s11223_s1 + $0xa64] ss:$16 sps:$4 sm:$0xff]   ;;  %v7461_v53 = vld [vmem:[%s11223_s1 + $0x860] ss:$16 sps:$4 sm:$0xff]  }
  0x63   :  { %5044 = vmatpush2.bf16.msra.mxu0 %v7388_v54  ;;  %v7464_v54 = vld [vmem:[%s11223_s1 + $0xa60] ss:$16 sps:$4 sm:$0xff]  }
  0x64   :  { %5085 = vmatpush2.bf16.msra.mxu1 %v7391_v55  ;;  %5045 = vmatprep.subr.bf16.mxu0 %v7396_v56  ;;  %v7469_v55 = vld [vmem:[%s11223_s1 + $0x844] ss:$16 sps:$4 sm:$0xff]  }
  0x65   :  { %5086 = vmatprep.subr.bf16.mxu1 %v7399_v57  ;;  %v7472_v56 = vld [vmem:[%s11223_s1 + $0xa44] ss:$16 sps:$4 sm:$0xff]   ;;  %v7467_v57 = vld [vmem:[%s11223_s1 + $0x840] ss:$16 sps:$4 sm:$0xff]  }
  0x67   :  { %5046 = vmatpush2.bf16.msra.mxu0 %v7394_v58  ;;  %v7470_v58 = vld [vmem:[%s11223_s1 + $0xa40] ss:$16 sps:$4 sm:$0xff]  }
  0x68   :  { %5087 = vmatpush2.bf16.msra.mxu1 %v7397_v59  ;;  %5047 = vmatprep.subr.bf16.mxu0 %v7402_v61  ;;  %v7475_v59 = vld [vmem:[%s11223_s1 + $0x824] ss:$16 sps:$4 sm:$0xff]  }
  0x69   :  { %5088 = vmatprep.subr.bf16.mxu1 %v7405_v62  ;;  %v7478_v61 = vld [vmem:[%s11223_s1 + $0xa24] ss:$16 sps:$4 sm:$0xff]   ;;  %v7473_v62 = vld [vmem:[%s11223_s1 + $0x820] ss:$16 sps:$4 sm:$0xff]  }
  0x6b   :  { %5048 = vmatpush2.bf16.msra.mxu0 %v7400_v63  ;;  %v7476_v63 = vld [vmem:[%s11223_s1 + $0xa20] ss:$16 sps:$4 sm:$0xff]  }
  0x6c   :  { %5089 = vmatpush2.bf16.msra.mxu1 %v7403_v1  ;;  %5049 = vmatprep.subr.bf16.mxu0 %v7408_v2  ;;  %v7481_v1 = vld [vmem:[%s11223_s1 + $0x804] ss:$16 sps:$4 sm:$0xff]  }
  0x6d   :  { %5090 = vmatprep.subr.bf16.mxu1 %v7411_v3  ;;  %v7484_v2 = vld [vmem:[%s11223_s1 + $0xa04] ss:$16 sps:$4 sm:$0xff]   ;;  %v7479_v3 = vld [vmem:[%s11223_s1 + $0x800] ss:$16 sps:$4 sm:$0xff]  }
  0x6f   :  { %5050 = vmatpush2.bf16.msra.mxu0 %v7406_v4  ;;  %v7482_v4 = vld [vmem:[%s11223_s1 + $0xa00] ss:$16 sps:$4 sm:$0xff]  }
  0x70   :  { %5091 = vmatpush2.bf16.msra.mxu1 %v7409_v5  ;;  %5051 = vmatprep.subr.bf16.mxu0 %v7414_v7  ;;  %v7487_v5 = vld [vmem:[%s11223_s1 + $0x9e4] ss:$16 sps:$4 sm:$0xff]  }
  0x71   :  { %5092 = vmatprep.subr.bf16.mxu1 %v7417_v8  ;;  %v7490_v7 = vld [vmem:[%s11223_s1 + $0xbe4] ss:$16 sps:$4 sm:$0xff]   ;;  %v7485_v8 = vld [vmem:[%s11223_s1 + $0x9e0] ss:$16 sps:$4 sm:$0xff]  }
  0x73   :  { %5052 = vmatpush2.bf16.msra.mxu0 %v7412_v9  ;;  %v7488_v9 = vld [vmem:[%s11223_s1 + $0xbe0] ss:$16 sps:$4 sm:$0xff]  }
  0x74   :  { %5093 = vmatpush2.bf16.msra.mxu1 %v7415_v10  ;;  %5053 = vmatprep.subr.bf16.mxu0 %v7420_v11  ;;  %v7493_v10 = vld [vmem:[%s11223_s1 + $0x9c4] ss:$16 sps:$4 sm:$0xff]  }
  0x75   :  { %5094 = vmatprep.subr.bf16.mxu1 %v7423_v12  ;;  %v7496_v11 = vld [vmem:[%s11223_s1 + $0xbc4] ss:$16 sps:$4 sm:$0xff]   ;;  %v7491_v12 = vld [vmem:[%s11223_s1 + $0x9c0] ss:$16 sps:$4 sm:$0xff]  }
  0x77   :  { %5054 = vmatpush2.bf16.msra.mxu0 %v7418_v14  ;;  %v7494_v14 = vld [vmem:[%s11223_s1 + $0xbc0] ss:$16 sps:$4 sm:$0xff]  }
  0x78   :  { %5095 = vmatpush2.bf16.msra.mxu1 %v7421_v15  ;;  %5055 = vmatprep.subr.bf16.mxu0 %v7426_v16  ;;  %v7499_v15 = vld [vmem:[%s11223_s1 + $0x9a4] ss:$16 sps:$4 sm:$0xff]  }
  0x79   :  { %5096 = vmatprep.subr.bf16.mxu1 %v7429_v19  ;;  %v7502_v16 = vld [vmem:[%s11223_s1 + $0xba4] ss:$16 sps:$4 sm:$0xff]   ;;  %v7497_v19 = vld [vmem:[%s11223_s1 + $0x9a0] ss:$16 sps:$4 sm:$0xff]  }
  0x7b   :  { %5056 = vmatpush2.bf16.msra.mxu0 %v7424_v20  ;;  %v7500_v20 = vld [vmem:[%s11223_s1 + $0xba0] ss:$16 sps:$4 sm:$0xff]  }
  0x7c   :  { %5097 = vmatpush2.bf16.msra.mxu1 %v7427_v21  ;;  %5057 = vmatprep.subr.bf16.mxu0 %v7432_v22  ;;  %v7505_v21 = vld [vmem:[%s11223_s1 + $0x984] ss:$16 sps:$4 sm:$0xff]  }
  0x7d   :  { %5098 = vmatprep.subr.bf16.mxu1 %v7435_v24  ;;  %v7508_v22 = vld [vmem:[%s11223_s1 + $0xb84] ss:$16 sps:$4 sm:$0xff]   ;;  %v7503_v24 = vld [vmem:[%s11223_s1 + $0x980] ss:$16 sps:$4 sm:$0xff]  }
  0x7f   :  { %5058 = vmatpush2.bf16.msra.mxu0 %v7430_v25  ;;  %v7506_v25 = vld [vmem:[%s11223_s1 + $0xb80] ss:$16 sps:$4 sm:$0xff]  }
  0x80   :  { %5099 = vmatpush2.bf16.msra.mxu1 %v7433_v27  ;;  %5109 = vmatprep.subr.bf16.mxu0 %v7439_v28  ;;  %v7511_v27 = vld [vmem:[%s11223_s1 + $0x964] ss:$16 sps:$4 sm:$0xff]  }
  0x81   :  { %5150 = vmatprep.subr.bf16.mxu1 %v7442_v29  ;;  %v7514_v28 = vld [vmem:[%s11223_s1 + $0xb64] ss:$16 sps:$4 sm:$0xff]   ;;  %v7509_v29 = vld [vmem:[%s11223_s1 + $0x960] ss:$16 sps:$4 sm:$0xff]  }
  0x82   :  { %5060 = vmatmul.mubr.bf16.vlgmr.msra.gmra.mxu0 %v8935_v26 }
  0x83   :  { %5101 = vmatmul.mubr.bf16.vlgmr.msra.gmra.mxu1 %v8948_v6  ;;  %5110 = vmatpush1.bf16.msra.mxu0 %v7437_v30  ;;  %v7512_v30 = vld [vmem:[%s11223_s1 + $0xb60] ss:$16 sps:$4 sm:$0xff]  }
  0x84   :  { %5151 = vmatpush1.bf16.msra.mxu1 %v7440_v31  ;;  %5111 = vmatprep.subr.bf16.mxu0 %v7445_v33  ;;  %v7517_v31 = vld [vmem:[%s11223_s1 + $0x944] ss:$16 sps:$4 sm:$0xff]  }
  0x85   :  { %5152 = vmatprep.subr.bf16.mxu1 %v7448_v34  ;;  %5141 = vmatprep.mubr.bf16.mxu0 %v8988_v41  ;;  %v7520_v33 = vld [vmem:[%s11223_s1 + $0xb44] ss:$16 sps:$4 sm:$0xff]   ;;  %v885_v34 = vcombine.high %v8959_v32, %v8959_v32 }
  0x86   :  { %5182 = vmatprep.mubr.bf16.mxu1 %v8993_v43  ;;  %v7526_v32 = vld [vmem:[%s11223_s1 + $0xb24] ss:$16 sps:$4 sm:$0xff]  }
  0x87   :  { %5112 = vmatpush1.bf16.msra.mxu0 %v7443_v37  ;;  %v7518_v37 = vld [vmem:[%s11223_s1 + $0xb40] ss:$16 sps:$4 sm:$0xff]  }
  0x88   :  { %5153 = vmatpush1.bf16.msra.mxu1 %v7446_v38  ;;  %5113 = vmatprep.subr.bf16.mxu0 %v7451_v39  ;;  %v7523_v38 = vld [vmem:[%s11223_s1 + $0x924] ss:$16 sps:$4 sm:$0xff]   ;;  %v9143_v39 = vrot.slane %v885_v34, %v8646_v49  ;;  %v7584_v34 = vld [vmem:[%s11223_s1 + $0xfe0] ss:$16 sps:$4 sm:$0xff]  }
  0x89   :  { %5154 = vmatprep.subr.bf16.mxu1 %v7454_v40  ;;  %v7521_v40 = vld [vmem:[%s11223_s1 + $0x920] ss:$16 sps:$4 sm:$0xff]  }
  0x8b   :  { %5114 = vmatpush1.bf16.msra.mxu0 %v7449_v44  ;;  %v7524_v44 = vld [vmem:[%s11223_s1 + $0xb20] ss:$16 sps:$4 sm:$0xff]  }
  0x8c   :  { %5155 = vmatpush1.bf16.msra.mxu1 %v7452_v45  ;;  %5115 = vmatprep.subr.bf16.mxu0 %v7457_v46  ;;  %v7529_v45 = vld [vmem:[%s11223_s1 + $0x904] ss:$16 sps:$4 sm:$0xff]  }
  0x8d   :  { %5156 = vmatprep.subr.bf16.mxu1 %v7460_v47  ;;  %v7532_v46 = vld [vmem:[%s11223_s1 + $0xb04] ss:$16 sps:$4 sm:$0xff]   ;;  %v901_v47 = vcombine.high %v9143_v39, %v9143_v39 }
  0x8f   :  { %5116 = vmatpush1.bf16.msra.mxu0 %v7455_v48  ;;  %v7527_v48 = vld [vmem:[%s11223_s1 + $0x900] ss:$16 sps:$4 sm:$0xff]  }
  0x90   :  { %5157 = vmatpush1.bf16.msra.mxu1 %v7458_v50  ;;  %5117 = vmatprep.subr.bf16.mxu0 %v7463_v51  ;;  %v9164_v50 = vrot.slane %v8969_v35, %v8646_v49  ;;  %v7530_v51 = vld [vmem:[%s11223_s1 + $0xb00] ss:$16 sps:$4 sm:$0xff]  }
  0x91   :  { %5158 = vmatprep.subr.bf16.mxu1 %v7466_v52  ;;  %v7535_v52 = vld [vmem:[%s11223_s1 + $0xce4] ss:$16 sps:$4 sm:$0xff]  }
  0x92   :  { %v9180_v35 = vcombine.high %v9164_v50, %v9164_v50 }
  0x93   :  { %5118 = vmatpush1.bf16.msra.mxu0 %v7461_v53  ;;  %v7538_v53 = vld [vmem:[%s11223_s1 + $0xee4] ss:$16 sps:$4 sm:$0xff]  }
  0x94   :  { %5159 = vmatpush1.bf16.msra.mxu1 %v7464_v54  ;;  %5119 = vmatprep.subr.bf16.mxu0 %v7469_v55  ;;  %v9176_v54 = vrot.slane %v901_v47, %v8646_v49  ;;  %v7533_v55 = vld [vmem:[%s11223_s1 + $0xce0] ss:$16 sps:$4 sm:$0xff]   ;;  %v7601_v47 = vld [vmem:[%s11223_s1 + $0xd84] ss:$16 sps:$4 sm:$0xff]  }
  0x95   :  { %5160 = vmatprep.subr.bf16.mxu1 %v7472_v56  ;;  %v7536_v56 = vld [vmem:[%s11223_s1 + $0xee0] ss:$16 sps:$4 sm:$0xff]  }
  0x97   :  { %5120 = vmatpush1.bf16.msra.mxu0 %v7467_v57  ;;  %v7541_v57 = vld [vmem:[%s11223_s1 + $0xcc4] ss:$16 sps:$4 sm:$0xff]  }
  0x98   :  { %5161 = vmatpush1.bf16.msra.mxu1 %v7470_v58  ;;  %5121 = vmatprep.subr.bf16.mxu0 %v7475_v59  ;;  %v7544_v58 = vld [vmem:[%s11223_s1 + $0xec4] ss:$16 sps:$4 sm:$0xff]   ;;  %v9196_v59 = vcombine.high %v9176_v54, %v9176_v54 }
  0x99   :  { %5162 = vmatprep.subr.bf16.mxu1 %v7478_v61  ;;  %v7539_v61 = vld [vmem:[%s11223_s1 + $0xcc0] ss:$16 sps:$4 sm:$0xff]  }
  0x9b   :  { %5122 = vmatpush1.bf16.msra.mxu0 %v7473_v62  ;;  %v7542_v62 = vld [vmem:[%s11223_s1 + $0xec0] ss:$16 sps:$4 sm:$0xff]  }
  0x9c   :  { %5163 = vmatpush1.bf16.msra.mxu1 %v7476_v63  ;;  %5123 = vmatprep.subr.bf16.mxu0 %v7481_v1  ;;  %v7547_v63 = vld [vmem:[%s11223_s1 + $0xca4] ss:$16 sps:$4 sm:$0xff]  }
  0x9d   :  { %5164 = vmatprep.subr.bf16.mxu1 %v7484_v2  ;;  %v7550_v1 = vld [vmem:[%s11223_s1 + $0xea4] ss:$16 sps:$4 sm:$0xff]   ;;  %v7545_v2 = vld [vmem:[%s11223_s1 + $0xca0] ss:$16 sps:$4 sm:$0xff]  }
  0x9f   :  { %5124 = vmatpush1.bf16.msra.mxu0 %v7479_v3  ;;  %v7548_v3 = vld [vmem:[%s11223_s1 + $0xea0] ss:$16 sps:$4 sm:$0xff]  }
  0xa0   :  { %5165 = vmatpush1.bf16.msra.mxu1 %v7482_v4  ;;  %5125 = vmatprep.subr.bf16.mxu0 %v7487_v5  ;;  %v7553_v4 = vld [vmem:[%s11223_s1 + $0xc84] ss:$16 sps:$4 sm:$0xff]  }
  0xa1   :  { %5166 = vmatprep.subr.bf16.mxu1 %v7490_v7  ;;  %v7556_v5 = vld [vmem:[%s11223_s1 + $0xe84] ss:$16 sps:$4 sm:$0xff]   ;;  %v7551_v7 = vld [vmem:[%s11223_s1 + $0xc80] ss:$16 sps:$4 sm:$0xff]  }
  0xa3   :  { %5126 = vmatpush2.bf16.msra.mxu0 %v7485_v8  ;;  %v7554_v8 = vld [vmem:[%s11223_s1 + $0xe80] ss:$16 sps:$4 sm:$0xff]  }
  0xa4   :  { %5167 = vmatpush2.bf16.msra.mxu1 %v7488_v9  ;;  %5127 = vmatprep.subr.bf16.mxu0 %v7493_v10  ;;  %v7559_v9 = vld [vmem:[%s11223_s1 + $0xc64] ss:$16 sps:$4 sm:$0xff]  }
  0xa5   :  { %5168 = vmatprep.subr.bf16.mxu1 %v7496_v11  ;;  %v7562_v10 = vld [vmem:[%s11223_s1 + $0xe64] ss:$16 sps:$4 sm:$0xff]   ;;  %v7557_v11 = vld [vmem:[%s11223_s1 + $0xc60] ss:$16 sps:$4 sm:$0xff]  }
  0xa7   :  { %5128 = vmatpush2.bf16.msra.mxu0 %v7491_v12  ;;  %v7560_v12 = vld [vmem:[%s11223_s1 + $0xe60] ss:$16 sps:$4 sm:$0xff]  }
  0xa8   :  { %5169 = vmatpush2.bf16.msra.mxu1 %v7494_v14  ;;  %5129 = vmatprep.subr.bf16.mxu0 %v7499_v15  ;;  %v7565_v14 = vld [vmem:[%s11223_s1 + $0xc44] ss:$16 sps:$4 sm:$0xff]  }
  0xa9   :  { %5170 = vmatprep.subr.bf16.mxu1 %v7502_v16  ;;  %v7568_v15 = vld [vmem:[%s11223_s1 + $0xe44] ss:$16 sps:$4 sm:$0xff]   ;;  %v7563_v16 = vld [vmem:[%s11223_s1 + $0xc40] ss:$16 sps:$4 sm:$0xff]  }
  0xab   :  { %5130 = vmatpush2.bf16.msra.mxu0 %v7497_v19  ;;  %v7566_v19 = vld [vmem:[%s11223_s1 + $0xe40] ss:$16 sps:$4 sm:$0xff]  }
  0xac   :  { %5171 = vmatpush2.bf16.msra.mxu1 %v7500_v20  ;;  %5131 = vmatprep.subr.bf16.mxu0 %v7505_v21  ;;  %v7571_v20 = vld [vmem:[%s11223_s1 + $0xc24] ss:$16 sps:$4 sm:$0xff]  }
  0xad   :  { %5172 = vmatprep.subr.bf16.mxu1 %v7508_v22  ;;  %v7574_v21 = vld [vmem:[%s11223_s1 + $0xe24] ss:$16 sps:$4 sm:$0xff]   ;;  %v7569_v22 = vld [vmem:[%s11223_s1 + $0xc20] ss:$16 sps:$4 sm:$0xff]  }
  0xaf   :  { %5132 = vmatpush2.bf16.msra.mxu0 %v7503_v24  ;;  %v7572_v24 = vld [vmem:[%s11223_s1 + $0xe20] ss:$16 sps:$4 sm:$0xff]  }
  0xb0   :  { %5173 = vmatpush2.bf16.msra.mxu1 %v7506_v25  ;;  %5133 = vmatprep.subr.bf16.mxu0 %v7511_v27  ;;  %v7577_v25 = vld [vmem:[%s11223_s1 + $0xc04] ss:$16 sps:$4 sm:$0xff]  }
  0xb1   :  { %5174 = vmatprep.subr.bf16.mxu1 %v7514_v28  ;;  %v7580_v27 = vld [vmem:[%s11223_s1 + $0xe04] ss:$16 sps:$4 sm:$0xff]   ;;  %v7575_v28 = vld [vmem:[%s11223_s1 + $0xc00] ss:$16 sps:$4 sm:$0xff]  }
  0xb3   :  { %5134 = vmatpush2.bf16.msra.mxu0 %v7509_v29  ;;  %v7578_v29 = vld [vmem:[%s11223_s1 + $0xe00] ss:$16 sps:$4 sm:$0xff]  }
  0xb4   :  { %5175 = vmatpush2.bf16.msra.mxu1 %v7512_v30  ;;  %5135 = vmatprep.subr.bf16.mxu0 %v7517_v31  ;;  %v7583_v30 = vld [vmem:[%s11223_s1 + $0xde4] ss:$16 sps:$4 sm:$0xff]  }
  0xb5   :  { %5176 = vmatprep.subr.bf16.mxu1 %v7520_v33  ;;  %v7586_v31 = vld [vmem:[%s11223_s1 + $0xfe4] ss:$16 sps:$4 sm:$0xff]   ;;  %v7581_v33 = vld [vmem:[%s11223_s1 + $0xde0] ss:$16 sps:$4 sm:$0xff]  }
  0xb7   :  { %5136 = vmatpush2.bf16.msra.mxu0 %v7515_v36  ;;  %v7589_v36 = vld [vmem:[%s11223_s1 + $0xdc4] ss:$16 sps:$4 sm:$0xff]  }
  0xb8   :  { %5177 = vmatpush2.bf16.msra.mxu1 %v7518_v37  ;;  %5137 = vmatprep.subr.bf16.mxu0 %v7523_v38  ;;  %v7592_v37 = vld [vmem:[%s11223_s1 + $0xfc4] ss:$16 sps:$4 sm:$0xff]   ;;  %v7587_v38 = vld [vmem:[%s11223_s1 + $0xdc0] ss:$16 sps:$4 sm:$0xff]  }
  0xb9   :  { %5178 = vmatprep.subr.bf16.mxu1 %v7526_v32  ;;  %v7590_v32 = vld [vmem:[%s11223_s1 + $0xfc0] ss:$16 sps:$4 sm:$0xff]  }
  0xbb   :  { %5138 = vmatpush2.bf16.msra.mxu0 %v7521_v40  ;;  %v7595_v40 = vld [vmem:[%s11223_s1 + $0xda4] ss:$16 sps:$4 sm:$0xff]  }
  0xbc   :  { %5179 = vmatpush2.bf16.msra.mxu1 %v7524_v44  ;;  %5139 = vmatprep.subr.bf16.mxu0 %v7529_v45  ;;  %v7598_v44 = vld [vmem:[%s11223_s1 + $0xfa4] ss:$16 sps:$4 sm:$0xff]   ;;  %v7593_v45 = vld [vmem:[%s11223_s1 + $0xda0] ss:$16 sps:$4 sm:$0xff]  }
  0xbd   :  { %5180 = vmatprep.subr.bf16.mxu1 %v7532_v46  ;;  %v7596_v46 = vld [vmem:[%s11223_s1 + $0xfa0] ss:$16 sps:$4 sm:$0xff]  }
  0xbf   :  { %5140 = vmatpush2.bf16.msra.mxu0 %v7527_v48  ;;  %v7604_v48 = vld [vmem:[%s11223_s1 + $0xf84] ss:$16 sps:$4 sm:$0xff]  }
  0xc0   :  { %5181 = vmatpush2.bf16.msra.mxu1 %v7530_v51  ;;  %5191 = vmatprep.subr.bf16.mxu0 %v7535_v52  ;;  %v7599_v51 = vld [vmem:[%s11223_s1 + $0xd80] ss:$16 sps:$4 sm:$0xff]  }
  0xc1   :  { %5232 = vmatprep.subr.bf16.mxu1 %v7538_v53  ;;  %v7602_v52 = vld [vmem:[%s11223_s1 + $0xf80] ss:$16 sps:$4 sm:$0xff]   ;;  %v7607_v53 = vld [vmem:[%s11223_s1 + $0xd64] ss:$16 sps:$4 sm:$0xff]  }
  0xc2   :  { %5142 = vmatmul.mubr.bf16.vlgmr.msra.gmra.mxu0 %v9164_v50 }
  0xc3   :  { %5183 = vmatmul.mubr.bf16.vlgmr.msra.gmra.mxu1 %v9180_v35  ;;  %5192 = vmatpush1.bf16.msra.mxu0 %v7533_v55  ;;  %v7610_v55 = vld [vmem:[%s11223_s1 + $0xf64] ss:$16 sps:$4 sm:$0xff]  }
  0xc4   :  { %5233 = vmatpush1.bf16.msra.mxu1 %v7536_v56  ;;  %5193 = vmatprep.subr.bf16.mxu0 %v7541_v57  ;;  %v7605_v56 = vld [vmem:[%s11223_s1 + $0xd60] ss:$16 sps:$4 sm:$0xff]  }
  0xc5   :  { %5234 = vmatprep.subr.bf16.mxu1 %v7544_v58  ;;  %5223 = vmatprep.mubr.bf16.mxu0 %v9176_v54  ;;  %v7608_v57 = vld [vmem:[%s11223_s1 + $0xf60] ss:$16 sps:$4 sm:$0xff]   ;;  %v7613_v58 = vld [vmem:[%s11223_s1 + $0xd44] ss:$16 sps:$4 sm:$0xff]  }
  0xc6   :  { %5264 = vmatprep.mubr.bf16.mxu1 %v9196_v59 }
  0xc7   :  { %5194 = vmatpush1.bf16.msra.mxu0 %v7539_v61  ;;  %v7616_v61 = vld [vmem:[%s11223_s1 + $0xf44] ss:$16 sps:$4 sm:$0xff]  }
  0xc8   :  { %5235 = vmatpush1.bf16.msra.mxu1 %v7542_v62  ;;  %5195 = vmatprep.subr.bf16.mxu0 %v7547_v63  ;;  %v7611_v62 = vld [vmem:[%s11223_s1 + $0xd40] ss:$16 sps:$4 sm:$0xff]  }
  0xc9   :  { %5236 = vmatprep.subr.bf16.mxu1 %v7550_v1  ;;  %v7614_v63 = vld [vmem:[%s11223_s1 + $0xf40] ss:$16 sps:$4 sm:$0xff]  }
  0xca   :  { %v9355_v1 = vld [vmem:[%s11222_s0 + $0x10] sm:$0xff] }
  0xcb   :  { %5196 = vmatpush1.bf16.msra.mxu0 %v7545_v2  ;;  %v7619_v2 = vld [vmem:[%s11223_s1 + $0xd24] ss:$16 sps:$4 sm:$0xff]  }
  0xcc   :  { %5237 = vmatpush1.bf16.msra.mxu1 %v7548_v3  ;;  %5197 = vmatprep.subr.bf16.mxu0 %v7553_v4  ;;  %v7622_v3 = vld [vmem:[%s11223_s1 + $0xf24] ss:$16 sps:$4 sm:$0xff]   ;;  %v9365_v4 = vrot.slane %v9355_v1, %v8646_v49 }
  0xcd   :  { %5238 = vmatprep.subr.bf16.mxu1 %v7556_v5  ;;  %v7617_v5 = vld [vmem:[%s11223_s1 + $0xd20] ss:$16 sps:$4 sm:$0xff]  }
  0xcf   :  { %5198 = vmatpush1.bf16.msra.mxu0 %v7551_v7  ;;  %v7620_v7 = vld [vmem:[%s11223_s1 + $0xf20] ss:$16 sps:$4 sm:$0xff]  }
  0xd0   :  { %5239 = vmatpush1.bf16.msra.mxu1 %v7554_v8  ;;  %5199 = vmatprep.subr.bf16.mxu0 %v7559_v9  ;;  %v7625_v8 = vld [vmem:[%s11223_s1 + $0xd04] ss:$16 sps:$4 sm:$0xff]  }
  0xd1   :  { %5240 = vmatprep.subr.bf16.mxu1 %v7562_v10  ;;  %v7628_v9 = vld [vmem:[%s11223_s1 + $0xf04] ss:$16 sps:$4 sm:$0xff]   ;;  %v7623_v10 = vld [vmem:[%s11223_s1 + $0xd00] ss:$16 sps:$4 sm:$0xff]  }
  0xd3   :  { %5200 = vmatpush1.bf16.msra.mxu0 %v7557_v11  ;;  %v949_v11 = vcombine.high %v9365_v4, %v9365_v4 }
  0xd4   :  { %5241 = vmatpush1.bf16.msra.mxu1 %v7560_v12  ;;  %5201 = vmatprep.subr.bf16.mxu0 %v7565_v14  ;;  %v7626_v12 = vld [vmem:[%s11223_s1 + $0xf00] ss:$16 sps:$4 sm:$0xff]  }
  0xd5   :  { %5242 = vmatprep.subr.bf16.mxu1 %v7568_v15  ;;  %v810_v14 = vld [vmem:[%s11224_s2] sm:$0xf]  ;;  %v9392_v15 = vrot.slane %v9143_v39, %v8646_v49 }
  0xd7   :  { %5202 = vmatpush1.bf16.msra.mxu0 %v7563_v16  ;;  %v814_v16 = vsub.s32 0, %v8628_v42  ;;  %v9407_v39 = vcombine.high %v9392_v15, %v9392_v15 }
  0xd8   :  { %5243 = vmatpush1.bf16.msra.mxu1 %v7566_v19  ;;  %5203 = vmatprep.subr.bf16.mxu0 %v7571_v20  ;;  %v7632_v19 = vld [vmem:[%s11223_s1 + $0x10e4] ss:$16 sps:$4 sm:$0xff]  }
  0xd9   :  { %5244 = vmatprep.subr.bf16.mxu1 %v7574_v21  ;;  %v7635_v20 = vld [vmem:[%s11223_s1 + $0x12e4] ss:$16 sps:$4 sm:$0xff]   ;;  %v818_v21 = vsub.s32 1, %v8628_v42 }
  0xdb   :  { %5204 = vmatpush1.bf16.msra.mxu0 %v7569_v22  ;;  %v9403_v22 = vrot.slane %v949_v11, %v8646_v49  ;;  %v7663_v11 = vld [vmem:[%s11223_s1 + $0x1240] ss:$16 sps:$4 sm:$0xff]  }
  0xdc   :  { %5245 = vmatpush1.bf16.msra.mxu1 %v7572_v24  ;;  %5205 = vmatprep.subr.bf16.mxu0 %v7577_v25  ;;  %v7630_v24 = vld [vmem:[%s11223_s1 + $0x10e0] ss:$16 sps:$4 sm:$0xff]  }
  0xdd   :  { %5246 = vmatprep.subr.bf16.mxu1 %v7580_v27  ;;  %v7633_v25 = vld [vmem:[%s11223_s1 + $0x12e0] ss:$16 sps:$4 sm:$0xff]   ;;  %v815_v27 = vrot.slane %v810_v14, %v814_v16 }
  0xde   :  { %v7666_v16 = vld [vmem:[%s11223_s1 + $0x1020] ss:$16 sps:$4 sm:$0xff]  }
  0xdf   :  { %5206 = vmatpush1.bf16.msra.mxu0 %v7575_v28  ;;  %v7638_v28 = vld [vmem:[%s11223_s1 + $0x10c4] ss:$16 sps:$4 sm:$0xff]  }
  0xe0   :  { %5247 = vmatpush1.bf16.msra.mxu1 %v7578_v29  ;;  %5207 = vmatprep.subr.bf16.mxu0 %v7583_v30  ;;  %v7641_v29 = vld [vmem:[%s11223_s1 + $0x12c4] ss:$16 sps:$4 sm:$0xff]   ;;  %v819_v30 = vrot.slane %v810_v14, %v818_v21 }
  0xe1   :  { %5248 = vmatprep.subr.bf16.mxu1 %v7586_v31  ;;  %v9423_v31 = vcombine.high %v9403_v22, %v9403_v22  ;;  %v7671_v14 = vld [vmem:[%s11223_s1 + $0x1224] ss:$16 sps:$4 sm:$0xff]  }
  0xe2   :  { %v7677_v21 = vld [vmem:[%s11223_s1 + $0x1204] ss:$16 sps:$4 sm:$0xff]  }
  0xe3   :  { %5208 = vmatpush2.bf16.msra.mxu0 %v7581_v33 }
  0xe4   :  { %5249 = vmatpush2.bf16.msra.mxu1 %v7584_v34  ;;  %5209 = vmatprep.subr.bf16.mxu0 %v7589_v36  ;;  %v7636_v36 = vld [vmem:[%s11223_s1 + $0x10c0] ss:$16 sps:$4 sm:$0xff]  }
  0xe5   :  { %5250 = vmatprep.subr.bf16.mxu1 %v7592_v37  ;;  %v7639_v37 = vld [vmem:[%s11223_s1 + $0x12c0] ss:$16 sps:$4 sm:$0xff]  }
  0xe7   :  { %5210 = vmatpush2.bf16.msra.mxu0 %v7587_v38 }
  0xe8   :  { %5251 = vmatpush2.bf16.msra.mxu1 %v7590_v32  ;;  %5211 = vmatprep.subr.bf16.mxu0 %v7595_v40 }
  0xe9   :  { %5252 = vmatprep.subr.bf16.mxu1 %v7598_v44  ;;  %v7644_v44 = vld [vmem:[%s11223_s1 + $0x10a4] ss:$16 sps:$4 sm:$0xff]  }
  0xeb   :  { %5212 = vmatpush2.bf16.msra.mxu0 %v7593_v45  ;;  %v7647_v45 = vld [vmem:[%s11223_s1 + $0x12a4] ss:$16 sps:$4 sm:$0xff]  }
  0xec   :  { %5253 = vmatpush2.bf16.msra.mxu1 %v7596_v46  ;;  %5213 = vmatprep.subr.bf16.mxu0 %v7601_v47 }
  0xed   :  { %5254 = vmatprep.subr.bf16.mxu1 %v7604_v48  ;;  %v7642_v48 = vld [vmem:[%s11223_s1 + $0x10a0] ss:$16 sps:$4 sm:$0xff]  }
  0xef   :  { %5214 = vmatpush2.bf16.msra.mxu0 %v7599_v51  ;;  %v7645_v51 = vld [vmem:[%s11223_s1 + $0x12a0] ss:$16 sps:$4 sm:$0xff]  }
  0xf0   :  { %5255 = vmatpush2.bf16.msra.mxu1 %v7602_v52  ;;  %5215 = vmatprep.subr.bf16.mxu0 %v7607_v53 }
  0xf1   :  { %5256 = vmatprep.subr.bf16.mxu1 %v7610_v55 }
  0xf3   :  { %5216 = vmatpush2.bf16.msra.mxu0 %v7605_v56 }
  0xf4   :  { %5257 = vmatpush2.bf16.msra.mxu1 %v7608_v57  ;;  %5217 = vmatprep.subr.bf16.mxu0 %v7613_v58  ;;  %v7650_v58 = vld [vmem:[%s11223_s1 + $0x1084] ss:$16 sps:$4 sm:$0xff]  }
  0xf5   :  { %5258 = vmatprep.subr.bf16.mxu1 %v7616_v61  ;;  %v7653_v61 = vld [vmem:[%s11223_s1 + $0x1284] ss:$16 sps:$4 sm:$0xff]  }
  0xf7   :  { %5218 = vmatpush2.bf16.msra.mxu0 %v7611_v62  ;;  %v7648_v62 = vld [vmem:[%s11223_s1 + $0x1080] ss:$16 sps:$4 sm:$0xff]  }
  0xf8   :  { %5259 = vmatpush2.bf16.msra.mxu1 %v7614_v63  ;;  %5219 = vmatprep.subr.bf16.mxu0 %v7619_v2  ;;  %v7651_v63 = vld [vmem:[%s11223_s1 + $0x1280] ss:$16 sps:$4 sm:$0xff]   ;;  %v7656_v2 = vld [vmem:[%s11223_s1 + $0x1064] ss:$16 sps:$4 sm:$0xff]  }
  0xf9   :  { %5260 = vmatprep.subr.bf16.mxu1 %v7622_v3  ;;  %v7659_v3 = vld [vmem:[%s11223_s1 + $0x1264] ss:$16 sps:$4 sm:$0xff]  }
  0xfb   :  { %5220 = vmatpush2.bf16.msra.mxu0 %v7617_v5  ;;  %v7654_v5 = vld [vmem:[%s11223_s1 + $0x1060] ss:$16 sps:$4 sm:$0xff]  }
  0xfc   :  { %5261 = vmatpush2.bf16.msra.mxu1 %v7620_v7  ;;  %5221 = vmatprep.subr.bf16.mxu0 %v7625_v8  ;;  %v7657_v7 = vld [vmem:[%s11223_s1 + $0x1260] ss:$16 sps:$4 sm:$0xff]   ;;  %v7662_v8 = vld [vmem:[%s11223_s1 + $0x1044] ss:$16 sps:$4 sm:$0xff]  }
  0xfd   :  { %5262 = vmatprep.subr.bf16.mxu1 %v7628_v9  ;;  %v7665_v9 = vld [vmem:[%s11223_s1 + $0x1244] ss:$16 sps:$4 sm:$0xff]  }
  0xff   :  { %5222 = vmatpush2.bf16.msra.mxu0 %v7623_v10  ;;  %v7660_v10 = vld [vmem:[%s11223_s1 + $0x1040] ss:$16 sps:$4 sm:$0xff]  }
 0x100   :  { %5263 = vmatpush2.bf16.msra.mxu1 %v7626_v12  ;;  %5273 = vmatprep.subr.bf16.mxu0 %v7632_v19  ;;  %v7668_v12 = vld [vmem:[%s11223_s1 + $0x1024] ss:$16 sps:$4 sm:$0xff]   ;;  %v7669_v19 = vld [vmem:[%s11223_s1 + $0x1220] ss:$16 sps:$4 sm:$0xff]  }
 0x101   :  { %5314 = vmatprep.subr.bf16.mxu1 %v7635_v20  ;;  %v7674_v20 = vld [vmem:[%s11223_s1 + $0x1004] ss:$16 sps:$4 sm:$0xff]  }
 0x102   :  { %v4979_v33 = vpop.f32.mrf.mxu0  ;;  %5224 = vmatmul.mubr.bf16.vlgmr.msra.gmra.mxu0 %v9392_v15 }
 0x103   :  { %v5020_v34 = vpop.f32.mrf.mxu1  ;;  %5265 = vmatmul.mubr.bf16.vlgmr.msra.gmra.mxu1 %v9407_v39  ;;  %v4980_v38 = vadd.f32 %v4979_v33, %v815_v27  ;;  %5274 = vmatpush1.bf16.msra.mxu0 %v7630_v24  ;;  %v7672_v24 = vld [vmem:[%s11223_s1 + $0x1000] ss:$16 sps:$4 sm:$0xff]   ;;  %v7680_v27 = vld [vmem:[%s11223_s1 + $0x11e4] ss:$16 sps:$4 sm:$0xff]  }
 0x104   :  { %5315 = vmatpush1.bf16.msra.mxu1 %v7633_v25  ;;  %v4981_v32 = vpop.f32.mrf.mxu0  ;;  %5275 = vmatprep.subr.bf16.mxu0 %v7638_v28  ;;  %v7675_v25 = vld [vmem:[%s11223_s1 + $0x1200] ss:$16 sps:$4 sm:$0xff]   ;;  %v7683_v28 = vld [vmem:[%s11223_s1 + $0x13e4] ss:$16 sps:$4 sm:$0xff]  }
 0x105   :  { %v5022_v40 = vpop.f32.mrf.mxu1  ;;  %5316 = vmatprep.subr.bf16.mxu1 %v7641_v29  ;;  %v9439_v46 = vadd.f32 %v5020_v34, %v4980_v38  ;;  %v4982_v47 = vadd.f32 %v4981_v32, %v819_v30  ;;  %5305 = vmatprep.mubr.bf16.mxu0 %v9403_v22  ;;  %v7678_v29 = vld [vmem:[%s11223_s1 + $0x11e0] ss:$16 sps:$4 sm:$0xff]   ;;  %v7686_v33 = vld [vmem:[%s11223_s1 + $0x11c4] ss:$16 sps:$4 sm:$0xff]  }
 0x106   :  { %5346 = vmatprep.mubr.bf16.mxu1 %v9423_v31  ;;  %v4983_v52 = vpop.f32.mrf.mxu0  ;;  %v7681_v30 = vld [vmem:[%s11223_s1 + $0x13e0] ss:$16 sps:$4 sm:$0xff]   ;;  %v7689_v34 = vld [vmem:[%s11223_s1 + $0x13c4] ss:$16 sps:$4 sm:$0xff]  }
 0x107   :  { %v5024_v53 = vpop.f32.mrf.mxu1  ;;  %v9449_v55 = vadd.f32 %v5022_v40, %v4982_v47  ;;  %5276 = vmatpush1.bf16.msra.mxu0 %v7636_v36  ;;  %v7684_v36 = vld [vmem:[%s11223_s1 + $0x11c0] ss:$16 sps:$4 sm:$0xff]   ;;  %v7692_v38 = vld [vmem:[%s11223_s1 + $0x11a4] ss:$16 sps:$4 sm:$0xff]  }
 0x108   :  { %5317 = vmatpush1.bf16.msra.mxu1 %v7639_v37  ;;  %v4984_v56 = vpop.f32.mrf.mxu0  ;;  %5277 = vmatprep.subr.bf16.mxu0 %v7644_v44  ;;  %v7687_v37 = vld [vmem:[%s11223_s1 + $0x13c0] ss:$16 sps:$4 sm:$0xff]   ;;  %v7695_v32 = vld [vmem:[%s11223_s1 + $0x13a4] ss:$16 sps:$4 sm:$0xff]  }
 0x109   :  { %v5025_v57 = vpop.f32.mrf.mxu1  ;;  %5318 = vmatprep.subr.bf16.mxu1 %v7647_v45  ;;  %v7690_v40 = vld [vmem:[%s11223_s1 + $0x11a0] ss:$16 sps:$4 sm:$0xff]   ;;  %v7698_v45 = vld [vmem:[%s11223_s1 + $0x1184] ss:$16 sps:$4 sm:$0xff]  }
 0x10a   :  { %v7693_v44 = vld [vmem:[%s11223_s1 + $0x13a0] ss:$16 sps:$4 sm:$0xff]   ;;  %v7701_v47 = vld [vmem:[%s11223_s1 + $0x1384] ss:$16 sps:$4 sm:$0xff]  }
 0x10b   :  { %5278 = vmatpush1.bf16.msra.mxu0 %v7642_v48  ;;  %v7696_v48 = vld [vmem:[%s11223_s1 + $0x1180] ss:$16 sps:$4 sm:$0xff]   ;;  %v7704_v52 = vld [vmem:[%s11223_s1 + $0x1164] ss:$16 sps:$4 sm:$0xff]  }
 0x10c   :  { %5319 = vmatpush1.bf16.msra.mxu1 %v7645_v51  ;;  %5279 = vmatprep.subr.bf16.mxu0 %v7650_v58  ;;  %v7699_v51 = vld [vmem:[%s11223_s1 + $0x1380] ss:$16 sps:$4 sm:$0xff]   ;;  %v7707_v53 = vld [vmem:[%s11223_s1 + $0x1364] ss:$16 sps:$4 sm:$0xff]  }
 0x10d   :  { %5320 = vmatprep.subr.bf16.mxu1 %v7653_v61  ;;  %v7702_v56 = vld [vmem:[%s11223_s1 + $0x1160] ss:$16 sps:$4 sm:$0xff]   ;;  %v7710_v58 = vld [vmem:[%s11223_s1 + $0x1144] ss:$16 sps:$4 sm:$0xff]  }
 0x10e   :  { %v7705_v57 = vld [vmem:[%s11223_s1 + $0x1360] ss:$16 sps:$4 sm:$0xff]   ;;  %v7713_v61 = vld [vmem:[%s11223_s1 + $0x1344] ss:$16 sps:$4 sm:$0xff]  }
 0x10f   :  { %5280 = vmatpush1.bf16.msra.mxu0 %v7648_v62  ;;  %v934_v62 = vcombine.high %v9355_v1, %v9355_v1  ;;  %v7719_v1 = vld [vmem:[%s11223_s1 + $0x1324] ss:$16 sps:$4 sm:$0xff]  }
 0x110   :  { %5321 = vmatpush1.bf16.msra.mxu1 %v7651_v63  ;;  %5281 = vmatprep.subr.bf16.mxu0 %v7656_v2  ;;  %v7708_v63 = vld [vmem:[%s11223_s1 + $0x1140] ss:$16 sps:$4 sm:$0xff]  }
 0x111   :  { %5322 = vmatprep.subr.bf16.mxu1 %v7659_v3  ;;  %v7711_v2 = vld [vmem:[%s11223_s1 + $0x1340] ss:$16 sps:$4 sm:$0xff]   ;;  %v7716_v3 = vld [vmem:[%s11223_s1 + $0x1124] ss:$16 sps:$4 sm:$0xff]  }
 0x113   :  { %5282 = vmatpush1.bf16.msra.mxu0 %v7654_v5  ;;  %v9592_v5 = vrot.slane %v934_v62, %v8646_v49  ;;  %v7747_v62 = vld [vmem:[%s11223_s1 + $0x1680] ss:$16 sps:$4 sm:$0xff]  }
 0x114   :  { %5323 = vmatpush1.bf16.msra.mxu1 %v7657_v7  ;;  %5283 = vmatprep.subr.bf16.mxu0 %v7662_v8  ;;  %v7714_v7 = vld [vmem:[%s11223_s1 + $0x1120] ss:$16 sps:$4 sm:$0xff]  }
 0x115   :  { %5324 = vmatprep.subr.bf16.mxu1 %v7665_v9  ;;  %v7717_v8 = vld [vmem:[%s11223_s1 + $0x1320] ss:$16 sps:$4 sm:$0xff]   ;;  %v7722_v9 = vld [vmem:[%s11223_s1 + $0x1104] ss:$16 sps:$4 sm:$0xff]  }
 0x117   :  { %5284 = vmatpush1.bf16.msra.mxu0 %v7660_v10  ;;  %v7725_v10 = vld [vmem:[%s11223_s1 + $0x1304] ss:$16 sps:$4 sm:$0xff]  }
 0x118   :  { %5325 = vmatpush1.bf16.msra.mxu1 %v7663_v11  ;;  %5285 = vmatprep.subr.bf16.mxu0 %v7668_v12  ;;  %v950_v11 = vcombine.high %v9592_v5, %v9592_v5  ;;  %v9610_v12 = vrot.slane %v9365_v4, %v8646_v49  ;;  %v7731_v4 = vld [vmem:[%s11223_s1 + $0x16e4] ss:$16 sps:$4 sm:$0xff]  }
 0x119   :  { %5326 = vmatprep.subr.bf16.mxu1 %v7671_v14  ;;  %v7720_v14 = vld [vmem:[%s11223_s1 + $0x1100] ss:$16 sps:$4 sm:$0xff]  }
 0x11b   :  { %5286 = vmatpush1.bf16.msra.mxu0 %v7666_v16  ;;  %v7723_v16 = vld [vmem:[%s11223_s1 + $0x1300] ss:$16 sps:$4 sm:$0xff]  }
 0x11c   :  { %5327 = vmatpush1.bf16.msra.mxu1 %v7669_v19  ;;  %5287 = vmatprep.subr.bf16.mxu0 %v7674_v20  ;;  %v7728_v19 = vld [vmem:[%s11223_s1 + $0x14e4] ss:$16 sps:$4 sm:$0xff]   ;;  %v7726_v20 = vld [vmem:[%s11223_s1 + $0x14e0] ss:$16 sps:$4 sm:$0xff]  }
 0x11d   :  { %5328 = vmatprep.subr.bf16.mxu1 %v7677_v21  ;;  %v7729_v21 = vld [vmem:[%s11223_s1 + $0x16e0] ss:$16 sps:$4 sm:$0xff]  }
 0x11f   :  { %5288 = vmatpush1.bf16.msra.mxu0 %v7672_v24  ;;  %v9631_v24 = vrot.slane %v950_v11, %v8646_v49  ;;  %v7764_v11 = vld [vmem:[%s11223_s1 + $0x1424] ss:$16 sps:$4 sm:$0xff]  }
 0x120   :  { %5329 = vmatpush1.bf16.msra.mxu1 %v7675_v25  ;;  %5289 = vmatprep.subr.bf16.mxu0 %v7680_v27  ;;  %v9635_v25 = vcombine.high %v9610_v12, %v9610_v12  ;;  %v7734_v27 = vld [vmem:[%s11223_s1 + $0x14c4] ss:$16 sps:$4 sm:$0xff]  }
 0x121   :  { %5330 = vmatprep.subr.bf16.mxu1 %v7683_v28  ;;  %v7737_v28 = vld [vmem:[%s11223_s1 + $0x16c4] ss:$16 sps:$4 sm:$0xff]  }
 0x123   :  { %5290 = vmatpush2.bf16.msra.mxu0 %v7678_v29  ;;  %v7732_v29 = vld [vmem:[%s11223_s1 + $0x14c0] ss:$16 sps:$4 sm:$0xff]  }
 0x124   :  { %5331 = vmatpush2.bf16.msra.mxu1 %v7681_v30  ;;  %5291 = vmatprep.subr.bf16.mxu0 %v7686_v33  ;;  %v7735_v30 = vld [vmem:[%s11223_s1 + $0x16c0] ss:$16 sps:$4 sm:$0xff]   ;;  %v9651_v33 = vcombine.high %v9631_v24, %v9631_v24 }
 0x125   :  { %5332 = vmatprep.subr.bf16.mxu1 %v7689_v34 }
 0x127   :  { %5292 = vmatpush2.bf16.msra.mxu0 %v7684_v36 }
 0x128   :  { %5333 = vmatpush2.bf16.msra.mxu1 %v7687_v37  ;;  %5293 = vmatprep.subr.bf16.mxu0 %v7692_v38 }
 0x129   :  { %5334 = vmatprep.subr.bf16.mxu1 %v7695_v32 }
 0x12b   :  { %5294 = vmatpush2.bf16.msra.mxu0 %v7690_v40  ;;  %v7740_v40 = vld [vmem:[%s11223_s1 + $0x14a4] ss:$16 sps:$4 sm:$0xff]  }
 0x12c   :  { %5335 = vmatpush2.bf16.msra.mxu1 %v7693_v44  ;;  %5295 = vmatprep.subr.bf16.mxu0 %v7698_v45  ;;  %v7743_v44 = vld [vmem:[%s11223_s1 + $0x16a4] ss:$16 sps:$4 sm:$0xff]  }
 0x12d   :  { %5336 = vmatprep.subr.bf16.mxu1 %v7701_v47 }
 0x12f   :  { %5296 = vmatpush2.bf16.msra.mxu0 %v7696_v48  ;;  %v7741_v48 = vld [vmem:[%s11223_s1 + $0x16a0] ss:$16 sps:$4 sm:$0xff]  }
 0x130   :  { %5337 = vmatpush2.bf16.msra.mxu1 %v7699_v51  ;;  %5297 = vmatprep.subr.bf16.mxu0 %v7704_v52 }
 0x131   :  { %5338 = vmatprep.subr.bf16.mxu1 %v7707_v53 }
 0x133   :  { %5298 = vmatpush2.bf16.msra.mxu0 %v7702_v56 }
 0x134   :  { %5339 = vmatpush2.bf16.msra.mxu1 %v7705_v57  ;;  %5299 = vmatprep.subr.bf16.mxu0 %v7710_v58  ;;  %v7746_v57 = vld [vmem:[%s11223_s1 + $0x1484] ss:$16 sps:$4 sm:$0xff]  }
 0x135   :  { %5340 = vmatprep.subr.bf16.mxu1 %v7713_v61  ;;  %v7749_v58 = vld [vmem:[%s11223_s1 + $0x1684] ss:$16 sps:$4 sm:$0xff]   ;;  %v7744_v61 = vld [vmem:[%s11223_s1 + $0x1480] ss:$16 sps:$4 sm:$0xff]  }
 0x137   :  { %5300 = vmatpush2.bf16.msra.mxu0 %v7708_v63  ;;  %v7752_v63 = vld [vmem:[%s11223_s1 + $0x1464] ss:$16 sps:$4 sm:$0xff]  }
 0x138   :  { %5341 = vmatpush2.bf16.msra.mxu1 %v7711_v2  ;;  %5301 = vmatprep.subr.bf16.mxu0 %v7716_v3  ;;  %v7755_v2 = vld [vmem:[%s11223_s1 + $0x1664] ss:$16 sps:$4 sm:$0xff]   ;;  %v7750_v3 = vld [vmem:[%s11223_s1 + $0x1460] ss:$16 sps:$4 sm:$0xff]  }
 0x139   :  { %5342 = vmatprep.subr.bf16.mxu1 %v7719_v1  ;;  %v7753_v1 = vld [vmem:[%s11223_s1 + $0x1660] ss:$16 sps:$4 sm:$0xff]  }
 0x13b   :  { %5302 = vmatpush2.bf16.msra.mxu0 %v7714_v7  ;;  %v7758_v7 = vld [vmem:[%s11223_s1 + $0x1444] ss:$16 sps:$4 sm:$0xff]  }
 0x13c   :  { %5343 = vmatpush2.bf16.msra.mxu1 %v7717_v8  ;;  %5303 = vmatprep.subr.bf16.mxu0 %v7722_v9  ;;  %v7761_v8 = vld [vmem:[%s11223_s1 + $0x1644] ss:$16 sps:$4 sm:$0xff]   ;;  %v7756_v9 = vld [vmem:[%s11223_s1 + $0x1440] ss:$16 sps:$4 sm:$0xff]  }
 0x13d   :  { %5344 = vmatprep.subr.bf16.mxu1 %v7725_v10  ;;  %v7759_v10 = vld [vmem:[%s11223_s1 + $0x1640] ss:$16 sps:$4 sm:$0xff]  }
 0x13f   :  { %5304 = vmatpush2.bf16.msra.mxu0 %v7720_v14  ;;  %v7767_v14 = vld [vmem:[%s11223_s1 + $0x1624] ss:$16 sps:$4 sm:$0xff]  }
 0x140   :  { %5345 = vmatpush2.bf16.msra.mxu1 %v7723_v16  ;;  %5355 = vmatprep.subr.bf16.mxu0 %v7728_v19  ;;  %v7762_v16 = vld [vmem:[%s11223_s1 + $0x1420] ss:$16 sps:$4 sm:$0xff]  }
 0x141   :  { %5396 = vmatprep.subr.bf16.mxu1 %v7731_v4  ;;  %v7765_v19 = vld [vmem:[%s11223_s1 + $0x1620] ss:$16 sps:$4 sm:$0xff]   ;;  %v7770_v4 = vld [vmem:[%s11223_s1 + $0x1404] ss:$16 sps:$4 sm:$0xff]  }
 0x142   :  { %v5061_v34 = vpop.f32.mrf.mxu0  ;;  %5306 = vmatmul.mubr.bf16.vlgmr.msra.gmra.mxu0 %v9610_v12 }
 0x143   :  { %v5102_v36 = vpop.f32.mrf.mxu1  ;;  %5347 = vmatmul.mubr.bf16.vlgmr.msra.gmra.mxu1 %v9635_v25  ;;  %v5062_v37 = vadd.f32 %v5061_v34, %v9439_v46  ;;  %5356 = vmatpush1.bf16.msra.mxu0 %v7726_v20  ;;  %v7738_v46 = vld [vmem:[%s11223_s1 + $0x14a0] ss:$16 sps:$4 sm:$0xff]   ;;  %v7773_v20 = vld [vmem:[%s11223_s1 + $0x1604] ss:$16 sps:$4 sm:$0xff]  }
 0x144   :  { %5397 = vmatpush1.bf16.msra.mxu1 %v7729_v21  ;;  %v5063_v38 = vpop.f32.mrf.mxu0  ;;  %5357 = vmatprep.subr.bf16.mxu0 %v7734_v27  ;;  %v7768_v21 = vld [vmem:[%s11223_s1 + $0x1400] ss:$16 sps:$4 sm:$0xff]  }
 0x145   :  { %v5104_v32 = vpop.f32.mrf.mxu1  ;;  %5398 = vmatprep.subr.bf16.mxu1 %v7737_v28  ;;  %v9662_v45 = vadd.f32 %v5102_v36, %v5062_v37  ;;  %v5064_v47 = vadd.f32 %v5063_v38, %v9449_v55  ;;  %5387 = vmatprep.mubr.bf16.mxu0 %v9631_v24  ;;  %v7771_v27 = vld [vmem:[%s11223_s1 + $0x1600] ss:$16 sps:$4 sm:$0xff]   ;;  %v7776_v28 = vld [vmem:[%s11223_s1 + $0x15e4] ss:$16 sps:$4 sm:$0xff]  }
 0x146   :  { %5428 = vmatprep.mubr.bf16.mxu1 %v9651_v33  ;;  %v5065_v51 = vpop.f32.mrf.mxu0  ;;  %v7777_v34 = vld [vmem:[%s11223_s1 + $0x17e0] ss:$16 sps:$4 sm:$0xff]   ;;  %v7782_v36 = vld [vmem:[%s11223_s1 + $0x15c4] ss:$16 sps:$4 sm:$0xff]  }
 0x147   :  { %v5106_v52 = vpop.f32.mrf.mxu1  ;;  %v9673_v53 = vadd.f32 %v5104_v32, %v5064_v47  ;;  %5358 = vmatpush1.bf16.msra.mxu0 %v7732_v29  ;;  %v7779_v29 = vld [vmem:[%s11223_s1 + $0x17e4] ss:$16 sps:$4 sm:$0xff]   ;;  %v7780_v38 = vld [vmem:[%s11223_s1 + $0x15c0] ss:$16 sps:$4 sm:$0xff]  }
 0x148   :  { %5399 = vmatpush1.bf16.msra.mxu1 %v7735_v30  ;;  %v5066_v56 = vpop.f32.mrf.mxu0  ;;  %5359 = vmatprep.subr.bf16.mxu0 %v7740_v40  ;;  %v7774_v30 = vld [vmem:[%s11223_s1 + $0x15e0] ss:$16 sps:$4 sm:$0xff]   ;;  %v7785_v37 = vld [vmem:[%s11223_s1 + $0x17c4] ss:$16 sps:$4 sm:$0xff]  }
 0x149   :  { %v5107_v55 = vpop.f32.mrf.mxu1  ;;  %5400 = vmatprep.subr.bf16.mxu1 %v7743_v44  ;;  %v7783_v32 = vld [vmem:[%s11223_s1 + $0x17c0] ss:$16 sps:$4 sm:$0xff]   ;;  %v7788_v40 = vld [vmem:[%s11223_s1 + $0x15a4] ss:$16 sps:$4 sm:$0xff]  }
 0x14a   :  { %v7791_v44 = vld [vmem:[%s11223_s1 + $0x17a4] ss:$16 sps:$4 sm:$0xff]   ;;  %v7786_v47 = vld [vmem:[%s11223_s1 + $0x15a0] ss:$16 sps:$4 sm:$0xff]  }
 0x14b   :  { %5360 = vmatpush1.bf16.msra.mxu0 %v7738_v46  ;;  %v7789_v46 = vld [vmem:[%s11223_s1 + $0x17a0] ss:$16 sps:$4 sm:$0xff]   ;;  %v7797_v51 = vld [vmem:[%s11223_s1 + $0x1784] ss:$16 sps:$4 sm:$0xff]  }
 0x14c   :  { %5401 = vmatpush1.bf16.msra.mxu1 %v7741_v48  ;;  %5361 = vmatprep.subr.bf16.mxu0 %v7746_v57  ;;  %v7794_v48 = vld [vmem:[%s11223_s1 + $0x1584] ss:$16 sps:$4 sm:$0xff]   ;;  %v7792_v52 = vld [vmem:[%s11223_s1 + $0x1580] ss:$16 sps:$4 sm:$0xff]  }
 0x14d   :  { %5402 = vmatprep.subr.bf16.mxu1 %v7749_v58  ;;  %v7795_v56 = vld [vmem:[%s11223_s1 + $0x1780] ss:$16 sps:$4 sm:$0xff]   ;;  %v7800_v55 = vld [vmem:[%s11223_s1 + $0x1564] ss:$16 sps:$4 sm:$0xff]  }
 0x14e   :  { %v7803_v57 = vld [vmem:[%s11223_s1 + $0x1764] ss:$16 sps:$4 sm:$0xff]   ;;  %v7798_v58 = vld [vmem:[%s11223_s1 + $0x1560] ss:$16 sps:$4 sm:$0xff]  }
 0x14f   :  { %5362 = vmatpush1.bf16.msra.mxu0 %v7744_v61  ;;  %v7801_v61 = vld [vmem:[%s11223_s1 + $0x1760] ss:$16 sps:$4 sm:$0xff]  }
 0x150   :  { %5403 = vmatpush1.bf16.msra.mxu1 %v7747_v62  ;;  %5363 = vmatprep.subr.bf16.mxu0 %v7752_v63  ;;  %v7806_v62 = vld [vmem:[%s11223_s1 + $0x1544] ss:$16 sps:$4 sm:$0xff]  }
 0x151   :  { %5404 = vmatprep.subr.bf16.mxu1 %v7755_v2  ;;  %v7809_v63 = vld [vmem:[%s11223_s1 + $0x1744] ss:$16 sps:$4 sm:$0xff]   ;;  %v7804_v2 = vld [vmem:[%s11223_s1 + $0x1540] ss:$16 sps:$4 sm:$0xff]  }
 0x153   :  { %5364 = vmatpush1.bf16.msra.mxu0 %v7750_v3  ;;  %v7807_v3 = vld [vmem:[%s11223_s1 + $0x1740] ss:$16 sps:$4 sm:$0xff]  }
 0x154   :  { %5405 = vmatpush1.bf16.msra.mxu1 %v7753_v1  ;;  %5365 = vmatprep.subr.bf16.mxu0 %v7758_v7  ;;  %v7812_v1 = vld [vmem:[%s11223_s1 + $0x1524] ss:$16 sps:$4 sm:$0xff]  }
 0x155   :  { %5406 = vmatprep.subr.bf16.mxu1 %v7761_v8  ;;  %v7815_v7 = vld [vmem:[%s11223_s1 + $0x1724] ss:$16 sps:$4 sm:$0xff]   ;;  %v7810_v8 = vld [vmem:[%s11223_s1 + $0x1520] ss:$16 sps:$4 sm:$0xff]  }
 0x157   :  { %5366 = vmatpush1.bf16.msra.mxu0 %v7756_v9  ;;  %v7813_v9 = vld [vmem:[%s11223_s1 + $0x1720] ss:$16 sps:$4 sm:$0xff]  }
 0x158   :  { %5407 = vmatpush1.bf16.msra.mxu1 %v7759_v10  ;;  %5367 = vmatprep.subr.bf16.mxu0 %v7764_v11  ;;  %v7818_v10 = vld [vmem:[%s11223_s1 + $0x1504] ss:$16 sps:$4 sm:$0xff]  }
 0x159   :  { %5408 = vmatprep.subr.bf16.mxu1 %v7767_v14  ;;  %v7821_v11 = vld [vmem:[%s11223_s1 + $0x1704] ss:$16 sps:$4 sm:$0xff]   ;;  %v9827_v14 = vrot.slane %v9592_v5, %v8646_v49  ;;  %v7828_v5 = vld [vmem:[%s11223_s1 + $0xec] ss:$16 sps:$4 sm:$0xff]  }
 0x15b   :  { %5368 = vmatpush1.bf16.msra.mxu0 %v7762_v16  ;;  %v7816_v16 = vld [vmem:[%s11223_s1 + $0x1500] ss:$16 sps:$4 sm:$0xff]  }
 0x15c   :  { %5409 = vmatpush1.bf16.msra.mxu1 %v7765_v19  ;;  %5369 = vmatprep.subr.bf16.mxu0 %v7770_v4  ;;  %v7819_v19 = vld [vmem:[%s11223_s1 + $0x1700] ss:$16 sps:$4 sm:$0xff]   ;;  %v7825_v4 = vld [vmem:[%s11223_s1 + $0x1864] ss:$16 sps:$4 sm:$0xff]  }
 0x15d   :  { %5410 = vmatprep.subr.bf16.mxu1 %v7773_v20  ;;  %v7823_v20 = vld [vmem:[%s11223_s1 + $0x1860] ss:$16 sps:$4 sm:$0xff]  }
 0x15f   :  { %5370 = vmatpush1.bf16.msra.mxu0 %v7768_v21  ;;  %v7826_v21 = vld [vmem:[%s11223_s1 + $0xe8] ss:$16 sps:$4 sm:$0xff]  }
 0x160   :  { %5411 = vmatpush1.bf16.msra.mxu1 %v7771_v27  ;;  %5371 = vmatprep.subr.bf16.mxu0 %v7776_v28  ;;  %v9849_v27 = vcombine.high %v9827_v14, %v9827_v14  ;;  %v7831_v28 = vld [vmem:[%s11223_s1 + $0x1844] ss:$16 sps:$4 sm:$0xff]  }
 0x161   :  { %5412 = vmatprep.subr.bf16.mxu1 %v7779_v29  ;;  %v7834_v29 = vld [vmem:[%s11223_s1 + $0xcc] ss:$16 sps:$4 sm:$0xff]  }
 0x163   :  { %5372 = vmatpush2.bf16.msra.mxu0 %v7774_v30  ;;  %v7829_v30 = vld [vmem:[%s11223_s1 + $0x1840] ss:$16 sps:$4 sm:$0xff]  }
 0x164   :  { %5413 = vmatpush2.bf16.msra.mxu1 %v7777_v34  ;;  %5373 = vmatprep.subr.bf16.mxu0 %v7782_v36  ;;  %v7832_v34 = vld [vmem:[%s11223_s1 + $0xc8] ss:$16 sps:$4 sm:$0xff]  }
 0x165   :  { %5414 = vmatprep.subr.bf16.mxu1 %v7785_v37 }
 0x167   :  { %5374 = vmatpush2.bf16.msra.mxu0 %v7780_v38 }
 0x168   :  { %5415 = vmatpush2.bf16.msra.mxu1 %v7783_v32  ;;  %5375 = vmatprep.subr.bf16.mxu0 %v7788_v40 }
 0x169   :  { %5416 = vmatprep.subr.bf16.mxu1 %v7791_v44  ;;  %v7837_v44 = vld [vmem:[%s11223_s1 + $0x1824] ss:$16 sps:$4 sm:$0xff]  }
 0x16b   :  { %5376 = vmatpush2.bf16.msra.mxu0 %v7786_v47  ;;  %v7840_v47 = vld [vmem:[%s11223_s1 + $0xac] ss:$16 sps:$4 sm:$0xff]  }
 0x16c   :  { %5417 = vmatpush2.bf16.msra.mxu1 %v7789_v46  ;;  %5377 = vmatprep.subr.bf16.mxu0 %v7794_v48 }
 0x16d   :  { %5418 = vmatprep.subr.bf16.mxu1 %v7797_v51  ;;  %v7838_v51 = vld [vmem:[%s11223_s1 + $0xa8] ss:$16 sps:$4 sm:$0xff]  }
 0x16f   :  { %5378 = vmatpush2.bf16.msra.mxu0 %v7792_v52  ;;  %v8479_v52 = vmov 0  }
 0x170   :  { %5419 = vmatpush2.bf16.msra.mxu1 %v7795_v56  ;;  %5379 = vmatprep.subr.bf16.mxu0 %v7800_v55 }
 0x171   :  { %5420 = vmatprep.subr.bf16.mxu1 %v7803_v57 }
 0x173   :  { %5380 = vmatpush2.bf16.msra.mxu0 %v7798_v58 }
 0x174   :  { %5421 = vmatpush2.bf16.msra.mxu1 %v7801_v61  ;;  %5381 = vmatprep.subr.bf16.mxu0 %v7806_v62  ;;  %v7843_v61 = vld [vmem:[%s11223_s1 + $0x1804] ss:$16 sps:$4 sm:$0xff]   ;;  %v7846_v62 = vld [vmem:[%s11223_s1 + $0x8c] ss:$16 sps:$4 sm:$0xff]  }
 0x175   :  { %5422 = vmatprep.subr.bf16.mxu1 %v7809_v63  ;;  %v7844_v63 = vld [vmem:[%s11223_s1 + $0x88] ss:$16 sps:$4 sm:$0xff]  }
 0x177   :  { %5382 = vmatpush2.bf16.msra.mxu0 %v7804_v2  ;;  %v6377_v2 = vld.sshfl [vmem:[%s11222_s0 + $0x18] sm:$0x1 pattern:$0x75316420] }
 0x178   :  { %5423 = vmatpush2.bf16.msra.mxu1 %v7807_v3  ;;  %5383 = vmatprep.subr.bf16.mxu0 %v7812_v1  ;;  %v7849_v3 = vld [vmem:[%s11223_s1 + $0x6c] ss:$16 sps:$4 sm:$0xff]  }
 0x179   :  { %5424 = vmatprep.subr.bf16.mxu1 %v7815_v7  ;;  %v7852_v1 = vld [vmem:[%s11223_s1 + $0x2ec] ss:$16 sps:$4 sm:$0xff]   ;;  %v7847_v7 = vld [vmem:[%s11223_s1 + $0x68] ss:$16 sps:$4 sm:$0xff]  }
 0x17b   :  { %5384 = vmatpush2.bf16.msra.mxu0 %v7810_v8  ;;  %v7850_v8 = vld [vmem:[%s11223_s1 + $0x2e8] ss:$16 sps:$4 sm:$0xff]  }
 0x17c   :  { %5425 = vmatpush2.bf16.msra.mxu1 %v7813_v9  ;;  %5385 = vmatprep.subr.bf16.mxu0 %v7818_v10  ;;  %v9913_v9 = vrot.slane %v6377_v2, %v8646_v49  ;;  %v7855_v10 = vld [vmem:[%s11223_s1 + $0x4c] ss:$16 sps:$4 sm:$0xff]   ;;  %v7853_v49 = vld [vmem:[%s11223_s1 + $0x48] ss:$16 sps:$4 sm:$0xff]  }
 0x17d   :  { %5426 = vmatprep.subr.bf16.mxu1 %v7821_v11  ;;  %v7858_v11 = vld [vmem:[%s11223_s1 + $0x2cc] ss:$16 sps:$4 sm:$0xff]  }
 0x17e   :  { %v7903_v2 = vld [vmem:[%s11223_s1 + $0x14c] ss:$16 sps:$4 sm:$0xff]  }
 0x17f   :  { %5386 = vmatpush2.bf16.msra.mxu0 %v7816_v16  ;;  %v7856_v16 = vld [vmem:[%s11223_s1 + $0x2c8] ss:$16 sps:$4 sm:$0xff]  }
 0x180   :  { %5427 = vmatpush2.bf16.msra.mxu1 %v7819_v19  ;;  %5445 = vmatprep.subr.bf16.mxu0 %v7825_v4  ;;  %v7861_v19 = vld [vmem:[%s11223_s1 + $0x2c] ss:$16 sps:$4 sm:$0xff]  }
 0x181   :  { %5478 = vmatprep.subr.bf16.mxu1 %v7828_v5  ;;  %v7864_v4 = vld [vmem:[%s11223_s1 + $0x2ac] ss:$16 sps:$4 sm:$0xff]   ;;  %v7859_v5 = vld [vmem:[%s11223_s1 + $0x28] ss:$16 sps:$4 sm:$0xff]  }
 0x182   :  { %v5143_v36 = vpop.f32.mrf.mxu0  ;;  %5388 = vmatmul.mubr.bf16.vlgmr.msra.gmra.mxu0 %v9827_v14 }
 0x183   :  { %v5184_v37 = vpop.f32.mrf.mxu1  ;;  %5429 = vmatmul.mubr.bf16.vlgmr.msra.gmra.mxu1 %v9849_v27  ;;  %v5144_v38 = vadd.f32 %v5143_v36, %v9662_v45  ;;  %5446 = vmatpush1.bf16.msra.mxu0 %v7823_v20  ;;  %v7835_v45 = vld [vmem:[%s11223_s1 + $0x1820] ss:$16 sps:$4 sm:$0xff]   ;;  %v7862_v20 = vld [vmem:[%s11223_s1 + $0x2a8] ss:$16 sps:$4 sm:$0xff]  }
 0x184   :  { %5479 = vmatpush1.bf16.msra.mxu1 %v7826_v21  ;;  %v5145_v32 = vpop.f32.mrf.mxu0  ;;  %5447 = vmatprep.subr.bf16.mxu0 %v7831_v28  ;;  %v7867_v21 = vld [vmem:[%s11223_s1 + $0xc] ss:$16 sps:$4 sm:$0xff]   ;;  %v7865_v28 = vld [vmem:[%s11223_s1 + $0x8] ss:$16 sps:$4 sm:$0xff]  }
 0x185   :  { %v5186_v40 = vpop.f32.mrf.mxu1  ;;  %5480 = vmatprep.subr.bf16.mxu1 %v7834_v29  ;;  %v9872_v46 = vadd.f32 %v5184_v37, %v5144_v38  ;;  %v5146_v48 = vadd.f32 %v5145_v32, %v9673_v53  ;;  %5469 = vmatprep.mubr.bf16.mxu0 %v8479_v52  ;;  %v7868_v29 = vld [vmem:[%s11223_s1 + $0x288] ss:$16 sps:$4 sm:$0xff]   ;;  %v7879_v38 = vld [vmem:[%s11223_s1 + $0x1cc] ss:$16 sps:$4 sm:$0xff]  }
 0x186   :  { %5510 = vmatprep.mubr.bf16.mxu1 %v8674_v60  ;;  %v5147_v56 = vpop.f32.mrf.mxu0  ;;  %v7841_v60 = vld [vmem:[%s11223_s1 + $0x1800] ss:$16 sps:$4 sm:$0xff]   ;;  %v7871_v36 = vld [vmem:[%s11223_s1 + $0x1e8] ss:$16 sps:$4 sm:$0xff]   ;;  %v7882_v32 = vld [vmem:[%s11223_s1 + $0x24c] ss:$16 sps:$4 sm:$0xff]  }
 0x187   :  { %v5188_v55 = vpop.f32.mrf.mxu1  ;;  %v9883_v57 = vadd.f32 %v5186_v40, %v5146_v48  ;;  %5448 = vmatpush1.bf16.msra.mxu0 %v7829_v30  ;;  %v7873_v30 = vld [vmem:[%s11223_s1 + $0x1ec] ss:$16 sps:$4 sm:$0xff]   ;;  %v7874_v37 = vld [vmem:[%s11223_s1 + $0x268] ss:$16 sps:$4 sm:$0xff]  }
 0x188   :  { %5481 = vmatpush1.bf16.msra.mxu1 %v7832_v34  ;;  %v5148_v53 = vpop.f32.mrf.mxu0  ;;  %5449 = vmatprep.subr.bf16.mxu0 %v7837_v44  ;;  %v7876_v34 = vld [vmem:[%s11223_s1 + $0x26c] ss:$16 sps:$4 sm:$0xff]   ;;  %v7877_v40 = vld [vmem:[%s11223_s1 + $0x1c8] ss:$16 sps:$4 sm:$0xff]  }
 0x189   :  { %v5189_v58 = vpop.f32.mrf.mxu1  ;;  %5482 = vmatprep.subr.bf16.mxu1 %v7840_v47  ;;  %v7880_v44 = vld [vmem:[%s11223_s1 + $0x248] ss:$16 sps:$4 sm:$0xff]   ;;  %v7885_v47 = vld [vmem:[%s11223_s1 + $0x1ac] ss:$16 sps:$4 sm:$0xff]  }
 0x18a   :  { %v7888_v48 = vld [vmem:[%s11223_s1 + $0x22c] ss:$16 sps:$4 sm:$0xff]   ;;  %v7889_v53 = vld [vmem:[%s11223_s1 + $0x188] ss:$16 sps:$4 sm:$0xff]  }
 0x18b   :  { %5450 = vmatpush1.bf16.msra.mxu0 %v7835_v45  ;;  %v7883_v45 = vld [vmem:[%s11223_s1 + $0x1a8] ss:$16 sps:$4 sm:$0xff]   ;;  %v7891_v56 = vld [vmem:[%s11223_s1 + $0x18c] ss:$16 sps:$4 sm:$0xff]  }
 0x18c   :  { %5483 = vmatpush1.bf16.msra.mxu1 %v7838_v51  ;;  %5451 = vmatprep.subr.bf16.mxu0 %v7843_v61  ;;  %v7886_v51 = vld [vmem:[%s11223_s1 + $0x228] ss:$16 sps:$4 sm:$0xff]   ;;  %v7894_v55 = vld [vmem:[%s11223_s1 + $0x20c] ss:$16 sps:$4 sm:$0xff]  }
 0x18d   :  { %5484 = vmatprep.subr.bf16.mxu1 %v7846_v62  ;;  %v7892_v58 = vld [vmem:[%s11223_s1 + $0x208] ss:$16 sps:$4 sm:$0xff]   ;;  %v7897_v61 = vld [vmem:[%s11223_s1 + $0x16c] ss:$16 sps:$4 sm:$0xff]  }
 0x18e   :  { %v7900_v62 = vld [vmem:[%s11223_s1 + $0x3ec] ss:$16 sps:$4 sm:$0xff]  }
 0x18f   :  { %5452 = vmatpush1.bf16.msra.mxu0 %v7841_v60  ;;  %v7895_v60 = vld [vmem:[%s11223_s1 + $0x168] ss:$16 sps:$4 sm:$0xff]  }
 0x190   :  { %5485 = vmatpush1.bf16.msra.mxu1 %v7844_v63  ;;  %5519 = vmatprep.subr.bf16.mxu0 %v7852_v1  ;;  %v7898_v63 = vld [vmem:[%s11223_s1 + $0x3e8] ss:$16 sps:$4 sm:$0xff]  }
 0x191   :  { %5486 = vmatprep.subr.bf16.mxu1 %v7849_v3  ;;  %v7906_v3 = vld [vmem:[%s11223_s1 + $0x3cc] ss:$16 sps:$4 sm:$0xff]   ;;  %v7901_v1 = vld [vmem:[%s11223_s1 + $0x148] ss:$16 sps:$4 sm:$0xff]  }
 0x192   :  { %7162 = vmatmul.mubr.msk.bf16.vlgmr.msra.gmra.mxu0 %vm4941_vm0, %v9913_v9 }
 0x193   :  { %5520 = vmatpush1.bf16.msra.mxu0 %v7850_v8  ;;  %5551 = vmatprep.mubr.bf16.mxu0 %v8687_v0  ;;  %v7870_v0 = vld [vmem:[%s11223_s1 + $0x28c] ss:$16 sps:$4 sm:$0xff]  }
 0x194   :  { %5487 = vmatpush1.bf16.msra.mxu1 %v7847_v7  ;;  %5521 = vmatprep.subr.bf16.mxu0 %v7858_v11  ;;  %v7904_v7 = vld [vmem:[%s11223_s1 + $0x3c8] ss:$16 sps:$4 sm:$0xff]   ;;  %v7909_v8 = vld [vmem:[%s11223_s1 + $0x12c] ss:$16 sps:$4 sm:$0xff]  }
 0x195   :  { %5488 = vmatprep.subr.bf16.mxu1 %v7855_v10  ;;  %v7912_v10 = vld [vmem:[%s11223_s1 + $0x3ac] ss:$16 sps:$4 sm:$0xff]   ;;  %v7907_v11 = vld [vmem:[%s11223_s1 + $0x128] ss:$16 sps:$4 sm:$0xff]  }
 0x197   :  { %5522 = vmatpush1.bf16.msra.mxu0 %v7856_v16  ;;  %v7915_v16 = vld [vmem:[%s11223_s1 + $0x10c] ss:$16 sps:$4 sm:$0xff]  }
 0x198   :  { %5489 = vmatpush1.bf16.msra.mxu1 %v7853_v49  ;;  %5523 = vmatprep.subr.bf16.mxu0 %v7864_v4  ;;  %v7910_v49 = vld [vmem:[%s11223_s1 + $0x3a8] ss:$16 sps:$4 sm:$0xff]  }
 0x199   :  { %5490 = vmatprep.subr.bf16.mxu1 %v7861_v19  ;;  %v7918_v19 = vld [vmem:[%s11223_s1 + $0x38c] ss:$16 sps:$4 sm:$0xff]   ;;  %v7913_v4 = vld [vmem:[%s11223_s1 + $0x108] ss:$16 sps:$4 sm:$0xff]  }
 0x19b   :  { %5524 = vmatpush1.bf16.msra.mxu0 %v7862_v20  ;;  %v7921_v20 = vld [vmem:[%s11223_s1 + $0x36c] ss:$16 sps:$4 sm:$0xff]  }
 0x19c   :  { %5491 = vmatpush1.bf16.msra.mxu1 %v7859_v5  ;;  %5525 = vmatprep.subr.bf16.mxu0 %v7870_v0  ;;  %v7916_v5 = vld [vmem:[%s11223_s1 + $0x388] ss:$16 sps:$4 sm:$0xff]  }
 0x19d   :  { %5492 = vmatprep.subr.bf16.mxu1 %v7867_v21  ;;  %v7924_v21 = vld [vmem:[%s11223_s1 + $0x4ec] ss:$16 sps:$4 sm:$0xff]   ;;  %v7919_v0 = vld [vmem:[%s11223_s1 + $0x368] ss:$16 sps:$4 sm:$0xff]  }
 0x19f   :  { %5526 = vmatpush1.bf16.msra.mxu0 %v7868_v29  ;;  %v7927_v29 = vld [vmem:[%s11223_s1 + $0x34c] ss:$16 sps:$4 sm:$0xff]  }
 0x1a0   :  { %5493 = vmatpush1.bf16.msra.mxu1 %v7865_v28  ;;  %5527 = vmatprep.subr.bf16.mxu0 %v7876_v34  ;;  %v7922_v28 = vld [vmem:[%s11223_s1 + $0x4e8] ss:$16 sps:$4 sm:$0xff]  }
 0x1a1   :  { %5494 = vmatprep.subr.bf16.mxu1 %v7873_v30  ;;  %v7930_v30 = vld [vmem:[%s11223_s1 + $0x4cc] ss:$16 sps:$4 sm:$0xff]   ;;  %v7925_v34 = vld [vmem:[%s11223_s1 + $0x348] ss:$16 sps:$4 sm:$0xff]  }
 0x1a3   :  { %5528 = vmatpush1.bf16.msra.mxu0 %v7874_v37 }
 0x1a4   :  { %5495 = vmatpush2.bf16.msra.mxu1 %v7871_v36  ;;  %5529 = vmatprep.subr.bf16.mxu0 %v7882_v32  ;;  %v7928_v36 = vld [vmem:[%s11223_s1 + $0x4c8] ss:$16 sps:$4 sm:$0xff]  }
 0x1a5   :  { %5496 = vmatprep.subr.bf16.mxu1 %v7879_v38 }
 0x1a7   :  { %5530 = vmatpush1.bf16.msra.mxu0 %v7880_v44 }
 0x1a8   :  { %5497 = vmatpush2.bf16.msra.mxu1 %v7877_v40  ;;  %5531 = vmatprep.subr.bf16.mxu0 %v7888_v48  ;;  %v7936_v48 = vld [vmem:[%s11223_s1 + $0x4ac] ss:$16 sps:$4 sm:$0xff]  }
 0x1a9   :  { %5498 = vmatprep.subr.bf16.mxu1 %v7885_v47  ;;  %v7933_v47 = vld [vmem:[%s11223_s1 + $0x32c] ss:$16 sps:$4 sm:$0xff]  }
 0x1ab   :  { %5532 = vmatpush1.bf16.msra.mxu0 %v7886_v51  ;;  %v7934_v51 = vld [vmem:[%s11223_s1 + $0x4a8] ss:$16 sps:$4 sm:$0xff]  }
 0x1ac   :  { %5499 = vmatpush2.bf16.msra.mxu1 %v7883_v45  ;;  %5533 = vmatprep.subr.bf16.mxu0 %v7894_v55 }
 0x1ad   :  { %5500 = vmatprep.subr.bf16.mxu1 %v7891_v56 }
 0x1af   :  { %5534 = vmatpush1.bf16.msra.mxu0 %v7892_v58 }
 0x1b0   :  { %5501 = vmatpush2.bf16.msra.mxu1 %v7889_v53  ;;  %5535 = vmatprep.subr.bf16.mxu0 %v7900_v62  ;;  %v7942_v62 = vld [vmem:[%s11223_s1 + $0x48c] ss:$16 sps:$4 sm:$0xff]  }
 0x1b1   :  { %5502 = vmatprep.subr.bf16.mxu1 %v7897_v61 }
 0x1b3   :  { %5536 = vmatpush2.bf16.msra.mxu0 %v7898_v63  ;;  %v7945_v63 = vld [vmem:[%s11223_s1 + $0x46c] ss:$16 sps:$4 sm:$0xff]  }
 0x1b4   :  { %5503 = vmatpush2.bf16.msra.mxu1 %v7895_v60  ;;  %5537 = vmatprep.subr.bf16.mxu0 %v7906_v3  ;;  %v7940_v60 = vld [vmem:[%s11223_s1 + $0x488] ss:$16 sps:$4 sm:$0xff]  }
 0x1b5   :  { %5504 = vmatprep.subr.bf16.mxu1 %v7903_v2  ;;  %v7948_v2 = vld [vmem:[%s11223_s1 + $0x6ec] ss:$16 sps:$4 sm:$0xff]   ;;  %v7943_v3 = vld [vmem:[%s11223_s1 + $0x468] ss:$16 sps:$4 sm:$0xff]  }
 0x1b7   :  { %5538 = vmatpush2.bf16.msra.mxu0 %v7904_v7  ;;  %v7951_v7 = vld [vmem:[%s11223_s1 + $0x44c] ss:$16 sps:$4 sm:$0xff]  }
 0x1b8   :  { %5505 = vmatpush2.bf16.msra.mxu1 %v7901_v1  ;;  %5539 = vmatprep.subr.bf16.mxu0 %v7912_v10  ;;  %v7946_v1 = vld [vmem:[%s11223_s1 + $0x6e8] ss:$16 sps:$4 sm:$0xff]  }
 0x1b9   :  { %5506 = vmatprep.subr.bf16.mxu1 %v7909_v8  ;;  %v7954_v8 = vld [vmem:[%s11223_s1 + $0x6cc] ss:$16 sps:$4 sm:$0xff]   ;;  %v7949_v10 = vld [vmem:[%s11223_s1 + $0x448] ss:$16 sps:$4 sm:$0xff]  }
 0x1bb   :  { %5540 = vmatpush2.bf16.msra.mxu0 %v7910_v49  ;;  %v7957_v49 = vld [vmem:[%s11223_s1 + $0x42c] ss:$16 sps:$4 sm:$0xff]  }
 0x1bc   :  { %5507 = vmatpush2.bf16.msra.mxu1 %v7907_v11  ;;  %5541 = vmatprep.subr.bf16.mxu0 %v7918_v19  ;;  %v7952_v11 = vld [vmem:[%s11223_s1 + $0x6c8] ss:$16 sps:$4 sm:$0xff]  }
 0x1bd   :  { %5508 = vmatprep.subr.bf16.mxu1 %v7915_v16  ;;  %v7960_v16 = vld [vmem:[%s11223_s1 + $0x6ac] ss:$16 sps:$4 sm:$0xff]   ;;  %v7955_v19 = vld [vmem:[%s11223_s1 + $0x428] ss:$16 sps:$4 sm:$0xff]  }
 0x1bf   :  { %5542 = vmatpush2.bf16.msra.mxu0 %v7916_v5  ;;  %v7966_v5 = vld [vmem:[%s11223_s1 + $0x68c] ss:$16 sps:$4 sm:$0xff]  }
 0x1c0   :  { %5509 = vmatpush2.bf16.msra.mxu1 %v7913_v4  ;;  %5543 = vmatprep.subr.bf16.mxu0 %v7921_v20  ;;  %v7963_v4 = vld [vmem:[%s11223_s1 + $0x40c] ss:$16 sps:$4 sm:$0xff]   ;;  %v7961_v20 = vld [vmem:[%s11223_s1 + $0x408] ss:$16 sps:$4 sm:$0xff]  }
 0x1c1   :  { %5560 = vmatprep.subr.bf16.mxu1 %v7924_v21  ;;  %v7969_v21 = vld [vmem:[%s11223_s1 + $0x5ec] ss:$16 sps:$4 sm:$0xff]  }
 0x1c2   :  { %v5225_v37 = vpop.f32.mrf.mxu0 }
 0x1c3   :  { %v5266_v38 = vpop.f32.mrf.mxu1  ;;  %5511 = vmatmul.mubr.bf16.vlgmr.msra.gmra.mxu1 %v8724_v13  ;;  %v5226_v32 = vadd.f32 %v5225_v37, %v9872_v46  ;;  %5544 = vmatpush2.bf16.msra.mxu0 %v7919_v0  ;;  %v7931_v46 = vld [vmem:[%s11223_s1 + $0x328] ss:$16 sps:$4 sm:$0xff]   ;;  %v7972_v0 = vld [vmem:[%s11223_s1 + $0x66c] ss:$16 sps:$4 sm:$0xff]  }
 0x1c4   :  { %5561 = vmatpush1.bf16.msra.mxu1 %v7922_v28  ;;  %v5227_v40 = vpop.f32.mrf.mxu0  ;;  %5545 = vmatprep.subr.bf16.mxu0 %v7927_v29  ;;  %v7967_v28 = vld [vmem:[%s11223_s1 + $0x5e8] ss:$16 sps:$4 sm:$0xff]  }
 0x1c5   :  { %v5268_v44 = vpop.f32.mrf.mxu1  ;;  %5562 = vmatprep.subr.bf16.mxu1 %v7930_v30  ;;  %v10082_v45 = vadd.f32 %v5266_v38, %v5226_v32  ;;  %v5228_v13 = vadd.f32 %v5227_v40, %v9883_v57  ;;  %5592 = vmatprep.mubr.bf16.mxu1 %v8736_v17  ;;  %v7939_v57 = vld [vmem:[%s11223_s1 + $0x30c] ss:$16 sps:$4 sm:$0xff]   ;;  %v7937_v17 = vld [vmem:[%s11223_s1 + $0x308] ss:$16 sps:$4 sm:$0xff]  }
 0x1c6   :  { %v5229_v56 = vpop.f32.mrf.mxu0  ;;  %v7970_v29 = vld [vmem:[%s11223_s1 + $0x668] ss:$16 sps:$4 sm:$0xff]   ;;  %v7975_v30 = vld [vmem:[%s11223_s1 + $0x5cc] ss:$16 sps:$4 sm:$0xff]  }
 0x1c7   :  { %v5270_v55 = vpop.f32.mrf.mxu1  ;;  %v10092_v53 = vadd.f32 %v5268_v44, %v5228_v13  ;;  %5546 = vmatpush2.bf16.msra.mxu0 %v7925_v34  ;;  %v7978_v34 = vld [vmem:[%s11223_s1 + $0x64c] ss:$16 sps:$4 sm:$0xff]   ;;  %v7976_v37 = vld [vmem:[%s11223_s1 + $0x648] ss:$16 sps:$4 sm:$0xff]  }
 0x1c8   :  { %5563 = vmatpush1.bf16.msra.mxu1 %v7928_v36  ;;  %v5230_v58 = vpop.f32.mrf.mxu0  ;;  %5547 = vmatprep.subr.bf16.mxu0 %v7933_v47  ;;  %v7973_v36 = vld [vmem:[%s11223_s1 + $0x5c8] ss:$16 sps:$4 sm:$0xff]   ;;  %v7981_v38 = vld [vmem:[%s11223_s1 + $0x5ac] ss:$16 sps:$4 sm:$0xff]  }
 0x1c9   :  { %v5271_v61 = vpop.f32.mrf.mxu1  ;;  %5564 = vmatprep.subr.bf16.mxu1 %v7936_v48  ;;  %v7984_v32 = vld [vmem:[%s11223_s1 + $0x62c] ss:$16 sps:$4 sm:$0xff]   ;;  %v7979_v40 = vld [vmem:[%s11223_s1 + $0x5a8] ss:$16 sps:$4 sm:$0xff]  }
 0x1ca   :  { %v7982_v44 = vld [vmem:[%s11223_s1 + $0x628] ss:$16 sps:$4 sm:$0xff]   ;;  %v7987_v47 = vld [vmem:[%s11223_s1 + $0x58c] ss:$16 sps:$4 sm:$0xff]  }
 0x1cb   :  { %5548 = vmatpush2.bf16.msra.mxu0 %v7931_v46  ;;  %v7990_v48 = vld [vmem:[%s11223_s1 + $0x60c] ss:$16 sps:$4 sm:$0xff]  }
 0x1cc   :  { %5565 = vmatpush1.bf16.msra.mxu1 %v7934_v51  ;;  %5549 = vmatprep.subr.bf16.mxu0 %v7939_v57 }
 0x1cd   :  { %5566 = vmatprep.subr.bf16.mxu1 %v7942_v62 }
 0x1cf   :  { %5550 = vmatpush2.bf16.msra.mxu0 %v7937_v17 }
 0x1d0   :  { %5567 = vmatpush1.bf16.msra.mxu1 %v7940_v60  ;;  %5601 = vmatprep.subr.bf16.mxu0 %v7948_v2 }
 0x1d1   :  { %5568 = vmatprep.subr.bf16.mxu1 %v7945_v63 }
 0x1d2   :  { %5552 = vmatmul.mubr.bf16.vlgmr.msra.gmra.mxu0 %v8740_v18  ;;  %v7958_v18 = vld [vmem:[%s11223_s1 + $0x6a8] ss:$16 sps:$4 sm:$0xff]  }
 0x1d3   :  { %5602 = vmatpush1.bf16.msra.mxu0 %v7946_v1  ;;  %5633 = vmatprep.mubr.bf16.mxu0 %v8756_v23  ;;  %v7964_v23 = vld [vmem:[%s11223_s1 + $0x688] ss:$16 sps:$4 sm:$0xff]  }
 0x1d4   :  { %5569 = vmatpush1.bf16.msra.mxu1 %v7943_v3  ;;  %5603 = vmatprep.subr.bf16.mxu0 %v7954_v8 }
 0x1d5   :  { %5570 = vmatprep.subr.bf16.mxu1 %v7951_v7 }
 0x1d7   :  { %5604 = vmatpush1.bf16.msra.mxu0 %v7952_v11 }
 0x1d8   :  { %5571 = vmatpush1.bf16.msra.mxu1 %v7949_v10  ;;  %5605 = vmatprep.subr.bf16.mxu0 %v7960_v16 }
 0x1d9   :  { %5572 = vmatprep.subr.bf16.mxu1 %v7957_v49 }
 0x1db   :  { %5606 = vmatpush1.bf16.msra.mxu0 %v7958_v18 }
 0x1dc   :  { %5573 = vmatpush1.bf16.msra.mxu1 %v7955_v19  ;;  %5607 = vmatprep.subr.bf16.mxu0 %v7966_v5 }
 0x1dd   :  { %5574 = vmatprep.subr.bf16.mxu1 %v7963_v4 }
 0x1df   :  { %5608 = vmatpush1.bf16.msra.mxu0 %v7964_v23 }
 0x1e0   :  { %5575 = vmatpush1.bf16.msra.mxu1 %v7961_v20  ;;  %5609 = vmatprep.subr.bf16.mxu0 %v7972_v0 }
 0x1e1   :  { %5576 = vmatprep.subr.bf16.mxu1 %v7969_v21 }
 0x1e3   :  { %5610 = vmatpush1.bf16.msra.mxu0 %v7970_v29 }
 0x1e4   :  { %5577 = vmatpush2.bf16.msra.mxu1 %v7967_v28  ;;  %5611 = vmatprep.subr.bf16.mxu0 %v7978_v34 }
 0x1e5   :  { %5578 = vmatprep.subr.bf16.mxu1 %v7975_v30 }
 0x1e7   :  { %5612 = vmatpush1.bf16.msra.mxu0 %v7976_v37 }
 0x1e8   :  { %5579 = vmatpush2.bf16.msra.mxu1 %v7973_v36  ;;  %5613 = vmatprep.subr.bf16.mxu0 %v7984_v32 }
 0x1e9   :  { %5580 = vmatprep.subr.bf16.mxu1 %v7981_v38 }
 0x1ea   :  { %10 = vsyncpa [#allocation3], 0  ;;  %v7985_v13 = vld [vmem:[%s11223_s1 + $0x588] ss:$16 sps:$4 sm:$0xff]   ;;  %v7993_v51 = vld [vmem:[%s11223_s1 + $0x56c] ss:$16 sps:$4 sm:$0xff]  }
 0x1eb   :  { %5614 = vmatpush1.bf16.msra.mxu0 %v7982_v44  ;;  %v7988_v46 = vld [vmem:[%s11223_s1 + $0x608] ss:$16 sps:$4 sm:$0xff]   ;;  %v7996_v56 = vld [vmem:[%s11223_s1 + $0x7ec] ss:$16 sps:$4 sm:$0xff]   ;;  %s8480_s16 = smov [#allocation2]  }
 0x1ec   :  { %5581 = vmatpush2.bf16.msra.mxu1 %v7979_v40  ;;  %5615 = vmatprep.subr.bf16.mxu0 %v7990_v48  ;;  %v7991_v55 = vld [vmem:[%s11223_s1 + $0x568] ss:$16 sps:$4 sm:$0xff]   ;;  %v7999_v61 = vld [vmem:[%s11223_s1 + $0x54c] ss:$16 sps:$4 sm:$0xff]   ;;  %s6369_s17 = sshll.u32 %s8480_s16, 4  ;;  %s6370_s17 = int_to_ptr.vmem [resolvable:$true] %s6369_s17 }
 0x1ed   :  { %5582 = vmatprep.subr.bf16.mxu1 %v7987_v47  ;;  %v7994_v58 = vld [vmem:[%s11223_s1 + $0x7e8] ss:$16 sps:$4 sm:$0xff]   ;;  %v8002_v57 = vld [vmem:[%s11223_s1 + $0x7cc] ss:$16 sps:$4 sm:$0xff]   ;;  %s8456_s18 = scalar_lea.vmem %s6370_s17, 32  ;;  %p8461_p1 = scmp.lt.s32.totalorder %s6370_s17, %s6370_s17 }
 0x1ee   :  { %v7997_v62 = vld [vmem:[%s11223_s1 + $0x548] ss:$16 sps:$4 sm:$0xff]   ;;  %v8005_v60 = vld [vmem:[%s11223_s1 + $0x52c] ss:$16 sps:$4 sm:$0xff]   ;;  %p8457_p0 = scmp.ne.s32.totalorder %s6370_s17, %s8456_s18  ;;  %p8462_p2 = scmp.lt.s32.totalorder %s8456_s18, %s8456_s18 }
 0x1ef   :  { %5616 = vmatpush1.bf16.msra.mxu0 %v7988_v46  ;;  %v8000_v17 = vld [vmem:[%s11223_s1 + $0x7c8] ss:$16 sps:$4 sm:$0xff]   ;;  %v8008_v63 = vld [vmem:[%s11223_s1 + $0x7ac] ss:$16 sps:$4 sm:$0xff]  }
 0x1f0   :  { %5583 = vmatpush2.bf16.msra.mxu1 %v7985_v13  ;;  %5617 = vmatprep.subr.bf16.mxu0 %v7996_v56  ;;  %v8003_v2 = vld [vmem:[%s11223_s1 + $0x528] ss:$16 sps:$4 sm:$0xff]   ;;  %v8011_v1 = vld [vmem:[%s11223_s1 + $0x50c] ss:$16 sps:$4 sm:$0xff]   ;;  %p8463_p3 = por %p8462_p2, %p8461_p1 }
 0x1f1   :  { %5584 = vmatprep.subr.bf16.mxu1 %v7993_v51  ;;  %v8006_v3 = vld [vmem:[%s11223_s1 + $0x7a8] ss:$16 sps:$4 sm:$0xff]   ;;  %v8014_v7 = vld [vmem:[%s11223_s1 + $0x78c] ss:$16 sps:$4 sm:$0xff]  }
 0x1f2   :  { %v8009_v8 = vld [vmem:[%s11223_s1 + $0x508] ss:$16 sps:$4 sm:$0xff]   ;;  %v8017_v11 = vld [vmem:[%s11223_s1 + $0x76c] ss:$16 sps:$4 sm:$0xff]   ;;  %p8464_p4 = pnand %p8463_p3, %p8457_p0 }
 0x1f3   :  { %5618 = vmatpush2.bf16.msra.mxu0 %v7994_v58  ;;  %v8012_v10 = vld [vmem:[%s11223_s1 + $0x788] ss:$16 sps:$4 sm:$0xff]   ;;  %v8020_v49 = vld [vmem:[%s11223_s1 + $0x8ec] ss:$16 sps:$4 sm:$0xff]  }
 0x1f4   :  { %5585 = vmatpush2.bf16.msra.mxu1 %v7991_v55  ;;  %5619 = vmatprep.subr.bf16.mxu0 %v8002_v57  ;;  %v8015_v16 = vld [vmem:[%s11223_s1 + $0x768] ss:$16 sps:$4 sm:$0xff]   ;;  %v8023_v18 = vld [vmem:[%s11223_s1 + $0x74c] ss:$16 sps:$4 sm:$0xff]  }
 0x1f5   :  { %5586 = vmatprep.subr.bf16.mxu1 %v7999_v61  ;;  %v8018_v19 = vld [vmem:[%s11223_s1 + $0x8e8] ss:$16 sps:$4 sm:$0xff]   ;;  %v8026_v4 = vld [vmem:[%s11223_s1 + $0x8cc] ss:$16 sps:$4 sm:$0xff]  }
 0x1f6   :  { %v8021_v21 = vld [vmem:[%s11223_s1 + $0x748] ss:$16 sps:$4 sm:$0xff]   ;;  %v8041_v46 = vld [vmem:[%s11223_s1 + $0x86c] ss:$16 sps:$4 sm:$0xff]  }
 0x1f7   :  { %5620 = vmatpush2.bf16.msra.mxu0 %v8000_v17  ;;  %v8024_v0 = vld [vmem:[%s11223_s1 + $0x8c8] ss:$16 sps:$4 sm:$0xff]   ;;  %v8044_v51 = vld [vmem:[%s11223_s1 + $0xaec] ss:$16 sps:$4 sm:$0xff]  }
 0x1f8   :  { %5587 = vmatpush2.bf16.msra.mxu1 %v7997_v62  ;;  %5621 = vmatprep.subr.bf16.mxu0 %v8008_v63  ;;  %v8027_v32 = vld [vmem:[%s11223_s1 + $0x728] ss:$16 sps:$4 sm:$0xff]   ;;  %v8047_v58 = vld [vmem:[%s11223_s1 + $0x84c] ss:$16 sps:$4 sm:$0xff]  }
 0x1f9   :  { %5588 = vmatprep.subr.bf16.mxu1 %v8005_v60  ;;  %v8030_v40 = vld [vmem:[%s11223_s1 + $0x8a8] ss:$16 sps:$4 sm:$0xff]   ;;  %v8050_v61 = vld [vmem:[%s11223_s1 + $0xacc] ss:$16 sps:$4 sm:$0xff]  }
 0x1fa   :  { %v8033_v48 = vld [vmem:[%s11223_s1 + $0x708] ss:$16 sps:$4 sm:$0xff]   ;;  %v8053_v17 = vld [vmem:[%s11223_s1 + $0x82c] ss:$16 sps:$4 sm:$0xff]  }
 0x1fb   :  { %5622 = vmatpush2.bf16.msra.mxu0 %v8006_v3  ;;  %v8036_v13 = vld [vmem:[%s11223_s1 + $0x888] ss:$16 sps:$4 sm:$0xff]  }
 0x1fc   :  { %5589 = vmatpush2.bf16.msra.mxu1 %v8003_v2  ;;  %5623 = vmatprep.subr.bf16.mxu0 %v8014_v7  ;;  %v8039_v56 = vld [vmem:[%s11223_s1 + $0x868] ss:$16 sps:$4 sm:$0xff]   ;;  %v8059_v2 = vld [vmem:[%s11223_s1 + $0x80c] ss:$16 sps:$4 sm:$0xff]  }
 0x1fd   :  { %5590 = vmatprep.subr.bf16.mxu1 %v8011_v1  ;;  %v8042_v55 = vld [vmem:[%s11223_s1 + $0xae8] ss:$16 sps:$4 sm:$0xff]   ;;  %v8065_v7 = vld [vmem:[%s11223_s1 + $0x9ec] ss:$16 sps:$4 sm:$0xff]  }
 0x1fe   :  { %v8045_v57 = vld [vmem:[%s11223_s1 + $0x848] ss:$16 sps:$4 sm:$0xff]  }
 0x1ff   :  { %5624 = vmatpush2.bf16.msra.mxu0 %v8012_v10  ;;  %v8048_v62 = vld [vmem:[%s11223_s1 + $0xac8] ss:$16 sps:$4 sm:$0xff]  }
 0x200   :  { %5591 = vmatpush2.bf16.msra.mxu1 %v8009_v8  ;;  %5625 = vmatprep.subr.bf16.mxu0 %v8017_v11  ;;  %v8051_v60 = vld [vmem:[%s11223_s1 + $0x828] ss:$16 sps:$4 sm:$0xff]   ;;  %v8068_v8 = vld [vmem:[%s11223_s1 + $0xa6c] ss:$16 sps:$4 sm:$0xff]  }
 0x201   :  { %5642 = vmatprep.subr.bf16.mxu1 %v8020_v49  ;;  %v8054_v63 = vld [vmem:[%s11223_s1 + $0xaa8] ss:$16 sps:$4 sm:$0xff]   ;;  %v8071_v49 = vld [vmem:[%s11223_s1 + $0x9cc] ss:$16 sps:$4 sm:$0xff]  }
 0x202   :  { %v5307_v5 = vpop.f32.mrf.mxu0  ;;  %v8057_v3 = vld [vmem:[%s11223_s1 + $0x808] ss:$16 sps:$4 sm:$0xff]  }
 0x203   :  { %v5348_v20 = vpop.f32.mrf.mxu1  ;;  %5593 = vmatmul.mubr.bf16.vlgmr.msra.gmra.mxu1 %v8935_v26  ;;  %v5308_v23 = vadd.f32 %v5307_v5, %v10082_v45  ;;  %5626 = vmatpush2.bf16.msra.mxu0 %v8015_v16  ;;  %v8029_v26 = vld [vmem:[%s11223_s1 + $0x72c] ss:$16 sps:$4 sm:$0xff]   ;;  %v8060_v1 = vld [vmem:[%s11223_s1 + $0xa88] ss:$16 sps:$4 sm:$0xff]  }
 0x204   :  { %5643 = vmatpush1.bf16.msra.mxu1 %v8018_v19  ;;  %v5309_v28 = vpop.f32.mrf.mxu0  ;;  %5627 = vmatprep.subr.bf16.mxu0 %v8023_v18  ;;  %v8032_v45 = vld [vmem:[%s11223_s1 + $0x8ac] ss:$16 sps:$4 sm:$0xff]   ;;  %v8063_v10 = vld [vmem:[%s11223_s1 + $0x9e8] ss:$16 sps:$4 sm:$0xff]  }
 0x205   :  { %v5350_v29 = vpop.f32.mrf.mxu1  ;;  %5644 = vmatprep.subr.bf16.mxu1 %v8026_v4  ;;  %v10284_v30 = vadd.f32 %v5348_v20, %v5308_v23  ;;  %v5310_v34 = vadd.f32 %v5309_v28, %v10092_v53  ;;  %5674 = vmatprep.mubr.bf16.mxu1 %v8988_v41  ;;  %v8035_v41 = vld [vmem:[%s11223_s1 + $0x70c] ss:$16 sps:$4 sm:$0xff]   ;;  %v8066_v11 = vld [vmem:[%s11223_s1 + $0xa68] ss:$16 sps:$4 sm:$0xff]  }
 0x206   :  { %v5311_v36 = vpop.f32.mrf.mxu0  ;;  %v8038_v53 = vld [vmem:[%s11223_s1 + $0x88c] ss:$16 sps:$4 sm:$0xff]   ;;  %v8069_v19 = vld [vmem:[%s11223_s1 + $0x9c8] ss:$16 sps:$4 sm:$0xff]  }
 0x207   :  { %v5352_v37 = vpop.f32.mrf.mxu1  ;;  %v10288_v38 = vadd.f32 %v5350_v29, %v5310_v34  ;;  %5628 = vmatpush2.bf16.msra.mxu0 %v8021_v21  ;;  %v8074_v16 = vld [vmem:[%s11223_s1 + $0xa4c] ss:$16 sps:$4 sm:$0xff]   ;;  %v8072_v18 = vld [vmem:[%s11223_s1 + $0xa48] ss:$16 sps:$4 sm:$0xff]  }
 0x208   :  { %5645 = vmatpush1.bf16.msra.mxu1 %v8024_v0  ;;  %v5312_v44 = vpop.f32.mrf.mxu0  ;;  %5629 = vmatprep.subr.bf16.mxu0 %v8029_v26  ;;  %v8077_v4 = vld [vmem:[%s11223_s1 + $0x9ac] ss:$16 sps:$4 sm:$0xff]   ;;  %v8075_v20 = vld [vmem:[%s11223_s1 + $0x9a8] ss:$16 sps:$4 sm:$0xff]  }
 0x209   :  { %v5353_v47 = vpop.f32.mrf.mxu1  ;;  %5646 = vmatprep.subr.bf16.mxu1 %v8032_v45  ;;  %v8080_v5 = vld [vmem:[%s11223_s1 + $0xa2c] ss:$16 sps:$4 sm:$0xff]   ;;  %v8078_v23 = vld [vmem:[%s11223_s1 + $0xa28] ss:$16 sps:$4 sm:$0xff]  }
 0x20a   :  { %v8083_v21 = vld [vmem:[%s11223_s1 + $0x98c] ss:$16 sps:$4 sm:$0xff]   ;;  %v8081_v28 = vld [vmem:[%s11223_s1 + $0x988] ss:$16 sps:$4 sm:$0xff]  }
 0x20b   :  { %5630 = vmatpush2.bf16.msra.mxu0 %v8027_v32  ;;  %v8086_v0 = vld [vmem:[%s11223_s1 + $0xa0c] ss:$16 sps:$4 sm:$0xff]   ;;  %v8084_v29 = vld [vmem:[%s11223_s1 + $0xa08] ss:$16 sps:$4 sm:$0xff]  }
 0x20c   :  { %5647 = vmatpush1.bf16.msra.mxu1 %v8030_v40  ;;  %5631 = vmatprep.subr.bf16.mxu0 %v8035_v41  ;;  %v8089_v26 = vld [vmem:[%s11223_s1 + $0x96c] ss:$16 sps:$4 sm:$0xff]   ;;  %v8087_v34 = vld [vmem:[%s11223_s1 + $0x968] ss:$16 sps:$4 sm:$0xff]  }
 0x20d   :  { %5648 = vmatprep.subr.bf16.mxu1 %v8038_v53  ;;  %v8092_v45 = vld [vmem:[%s11223_s1 + $0xbec] ss:$16 sps:$4 sm:$0xff]   ;;  %v8090_v36 = vld [vmem:[%s11223_s1 + $0xbe8] ss:$16 sps:$4 sm:$0xff]  }
 0x20e   :  { %v8095_v37 = vld [vmem:[%s11223_s1 + $0x94c] ss:$16 sps:$4 sm:$0xff]   ;;  %v8093_v40 = vld [vmem:[%s11223_s1 + $0x948] ss:$16 sps:$4 sm:$0xff]  }
 0x20f   :  { %5632 = vmatpush2.bf16.msra.mxu0 %v8033_v48  ;;  %v8098_v32 = vld [vmem:[%s11223_s1 + $0xbcc] ss:$16 sps:$4 sm:$0xff]   ;;  %v8096_v44 = vld [vmem:[%s11223_s1 + $0xbc8] ss:$16 sps:$4 sm:$0xff]  }
 0x210   :  { %5649 = vmatpush1.bf16.msra.mxu1 %v8036_v13  ;;  %5683 = vmatprep.subr.bf16.mxu0 %v8044_v51  ;;  %v8101_v47 = vld [vmem:[%s11223_s1 + $0x92c] ss:$16 sps:$4 sm:$0xff]   ;;  %v8099_v53 = vld [vmem:[%s11223_s1 + $0x928] ss:$16 sps:$4 sm:$0xff]  }
 0x211   :  { %5650 = vmatprep.subr.bf16.mxu1 %v8041_v46  ;;  %v8104_v41 = vld [vmem:[%s11223_s1 + $0xbac] ss:$16 sps:$4 sm:$0xff]   ;;  %v8102_v48 = vld [vmem:[%s11223_s1 + $0xba8] ss:$16 sps:$4 sm:$0xff]  }
 0x212   :  { %5634 = vmatmul.mubr.bf16.vlgmr.msra.gmra.mxu0 %v8948_v6  ;;  %v8056_v6 = vld [vmem:[%s11223_s1 + $0xaac] ss:$16 sps:$4 sm:$0xff]   ;;  %v8105_v51 = vld [vmem:[%s11223_s1 + $0x908] ss:$16 sps:$4 sm:$0xff]  }
 0x213   :  { %5684 = vmatpush1.bf16.msra.mxu0 %v8042_v55  ;;  %5715 = vmatprep.mubr.bf16.mxu0 %v8993_v43  ;;  %v8062_v43 = vld [vmem:[%s11223_s1 + $0xa8c] ss:$16 sps:$4 sm:$0xff]  }
 0x214   :  { %5651 = vmatpush1.bf16.msra.mxu1 %v8039_v56  ;;  %5685 = vmatprep.subr.bf16.mxu0 %v8050_v61  ;;  %v8107_v13 = vld [vmem:[%s11223_s1 + $0x90c] ss:$16 sps:$4 sm:$0xff]   ;;  %v8108_v56 = vld [vmem:[%s11223_s1 + $0xb88] ss:$16 sps:$4 sm:$0xff]  }
 0x215   :  { %5652 = vmatprep.subr.bf16.mxu1 %v8047_v58  ;;  %v8110_v46 = vld [vmem:[%s11223_s1 + $0xb8c] ss:$16 sps:$4 sm:$0xff]   ;;  %v8111_v61 = vld [vmem:[%s11223_s1 + $0xb68] ss:$16 sps:$4 sm:$0xff]  }
 0x216   :  { %v8113_v55 = vld [vmem:[%s11223_s1 + $0xb6c] ss:$16 sps:$4 sm:$0xff]  }
 0x217   :  { %5686 = vmatpush1.bf16.msra.mxu0 %v8048_v62  ;;  %v8116_v58 = vld [vmem:[%s11223_s1 + $0xcec] ss:$16 sps:$4 sm:$0xff]  }
 0x218   :  { %5653 = vmatpush1.bf16.msra.mxu1 %v8045_v57  ;;  %5687 = vmatprep.subr.bf16.mxu0 %v8056_v6  ;;  %v8114_v57 = vld [vmem:[%s11223_s1 + $0xce8] ss:$16 sps:$4 sm:$0xff]   ;;  %v8119_v62 = vld [vmem:[%s11223_s1 + $0xb4c] ss:$16 sps:$4 sm:$0xff]  }
 0x219   :  { %5654 = vmatprep.subr.bf16.mxu1 %v8053_v17  ;;  %v8122_v17 = vld [vmem:[%s11223_s1 + $0xccc] ss:$16 sps:$4 sm:$0xff]  }
 0x21b   :  { %5688 = vmatpush1.bf16.msra.mxu0 %v8054_v63 }
 0x21c   :  { %5655 = vmatpush1.bf16.msra.mxu1 %v8051_v60  ;;  %5689 = vmatprep.subr.bf16.mxu0 %v8062_v43  ;;  %v8120_v43 = vld [vmem:[%s11223_s1 + $0xcc8] ss:$16 sps:$4 sm:$0xff]  }
 0x21d   :  { %5656 = vmatprep.subr.bf16.mxu1 %v8059_v2  ;;  %v8117_v2 = vld [vmem:[%s11223_s1 + $0xb48] ss:$16 sps:$4 sm:$0xff]  }
 0x21f   :  { %5690 = vmatpush1.bf16.msra.mxu0 %v8060_v1 }
 0x220   :  { %5657 = vmatpush1.bf16.msra.mxu1 %v8057_v3  ;;  %5691 = vmatprep.subr.bf16.mxu0 %v8068_v8 }
 0x221   :  { %5658 = vmatprep.subr.bf16.mxu1 %v8065_v7 }
 0x223   :  { %5692 = vmatpush1.bf16.msra.mxu0 %v8066_v11 }
 0x224   :  { %5659 = vmatpush2.bf16.msra.mxu1 %v8063_v10  ;;  %5693 = vmatprep.subr.bf16.mxu0 %v8074_v16  ;;  %v8123_v16 = vld [vmem:[%s11223_s1 + $0xb28] ss:$16 sps:$4 sm:$0xff]  }
 0x225   :  { %5660 = vmatprep.subr.bf16.mxu1 %v8071_v49 }
 0x227   :  { %5694 = vmatpush1.bf16.msra.mxu0 %v8072_v18 }
 0x228   :  { %5661 = vmatpush2.bf16.msra.mxu1 %v8069_v19  ;;  %5695 = vmatprep.subr.bf16.mxu0 %v8080_v5  ;;  %v8126_v19 = vld [vmem:[%s11223_s1 + $0xca8] ss:$16 sps:$4 sm:$0xff]  }
 0x229   :  { %5662 = vmatprep.subr.bf16.mxu1 %v8077_v4  ;;  %v8129_v5 = vld [vmem:[%s11223_s1 + $0xb08] ss:$16 sps:$4 sm:$0xff]  }
 0x22b   :  { %5696 = vmatpush1.bf16.msra.mxu0 %v8078_v23  ;;  %v8137_v23 = vld [vmem:[%s11223_s1 + $0xc6c] ss:$16 sps:$4 sm:$0xff]  }
 0x22c   :  { %5663 = vmatpush2.bf16.msra.mxu1 %v8075_v20  ;;  %5697 = vmatprep.subr.bf16.mxu0 %v8086_v0  ;;  %v8132_v20 = vld [vmem:[%s11223_s1 + $0xc88] ss:$16 sps:$4 sm:$0xff]  }
 0x22d   :  { %5664 = vmatprep.subr.bf16.mxu1 %v8083_v21  ;;  %v8140_v21 = vld [vmem:[%s11223_s1 + $0xeec] ss:$16 sps:$4 sm:$0xff]   ;;  %v8135_v0 = vld [vmem:[%s11223_s1 + $0xc68] ss:$16 sps:$4 sm:$0xff]  }
 0x22f   :  { %5698 = vmatpush1.bf16.msra.mxu0 %v8084_v29  ;;  %v8143_v29 = vld [vmem:[%s11223_s1 + $0xc4c] ss:$16 sps:$4 sm:$0xff]  }
 0x230   :  { %5665 = vmatpush2.bf16.msra.mxu1 %v8081_v28  ;;  %5699 = vmatprep.subr.bf16.mxu0 %v8092_v45  ;;  %v8138_v28 = vld [vmem:[%s11223_s1 + $0xee8] ss:$16 sps:$4 sm:$0xff]  }
 0x231   :  { %5666 = vmatprep.subr.bf16.mxu1 %v8089_v26  ;;  %v8146_v26 = vld [vmem:[%s11223_s1 + $0xecc] ss:$16 sps:$4 sm:$0xff]  }
 0x233   :  { %5700 = vmatpush2.bf16.msra.mxu0 %v8090_v36  ;;  %v8141_v36 = vld [vmem:[%s11223_s1 + $0xc48] ss:$16 sps:$4 sm:$0xff]  }
 0x234   :  { %5667 = vmatpush2.bf16.msra.mxu1 %v8087_v34  ;;  %5701 = vmatprep.subr.bf16.mxu0 %v8098_v32 }
 0x235   :  { %5668 = vmatprep.subr.bf16.mxu1 %v8095_v37  ;;  %v8144_v37 = vld [vmem:[%s11223_s1 + $0xec8] ss:$16 sps:$4 sm:$0xff]  }
 0x237   :  { %5702 = vmatpush2.bf16.msra.mxu0 %v8096_v44 }
 0x238   :  { %5669 = vmatpush2.bf16.msra.mxu1 %v8093_v40  ;;  %5703 = vmatprep.subr.bf16.mxu0 %v8104_v41  ;;  %v8149_v40 = vld [vmem:[%s11223_s1 + $0xc2c] ss:$16 sps:$4 sm:$0xff]   ;;  %v8147_v41 = vld [vmem:[%s11223_s1 + $0xc28] ss:$16 sps:$4 sm:$0xff]  }
 0x239   :  { %5670 = vmatprep.subr.bf16.mxu1 %v8101_v47 }
 0x23b   :  { %5704 = vmatpush2.bf16.msra.mxu0 %v8102_v48 }
 0x23c   :  { %5671 = vmatpush2.bf16.msra.mxu1 %v8099_v53  ;;  %5705 = vmatprep.subr.bf16.mxu0 %v8110_v46  ;;  %v8150_v53 = vld [vmem:[%s11223_s1 + $0xea8] ss:$16 sps:$4 sm:$0xff]  }
 0x23d   :  { %5672 = vmatprep.subr.bf16.mxu1 %v8107_v13  ;;  %v8155_v13 = vld [vmem:[%s11223_s1 + $0xc0c] ss:$16 sps:$4 sm:$0xff]   ;;  %v8153_v46 = vld [vmem:[%s11223_s1 + $0xc08] ss:$16 sps:$4 sm:$0xff]  }
 0x23f   :  { %5706 = vmatpush2.bf16.msra.mxu0 %v8108_v56  ;;  %v8161_v56 = vld [vmem:[%s11223_s1 + $0xdec] ss:$16 sps:$4 sm:$0xff]  }
 0x240   :  { %5673 = vmatpush2.bf16.msra.mxu1 %v8105_v51  ;;  %5707 = vmatprep.subr.bf16.mxu0 %v8113_v55  ;;  %v8156_v51 = vld [vmem:[%s11223_s1 + $0xe88] ss:$16 sps:$4 sm:$0xff]   ;;  %v8164_v55 = vld [vmem:[%s11223_s1 + $0xe6c] ss:$16 sps:$4 sm:$0xff]  }
 0x241   :  { %5724 = vmatprep.subr.bf16.mxu1 %v8116_v58  ;;  %v8159_v58 = vld [vmem:[%s11223_s1 + $0xde8] ss:$16 sps:$4 sm:$0xff]  }
 0x242   :  { %v5389_v6 = vpop.f32.mrf.mxu0 }
 0x243   :  { %v5430_v60 = vpop.f32.mrf.mxu1  ;;  %5675 = vmatmul.mubr.bf16.vlgmr.msra.gmra.mxu1 %v9164_v50  ;;  %v5390_v63 = vadd.f32 %v5389_v6, %v10284_v30  ;;  %5708 = vmatpush2.bf16.msra.mxu0 %v8111_v61  ;;  %v8125_v50 = vld [vmem:[%s11223_s1 + $0xb2c] ss:$16 sps:$4 sm:$0xff]   ;;  %v8162_v61 = vld [vmem:[%s11223_s1 + $0xe68] ss:$16 sps:$4 sm:$0xff]  }
 0x244   :  { %5725 = vmatpush1.bf16.msra.mxu1 %v8114_v57  ;;  %v5391_v3 = vpop.f32.mrf.mxu0  ;;  %5709 = vmatprep.subr.bf16.mxu0 %v8119_v62  ;;  %v8128_v30 = vld [vmem:[%s11223_s1 + $0xcac] ss:$16 sps:$4 sm:$0xff]   ;;  %v8168_v6 = vld [vmem:[%s11223_s1 + $0xe48] ss:$16 sps:$4 sm:$0xff]  }
 0x245   :  { %v5432_v1 = vpop.f32.mrf.mxu1  ;;  %5726 = vmatprep.subr.bf16.mxu1 %v8122_v17  ;;  %v5431_v7 = vadd.f32 %v5430_v60, %v5390_v63  ;;  %v5392_v8 = vadd.f32 %v5391_v3, %v10288_v38  ;;  %5756 = vmatprep.mubr.bf16.mxu1 %v9176_v54  ;;  %v8131_v54 = vld [vmem:[%s11223_s1 + $0xb0c] ss:$16 sps:$4 sm:$0xff]   ;;  %v8165_v17 = vld [vmem:[%s11223_s1 + $0xdc8] ss:$16 sps:$4 sm:$0xff]  }
 0x246   :  { %v5393_v10 = vpop.f32.mrf.mxu0  ;;  %v8134_v38 = vld [vmem:[%s11223_s1 + $0xc8c] ss:$16 sps:$4 sm:$0xff]  }
 0x247   :  { %v5434_v11 = vpop.f32.mrf.mxu1  ;;  %v5433_v49 = vadd.f32 %v5432_v1, %v5392_v8  ;;  %5710 = vmatpush2.bf16.msra.mxu0 %v8117_v2  ;;  %v8167_v57 = vld [vmem:[%s11223_s1 + $0xdcc] ss:$16 sps:$4 sm:$0xff]   ;;  %v8171_v2 = vld [vmem:[%s11223_s1 + $0xda8] ss:$16 sps:$4 sm:$0xff]  }
 0x248   :  { %5727 = vmatpush1.bf16.msra.mxu1 %v8120_v43  ;;  %v5394_v18 = vpop.f32.mrf.mxu0  ;;  %5711 = vmatprep.subr.bf16.mxu0 %v8125_v50  ;;  %v8170_v62 = vld [vmem:[%s11223_s1 + $0xe4c] ss:$16 sps:$4 sm:$0xff]   ;;  %v8174_v43 = vld [vmem:[%s11223_s1 + $0xe28] ss:$16 sps:$4 sm:$0xff]  }
 0x249   :  { %v5435_v4 = vpop.f32.mrf.mxu1  ;;  %5728 = vmatprep.subr.bf16.mxu1 %v8128_v30  ;;  %v8173_v60 = vld [vmem:[%s11223_s1 + $0xdac] ss:$16 sps:$4 sm:$0xff]   ;;  %v8177_v50 = vld [vmem:[%s11223_s1 + $0xd88] ss:$16 sps:$4 sm:$0xff]  }
 0x24a   :  { %v8176_v63 = vld [vmem:[%s11223_s1 + $0xe2c] ss:$16 sps:$4 sm:$0xff]   ;;  %v8180_v30 = vld [vmem:[%s11223_s1 + $0xe08] ss:$16 sps:$4 sm:$0xff]  }
 0x24b   :  { %5712 = vmatpush2.bf16.msra.mxu0 %v8123_v16  ;;  %v8179_v3 = vld [vmem:[%s11223_s1 + $0xd8c] ss:$16 sps:$4 sm:$0xff]   ;;  %v8183_v10 = vld [vmem:[%s11223_s1 + $0xd68] ss:$16 sps:$4 sm:$0xff]  }
 0x24c   :  { %5729 = vmatpush1.bf16.msra.mxu1 %v8126_v19  ;;  %5713 = vmatprep.subr.bf16.mxu0 %v8131_v54  ;;  %v8182_v1 = vld [vmem:[%s11223_s1 + $0xe0c] ss:$16 sps:$4 sm:$0xff]   ;;  %v8186_v11 = vld [vmem:[%s11223_s1 + $0xfe8] ss:$16 sps:$4 sm:$0xff]  }
 0x24d   :  { %5730 = vmatprep.subr.bf16.mxu1 %v8134_v38  ;;  %v8188_v8 = vld [vmem:[%s11223_s1 + $0xfec] ss:$16 sps:$4 sm:$0xff]   ;;  %v8189_v19 = vld [vmem:[%s11223_s1 + $0xd48] ss:$16 sps:$4 sm:$0xff]  }
 0x24e   :  { %v8194_v16 = vld [vmem:[%s11223_s1 + $0xfcc] ss:$16 sps:$4 sm:$0xff]   ;;  %v8192_v18 = vld [vmem:[%s11223_s1 + $0xfc8] ss:$16 sps:$4 sm:$0xff]  }
 0x24f   :  { %5714 = vmatpush2.bf16.msra.mxu0 %v8129_v5  ;;  %v8197_v4 = vld [vmem:[%s11223_s1 + $0xd2c] ss:$16 sps:$4 sm:$0xff]   ;;  %v8195_v38 = vld [vmem:[%s11223_s1 + $0xd28] ss:$16 sps:$4 sm:$0xff]  }
 0x250   :  { %5731 = vmatpush1.bf16.msra.mxu1 %v8132_v20  ;;  %5765 = vmatprep.subr.bf16.mxu0 %v8140_v21  ;;  %v8200_v54 = vld [vmem:[%s11223_s1 + $0xfac] ss:$16 sps:$4 sm:$0xff]   ;;  %v8198_v5 = vld [vmem:[%s11223_s1 + $0xfa8] ss:$16 sps:$4 sm:$0xff]  }
 0x251   :  { %5732 = vmatprep.subr.bf16.mxu1 %v8137_v23  ;;  %v8203_v20 = vld [vmem:[%s11223_s1 + $0xd0c] ss:$16 sps:$4 sm:$0xff]   ;;  %v8201_v21 = vld [vmem:[%s11223_s1 + $0xd08] ss:$16 sps:$4 sm:$0xff]  }
 0x252   :  { %v5471_v45 = vpop.f32.mrf.mxu0  ;;  %5716 = vmatmul.mubr.bf16.vlgmr.msra.gmra.mxu0 %v9180_v35  ;;  %v8152_v35 = vld [vmem:[%s11223_s1 + $0xeac] ss:$16 sps:$4 sm:$0xff]  }
 0x253   :  { %v10525_v34 = vadd.f32 %v5471_v45, %v5431_v7  ;;  %5766 = vmatpush1.bf16.msra.mxu0 %v8138_v28  ;;  %5797 = vmatprep.mubr.bf16.mxu0 %v9196_v59  ;;  %v8158_v59 = vld [vmem:[%s11223_s1 + $0xe8c] ss:$16 sps:$4 sm:$0xff]   ;;  %v8210_v45 = vld [vmem:[%s11223_s1 + $0x10e8] ss:$16 sps:$4 sm:$0xff]  }
 0x254   :  { %5733 = vmatpush1.bf16.msra.mxu1 %v8135_v0  ;;  %v5473_v32 = vpop.f32.mrf.mxu0  ;;  %5767 = vmatprep.subr.bf16.mxu0 %v8146_v26  ;;  %v8185_v7 = vld [vmem:[%s11223_s1 + $0xd6c] ss:$16 sps:$4 sm:$0xff]   ;;  %v8204_v0 = vld [vmem:[%s11223_s1 + $0xf88] ss:$16 sps:$4 sm:$0xff]  }
 0x255   :  { %5734 = vmatprep.subr.bf16.mxu1 %v8143_v29  ;;  %v10539_v44 = vadd.f32 %v5473_v32, %v5433_v49  ;;  %v8191_v49 = vld [vmem:[%s11223_s1 + $0xd4c] ss:$16 sps:$4 sm:$0xff]   ;;  %v8207_v26 = vld [vmem:[%s11223_s1 + $0xf68] ss:$16 sps:$4 sm:$0xff]  }
 0x256   :  { %v5475_v47 = vpop.f32.mrf.mxu0  ;;  %v8206_v23 = vld [vmem:[%s11223_s1 + $0xf8c] ss:$16 sps:$4 sm:$0xff]  }
 0x257   :  { %5768 = vmatpush1.bf16.msra.mxu0 %v8144_v37  ;;  %v8209_v28 = vld [vmem:[%s11223_s1 + $0xf6c] ss:$16 sps:$4 sm:$0xff]  }
 0x258   :  { %5735 = vmatpush1.bf16.msra.mxu1 %v8141_v36  ;;  %v5476_v48 = vpop.f32.mrf.mxu0  ;;  %5769 = vmatprep.subr.bf16.mxu0 %v8152_v35  ;;  %v8212_v29 = vld [vmem:[%s11223_s1 + $0x10ec] ss:$16 sps:$4 sm:$0xff]   ;;  %v8216_v35 = vld [vmem:[%s11223_s1 + $0x10c8] ss:$16 sps:$4 sm:$0xff]  }
 0x259   :  { %5736 = vmatprep.subr.bf16.mxu1 %v8149_v40  ;;  %v8215_v36 = vld [vmem:[%s11223_s1 + $0xf4c] ss:$16 sps:$4 sm:$0xff]   ;;  %v8213_v40 = vld [vmem:[%s11223_s1 + $0xf48] ss:$16 sps:$4 sm:$0xff]  }
 0x25a   :  { %v8218_v37 = vld [vmem:[%s11223_s1 + $0x10cc] ss:$16 sps:$4 sm:$0xff]   ;;  %v8219_v48 = vld [vmem:[%s11223_s1 + $0xf28] ss:$16 sps:$4 sm:$0xff]  }
 0x25b   :  { %5770 = vmatpush1.bf16.msra.mxu0 %v8150_v53 }
 0x25c   :  { %5737 = vmatpush1.bf16.msra.mxu1 %v8147_v41  ;;  %5771 = vmatprep.subr.bf16.mxu0 %v8158_v59  ;;  %v8221_v41 = vld [vmem:[%s11223_s1 + $0xf2c] ss:$16 sps:$4 sm:$0xff]  }
 0x25d   :  { %5738 = vmatprep.subr.bf16.mxu1 %v8155_v13  ;;  %v8222_v13 = vld [vmem:[%s11223_s1 + $0x10a8] ss:$16 sps:$4 sm:$0xff]  }
 0x25f   :  { %5772 = vmatpush1.bf16.msra.mxu0 %v8156_v51  ;;  %v822_v51 = vsub.s32 2, %v8628_v42 }
 0x260   :  { %5739 = vmatpush1.bf16.msra.mxu1 %v8153_v46  ;;  %5773 = vmatprep.subr.bf16.mxu0 %v8164_v55  ;;  %v8227_v46 = vld [vmem:[%s11223_s1 + $0xf0c] ss:$16 sps:$4 sm:$0xff]   ;;  %v8225_v55 = vld [vmem:[%s11223_s1 + $0xf08] ss:$16 sps:$4 sm:$0xff]  }
 0x261   :  { %5740 = vmatprep.subr.bf16.mxu1 %v8161_v56  ;;  %v826_v56 = vsub.s32 3, %v8628_v42  ;;  %v8236_v42 = vld [vmem:[%s11223_s1 + $0x12ec] ss:$16 sps:$4 sm:$0xff]  }
 0x263   :  { %5774 = vmatpush1.bf16.msra.mxu0 %v8162_v61  ;;  %v8233_v61 = vld [vmem:[%s11223_s1 + $0x106c] ss:$16 sps:$4 sm:$0xff]  }
 0x264   :  { %5741 = vmatpush2.bf16.msra.mxu1 %v8159_v58  ;;  %5775 = vmatprep.subr.bf16.mxu0 %v8170_v62  ;;  %v8228_v58 = vld [vmem:[%s11223_s1 + $0x1088] ss:$16 sps:$4 sm:$0xff]  }
 0x265   :  { %5742 = vmatprep.subr.bf16.mxu1 %v8167_v57  ;;  %v8455_v57 = vld [vmem:[%s11224_s2] sm:$0xf] }
 0x266   :  { %v823_v62 = vrot.slane %v8455_v57, %v822_v51  ;;  %v8288_v51 = vld [vmem:[%s11223_s1 + $0x13c8] ss:$16 sps:$4 sm:$0xff]  }
 0x267   :  { %5776 = vmatpush1.bf16.msra.mxu0 %v8168_v6  ;;  %v8231_v6 = vld [vmem:[%s11223_s1 + $0x1068] ss:$16 sps:$4 sm:$0xff]  }
 0x268   :  { %5743 = vmatpush2.bf16.msra.mxu1 %v8165_v17  ;;  %5777 = vmatprep.subr.bf16.mxu0 %v8176_v63  ;;  %v827_v17 = vrot.slane %v8455_v57, %v826_v56  ;;  %v8239_v63 = vld [vmem:[%s11223_s1 + $0x104c] ss:$16 sps:$4 sm:$0xff]  }
 0x269   :  { %5744 = vmatprep.subr.bf16.mxu1 %v8173_v60  ;;  %v8234_v60 = vld [vmem:[%s11223_s1 + $0x12e8] ss:$16 sps:$4 sm:$0xff]   ;;  %v8293_v56 = vld [vmem:[%s11223_s1 + $0x112c] ss:$16 sps:$4 sm:$0xff]  }
 0x26a   :  { %v8302_v57 = vld [vmem:[%s11223_s1 + $0x138c] ss:$16 sps:$4 sm:$0xff]  }
 0x26b   :  { %5778 = vmatpush1.bf16.msra.mxu0 %v8174_v43 }
 0x26c   :  { %5745 = vmatpush2.bf16.msra.mxu1 %v8171_v2  ;;  %5779 = vmatprep.subr.bf16.mxu0 %v8182_v1  ;;  %v8242_v2 = vld [vmem:[%s11223_s1 + $0x12cc] ss:$16 sps:$4 sm:$0xff]  }
 0x26d   :  { %5746 = vmatprep.subr.bf16.mxu1 %v8179_v3 }
 0x26f   :  { %5780 = vmatpush1.bf16.msra.mxu0 %v8180_v30  ;;  %v8237_v30 = vld [vmem:[%s11223_s1 + $0x1048] ss:$16 sps:$4 sm:$0xff]  }
 0x270   :  { %5747 = vmatpush2.bf16.msra.mxu1 %v8177_v50  ;;  %5781 = vmatprep.subr.bf16.mxu0 %v8188_v8 }
 0x271   :  { %5748 = vmatprep.subr.bf16.mxu1 %v8185_v7  ;;  %v8240_v7 = vld [vmem:[%s11223_s1 + $0x12c8] ss:$16 sps:$4 sm:$0xff]  }
 0x273   :  { %5782 = vmatpush2.bf16.msra.mxu0 %v8186_v11 }
 0x274   :  { %5749 = vmatpush2.bf16.msra.mxu1 %v8183_v10  ;;  %5783 = vmatprep.subr.bf16.mxu0 %v8194_v16  ;;  %v8248_v10 = vld [vmem:[%s11223_s1 + $0x12ac] ss:$16 sps:$4 sm:$0xff]   ;;  %v8243_v16 = vld [vmem:[%s11223_s1 + $0x1028] ss:$16 sps:$4 sm:$0xff]  }
 0x275   :  { %5750 = vmatprep.subr.bf16.mxu1 %v8191_v49 }
 0x277   :  { %5784 = vmatpush2.bf16.msra.mxu0 %v8192_v18 }
 0x278   :  { %5751 = vmatpush2.bf16.msra.mxu1 %v8189_v19  ;;  %5785 = vmatprep.subr.bf16.mxu0 %v8200_v54  ;;  %v8246_v19 = vld [vmem:[%s11223_s1 + $0x12a8] ss:$16 sps:$4 sm:$0xff]  }
 0x279   :  { %5752 = vmatprep.subr.bf16.mxu1 %v8197_v4  ;;  %v8251_v4 = vld [vmem:[%s11223_s1 + $0x100c] ss:$16 sps:$4 sm:$0xff]   ;;  %v8249_v54 = vld [vmem:[%s11223_s1 + $0x1008] ss:$16 sps:$4 sm:$0xff]  }
 0x27b   :  { %5786 = vmatpush2.bf16.msra.mxu0 %v8198_v5  ;;  %v8257_v5 = vld [vmem:[%s11223_s1 + $0x11ec] ss:$16 sps:$4 sm:$0xff]  }
 0x27c   :  { %5753 = vmatpush2.bf16.msra.mxu1 %v8195_v38  ;;  %5787 = vmatprep.subr.bf16.mxu0 %v8206_v23  ;;  %v8252_v38 = vld [vmem:[%s11223_s1 + $0x1288] ss:$16 sps:$4 sm:$0xff]  }
 0x27d   :  { %5754 = vmatprep.subr.bf16.mxu1 %v8203_v20  ;;  %v8260_v20 = vld [vmem:[%s11223_s1 + $0x126c] ss:$16 sps:$4 sm:$0xff]   ;;  %v8255_v23 = vld [vmem:[%s11223_s1 + $0x11e8] ss:$16 sps:$4 sm:$0xff]  }
 0x27f   :  { %5788 = vmatpush2.bf16.msra.mxu0 %v8204_v0  ;;  %v8263_v0 = vld [vmem:[%s11223_s1 + $0x11cc] ss:$16 sps:$4 sm:$0xff]  }
 0x280   :  { %5755 = vmatpush2.bf16.msra.mxu1 %v8201_v21  ;;  %5789 = vmatprep.subr.bf16.mxu0 %v8209_v28  ;;  %v8258_v21 = vld [vmem:[%s11223_s1 + $0x1268] ss:$16 sps:$4 sm:$0xff]   ;;  %v8266_v28 = vld [vmem:[%s11223_s1 + $0x124c] ss:$16 sps:$4 sm:$0xff]  }
 0x281   :  { %5806 = vmatprep.subr.bf16.mxu1 %v8212_v29  ;;  %v8261_v29 = vld [vmem:[%s11223_s1 + $0x11c8] ss:$16 sps:$4 sm:$0xff]  }
 0x283   :  { %v5512_v32 = vpop.f32.mrf.mxu1  ;;  %5757 = vmatmul.mubr.bf16.vlgmr.msra.gmra.mxu1 %v9392_v15  ;;  %5790 = vmatpush2.bf16.msra.mxu0 %v8207_v26  ;;  %v8224_v15 = vld [vmem:[%s11223_s1 + $0x10ac] ss:$16 sps:$4 sm:$0xff]   ;;  %v8264_v26 = vld [vmem:[%s11223_s1 + $0x1248] ss:$16 sps:$4 sm:$0xff]  }
 0x284   :  { %5807 = vmatpush1.bf16.msra.mxu1 %v8210_v45  ;;  %5791 = vmatprep.subr.bf16.mxu0 %v8215_v36  ;;  %v5513_v43 = vadd.f32 %v5512_v32, %v823_v62  ;;  %v8269_v45 = vld [vmem:[%s11223_s1 + $0x11ac] ss:$16 sps:$4 sm:$0xff]   ;;  %v8270_v32 = vld [vmem:[%s11223_s1 + $0x1228] ss:$16 sps:$4 sm:$0xff]  }
 0x285   :  { %v5514_v47 = vpop.f32.mrf.mxu1  ;;  %5808 = vmatprep.subr.bf16.mxu1 %v8218_v37  ;;  %5838 = vmatprep.mubr.bf16.mxu1 %v9403_v22  ;;  %v8230_v22 = vld [vmem:[%s11223_s1 + $0x108c] ss:$16 sps:$4 sm:$0xff]   ;;  %v8267_v37 = vld [vmem:[%s11223_s1 + $0x11a8] ss:$16 sps:$4 sm:$0xff]  }
 0x286   :  { %v5515_v1 = vadd.f32 %v5514_v47, %v827_v17  ;;  %v8272_v36 = vld [vmem:[%s11223_s1 + $0x122c] ss:$16 sps:$4 sm:$0xff]   ;;  %v8273_v47 = vld [vmem:[%s11223_s1 + $0x1188] ss:$16 sps:$4 sm:$0xff]  }
 0x287   :  { %v5516_v53 = vpop.f32.mrf.mxu1  ;;  %5792 = vmatpush2.bf16.msra.mxu0 %v8213_v40  ;;  %v8275_v40 = vld [vmem:[%s11223_s1 + $0x118c] ss:$16 sps:$4 sm:$0xff]   ;;  %v8297_v62 = vld [vmem:[%s11223_s1 + $0x1108] ss:$16 sps:$4 sm:$0xff]  }
 0x288   :  { %5809 = vmatpush1.bf16.msra.mxu1 %v8216_v35  ;;  %5793 = vmatprep.subr.bf16.mxu0 %v8221_v41  ;;  %v8278_v35 = vld [vmem:[%s11223_s1 + $0x120c] ss:$16 sps:$4 sm:$0xff]   ;;  %v8276_v41 = vld [vmem:[%s11223_s1 + $0x1208] ss:$16 sps:$4 sm:$0xff]  }
 0x289   :  { %v5517_v59 = vpop.f32.mrf.mxu1  ;;  %5810 = vmatprep.subr.bf16.mxu1 %v8224_v15  ;;  %v8281_v15 = vld [vmem:[%s11223_s1 + $0x116c] ss:$16 sps:$4 sm:$0xff]   ;;  %v8300_v17 = vld [vmem:[%s11223_s1 + $0x1388] ss:$16 sps:$4 sm:$0xff]  }
 0x28a   :  { %v8284_v53 = vld [vmem:[%s11223_s1 + $0x13ec] ss:$16 sps:$4 sm:$0xff]  }
 0x28b   :  { %5794 = vmatpush2.bf16.msra.mxu0 %v8219_v48  ;;  %v8279_v48 = vld [vmem:[%s11223_s1 + $0x1168] ss:$16 sps:$4 sm:$0xff]   ;;  %v8287_v59 = vld [vmem:[%s11223_s1 + $0x114c] ss:$16 sps:$4 sm:$0xff]  }
 0x28c   :  { %5811 = vmatpush1.bf16.msra.mxu1 %v8222_v13  ;;  %5795 = vmatprep.subr.bf16.mxu0 %v8227_v46  ;;  %v8282_v13 = vld [vmem:[%s11223_s1 + $0x13e8] ss:$16 sps:$4 sm:$0xff]   ;;  %v8290_v46 = vld [vmem:[%s11223_s1 + $0x13cc] ss:$16 sps:$4 sm:$0xff]  }
 0x28d   :  { %5812 = vmatprep.subr.bf16.mxu1 %v8230_v22  ;;  %v8285_v22 = vld [vmem:[%s11223_s1 + $0x1148] ss:$16 sps:$4 sm:$0xff]  }
 0x28f   :  { %5796 = vmatpush2.bf16.msra.mxu0 %v8225_v55  ;;  %v8296_v55 = vld [vmem:[%s11223_s1 + $0x13ac] ss:$16 sps:$4 sm:$0xff]  }
 0x290   :  { %5813 = vmatpush1.bf16.msra.mxu1 %v8228_v58  ;;  %5847 = vmatprep.subr.bf16.mxu0 %v8236_v42  ;;  %v8291_v58 = vld [vmem:[%s11223_s1 + $0x1128] ss:$16 sps:$4 sm:$0xff]   ;;  %v8299_v42 = vld [vmem:[%s11223_s1 + $0x110c] ss:$16 sps:$4 sm:$0xff]  }
 0x291   :  { %5814 = vmatprep.subr.bf16.mxu1 %v8233_v61  ;;  %v8294_v61 = vld [vmem:[%s11223_s1 + $0x13a8] ss:$16 sps:$4 sm:$0xff]  }
 0x292   :  { %v5553_v3 = vpop.f32.mrf.mxu0  ;;  %5798 = vmatmul.mubr.bf16.vlgmr.msra.gmra.mxu0 %v9407_v39  ;;  %v8245_v39 = vld [vmem:[%s11223_s1 + $0x102c] ss:$16 sps:$4 sm:$0xff]  }
 0x293   :  { %v10730_v50 = vadd.f32 %v5553_v3, %v5513_v43  ;;  %5848 = vmatpush1.bf16.msra.mxu0 %v8234_v60  ;;  %5879 = vmatprep.mubr.bf16.mxu0 %v9423_v31  ;;  %v8254_v31 = vld [vmem:[%s11223_s1 + $0x128c] ss:$16 sps:$4 sm:$0xff]  }
 0x294   :  { %5815 = vmatpush1.bf16.msra.mxu1 %v8231_v6  ;;  %v5555_v8 = vpop.f32.mrf.mxu0  ;;  %5849 = vmatprep.subr.bf16.mxu0 %v8242_v2  ;;  %v8305_v6 = vld [vmem:[%s11223_s1 + $0x136c] ss:$16 sps:$4 sm:$0xff]   ;;  %v8306_v2 = vld [vmem:[%s11223_s1 + $0x14e8] ss:$16 sps:$4 sm:$0xff]  }
 0x295   :  { %5816 = vmatprep.subr.bf16.mxu1 %v8239_v63  ;;  %v10744_v11 = vadd.f32 %v5555_v8, %v5515_v1  ;;  %v8308_v60 = vld [vmem:[%s11223_s1 + $0x14ec] ss:$16 sps:$4 sm:$0xff]   ;;  %v8303_v63 = vld [vmem:[%s11223_s1 + $0x1368] ss:$16 sps:$4 sm:$0xff]  }
 0x296   :  { %v5557_v49 = vpop.f32.mrf.mxu0  ;;  %v8311_v43 = vld [vmem:[%s11223_s1 + $0x134c] ss:$16 sps:$4 sm:$0xff]   ;;  %v8312_v8 = vld [vmem:[%s11223_s1 + $0x14c8] ss:$16 sps:$4 sm:$0xff]  }
 0x297   :  { %5850 = vmatpush1.bf16.msra.mxu0 %v8240_v7  ;;  %v8314_v3 = vld [vmem:[%s11223_s1 + $0x14cc] ss:$16 sps:$4 sm:$0xff]   ;;  %v8309_v7 = vld [vmem:[%s11223_s1 + $0x1348] ss:$16 sps:$4 sm:$0xff]  }
 0x298   :  { %5817 = vmatpush1.bf16.msra.mxu1 %v8237_v30  ;;  %v5558_v18 = vpop.f32.mrf.mxu0  ;;  %5851 = vmatprep.subr.bf16.mxu0 %v8248_v10  ;;  %v8317_v10 = vld [vmem:[%s11223_s1 + $0x132c] ss:$16 sps:$4 sm:$0xff]  }
 0x299   :  { %5818 = vmatprep.subr.bf16.mxu1 %v8245_v39 }
 0x29b   :  { %5852 = vmatpush1.bf16.msra.mxu0 %v8246_v19  ;;  %v8318_v19 = vld [vmem:[%s11223_s1 + $0x14a8] ss:$16 sps:$4 sm:$0xff]  }
 0x29c   :  { %5819 = vmatpush1.bf16.msra.mxu1 %v8243_v16  ;;  %5853 = vmatprep.subr.bf16.mxu0 %v8254_v31  ;;  %v8315_v16 = vld [vmem:[%s11223_s1 + $0x1328] ss:$16 sps:$4 sm:$0xff]  }
 0x29d   :  { %5820 = vmatprep.subr.bf16.mxu1 %v8251_v4  ;;  %v8321_v4 = vld [vmem:[%s11223_s1 + $0x1308] ss:$16 sps:$4 sm:$0xff]  }
 0x29e   :  { %v8324_v31 = vld [vmem:[%s11223_s1 + $0x1488] ss:$16 sps:$4 sm:$0xff]  }
 0x29f   :  { %5854 = vmatpush1.bf16.msra.mxu0 %v8252_v38  ;;  %v8332_v38 = vld [vmem:[%s11223_s1 + $0x16ec] ss:$16 sps:$4 sm:$0xff]  }
 0x2a0   :  { %5821 = vmatpush1.bf16.msra.mxu1 %v8249_v54  ;;  %5855 = vmatprep.subr.bf16.mxu0 %v8260_v20  ;;  %v8329_v54 = vld [vmem:[%s11223_s1 + $0x146c] ss:$16 sps:$4 sm:$0xff]   ;;  %v8330_v20 = vld [vmem:[%s11223_s1 + $0x16e8] ss:$16 sps:$4 sm:$0xff]  }
 0x2a1   :  { %5822 = vmatprep.subr.bf16.mxu1 %v8257_v5  ;;  %v8327_v5 = vld [vmem:[%s11223_s1 + $0x1468] ss:$16 sps:$4 sm:$0xff]  }
 0x2a3   :  { %5856 = vmatpush1.bf16.msra.mxu0 %v8258_v21  ;;  %v8338_v21 = vld [vmem:[%s11223_s1 + $0x16cc] ss:$16 sps:$4 sm:$0xff]  }
 0x2a4   :  { %5823 = vmatpush2.bf16.msra.mxu1 %v8255_v23  ;;  %5857 = vmatprep.subr.bf16.mxu0 %v8266_v28  ;;  %v8335_v23 = vld [vmem:[%s11223_s1 + $0x144c] ss:$16 sps:$4 sm:$0xff]  }
 0x2a5   :  { %5824 = vmatprep.subr.bf16.mxu1 %v8263_v0 }
 0x2a7   :  { %5858 = vmatpush1.bf16.msra.mxu0 %v8264_v26  ;;  %v8336_v26 = vld [vmem:[%s11223_s1 + $0x16c8] ss:$16 sps:$4 sm:$0xff]  }
 0x2a8   :  { %5825 = vmatpush2.bf16.msra.mxu1 %v8261_v29  ;;  %5859 = vmatprep.subr.bf16.mxu0 %v8272_v36  ;;  %v8333_v29 = vld [vmem:[%s11223_s1 + $0x1448] ss:$16 sps:$4 sm:$0xff]   ;;  %v8341_v36 = vld [vmem:[%s11223_s1 + $0x142c] ss:$16 sps:$4 sm:$0xff]  }
 0x2a9   :  { %5826 = vmatprep.subr.bf16.mxu1 %v8269_v45 }
 0x2ab   :  { %5860 = vmatpush1.bf16.msra.mxu0 %v8270_v32 }
 0x2ac   :  { %5827 = vmatpush2.bf16.msra.mxu1 %v8267_v37  ;;  %5861 = vmatprep.subr.bf16.mxu0 %v8278_v35  ;;  %v8342_v35 = vld [vmem:[%s11223_s1 + $0x16a8] ss:$16 sps:$4 sm:$0xff]  }
 0x2ad   :  { %5828 = vmatprep.subr.bf16.mxu1 %v8275_v40  ;;  %v8339_v40 = vld [vmem:[%s11223_s1 + $0x1428] ss:$16 sps:$4 sm:$0xff]  }
 0x2af   :  { %5862 = vmatpush1.bf16.msra.mxu0 %v8276_v41  ;;  %v8347_v41 = vld [vmem:[%s11223_s1 + $0x140c] ss:$16 sps:$4 sm:$0xff]  }
 0x2b0   :  { %5829 = vmatpush2.bf16.msra.mxu1 %v8273_v47  ;;  %5863 = vmatprep.subr.bf16.mxu0 %v8284_v53  ;;  %v8348_v53 = vld [vmem:[%s11223_s1 + $0x1688] ss:$16 sps:$4 sm:$0xff]  }
 0x2b1   :  { %5830 = vmatprep.subr.bf16.mxu1 %v8281_v15  ;;  %v8345_v15 = vld [vmem:[%s11223_s1 + $0x1408] ss:$16 sps:$4 sm:$0xff]  }
 0x2b3   :  { %5864 = vmatpush2.bf16.msra.mxu0 %v8282_v13  ;;  %v8356_v13 = vld [vmem:[%s11223_s1 + $0x166c] ss:$16 sps:$4 sm:$0xff]  }
 0x2b4   :  { %5831 = vmatpush2.bf16.msra.mxu1 %v8279_v48  ;;  %5865 = vmatprep.subr.bf16.mxu0 %v8290_v46  ;;  %v8353_v48 = vld [vmem:[%s11223_s1 + $0x15ec] ss:$16 sps:$4 sm:$0xff]   ;;  %v8354_v46 = vld [vmem:[%s11223_s1 + $0x1668] ss:$16 sps:$4 sm:$0xff]  }
 0x2b5   :  { %5832 = vmatprep.subr.bf16.mxu1 %v8287_v59  ;;  %v8351_v59 = vld [vmem:[%s11223_s1 + $0x15e8] ss:$16 sps:$4 sm:$0xff]  }
 0x2b7   :  { %5866 = vmatpush2.bf16.msra.mxu0 %v8288_v51  ;;  %v8362_v51 = vld [vmem:[%s11223_s1 + $0x164c] ss:$16 sps:$4 sm:$0xff]  }
 0x2b8   :  { %5833 = vmatpush2.bf16.msra.mxu1 %v8285_v22  ;;  %5867 = vmatprep.subr.bf16.mxu0 %v8296_v55  ;;  %v8359_v22 = vld [vmem:[%s11223_s1 + $0x15cc] ss:$16 sps:$4 sm:$0xff]   ;;  %v8360_v55 = vld [vmem:[%s11223_s1 + $0x1648] ss:$16 sps:$4 sm:$0xff]  }
 0x2b9   :  { %5834 = vmatprep.subr.bf16.mxu1 %v8293_v56  ;;  %v8357_v56 = vld [vmem:[%s11223_s1 + $0x15c8] ss:$16 sps:$4 sm:$0xff]  }
 0x2bb   :  { %5868 = vmatpush2.bf16.msra.mxu0 %v8294_v61  ;;  %v8368_v61 = vld [vmem:[%s11223_s1 + $0x162c] ss:$16 sps:$4 sm:$0xff]  }
 0x2bc   :  { %5835 = vmatpush2.bf16.msra.mxu1 %v8291_v58  ;;  %5869 = vmatprep.subr.bf16.mxu0 %v8302_v57  ;;  %v8365_v58 = vld [vmem:[%s11223_s1 + $0x15ac] ss:$16 sps:$4 sm:$0xff]   ;;  %v8366_v57 = vld [vmem:[%s11223_s1 + $0x1628] ss:$16 sps:$4 sm:$0xff]  }
 0x2bd   :  { %5836 = vmatprep.subr.bf16.mxu1 %v8299_v42  ;;  %v8363_v42 = vld [vmem:[%s11223_s1 + $0x15a8] ss:$16 sps:$4 sm:$0xff]  }
 0x2bf   :  { %5870 = vmatpush2.bf16.msra.mxu0 %v8300_v17  ;;  %v8374_v17 = vld [vmem:[%s11223_s1 + $0x160c] ss:$16 sps:$4 sm:$0xff]  }
 0x2c0   :  { %5837 = vmatpush2.bf16.msra.mxu1 %v8297_v62  ;;  %5871 = vmatprep.subr.bf16.mxu0 %v8305_v6  ;;  %v8371_v62 = vld [vmem:[%s11223_s1 + $0x158c] ss:$16 sps:$4 sm:$0xff]   ;;  %v8369_v6 = vld [vmem:[%s11223_s1 + $0x1588] ss:$16 sps:$4 sm:$0xff]  }
 0x2c1   :  { %5888 = vmatprep.subr.bf16.mxu1 %v8308_v60  ;;  %v8372_v60 = vld [vmem:[%s11223_s1 + $0x1608] ss:$16 sps:$4 sm:$0xff]  }
 0x2c3   :  { %v5594_v1 = vpop.f32.mrf.mxu1  ;;  %5839 = vmatmul.mubr.bf16.vlgmr.msra.gmra.mxu1 %v9610_v12  ;;  %5872 = vmatpush2.bf16.msra.mxu0 %v8303_v63  ;;  %v8320_v12 = vld [vmem:[%s11223_s1 + $0x14ac] ss:$16 sps:$4 sm:$0xff]  }
 0x2c4   :  { %v5595_v30 = vadd.f32 %v5594_v1, %v10730_v50  ;;  %5889 = vmatpush1.bf16.msra.mxu1 %v8306_v2  ;;  %5873 = vmatprep.subr.bf16.mxu0 %v8311_v43  ;;  %v8377_v63 = vld [vmem:[%s11223_s1 + $0x156c] ss:$16 sps:$4 sm:$0xff]   ;;  %v8375_v43 = vld [vmem:[%s11223_s1 + $0x1568] ss:$16 sps:$4 sm:$0xff]  }
 0x2c5   :  { %v5596_v39 = vpop.f32.mrf.mxu1  ;;  %5890 = vmatprep.subr.bf16.mxu1 %v8314_v3  ;;  %5920 = vmatprep.mubr.bf16.mxu1 %v9631_v24  ;;  %v8326_v24 = vld [vmem:[%s11223_s1 + $0x148c] ss:$16 sps:$4 sm:$0xff]   ;;  %v8378_v3 = vld [vmem:[%s11223_s1 + $0x17e8] ss:$16 sps:$4 sm:$0xff]  }
 0x2c6   :  { %v5597_v50 = vadd.f32 %v5596_v39, %v10744_v11  ;;  %v8323_v11 = vld [vmem:[%s11223_s1 + $0x130c] ss:$16 sps:$4 sm:$0xff]  }
 0x2c7   :  { %v5598_v49 = vpop.f32.mrf.mxu1  ;;  %5874 = vmatpush2.bf16.msra.mxu0 %v8309_v7  ;;  %v8380_v2 = vld [vmem:[%s11223_s1 + $0x17ec] ss:$16 sps:$4 sm:$0xff]   ;;  %v8381_v7 = vld [vmem:[%s11223_s1 + $0x1548] ss:$16 sps:$4 sm:$0xff]  }
 0x2c8   :  { %5891 = vmatpush1.bf16.msra.mxu1 %v8312_v8  ;;  %5875 = vmatprep.subr.bf16.mxu0 %v8317_v10  ;;  %v8383_v1 = vld [vmem:[%s11223_s1 + $0x154c] ss:$16 sps:$4 sm:$0xff]   ;;  %v8384_v8 = vld [vmem:[%s11223_s1 + $0x17c8] ss:$16 sps:$4 sm:$0xff]  }
 0x2c9   :  { %v5599_v18 = vpop.f32.mrf.mxu1  ;;  %5892 = vmatprep.subr.bf16.mxu1 %v8320_v12  ;;  %v8389_v39 = vld [vmem:[%s11223_s1 + $0x152c] ss:$16 sps:$4 sm:$0xff]   ;;  %v8387_v12 = vld [vmem:[%s11223_s1 + $0x1528] ss:$16 sps:$4 sm:$0xff]  }
 0x2ca   :  { %v8392_v10 = vld [vmem:[%s11223_s1 + $0x17ac] ss:$16 sps:$4 sm:$0xff]   ;;  %v8396_v18 = vld [vmem:[%s11223_s1 + $0x1788] ss:$16 sps:$4 sm:$0xff]  }
 0x2cb   :  { %5876 = vmatpush2.bf16.msra.mxu0 %v8315_v16  ;;  %v8395_v49 = vld [vmem:[%s11223_s1 + $0x150c] ss:$16 sps:$4 sm:$0xff]  }
 0x2cc   :  { %5893 = vmatpush1.bf16.msra.mxu1 %v8318_v19  ;;  %5877 = vmatprep.subr.bf16.mxu0 %v8323_v11  ;;  %v8398_v16 = vld [vmem:[%s11223_s1 + $0x178c] ss:$16 sps:$4 sm:$0xff]   ;;  %v8393_v19 = vld [vmem:[%s11223_s1 + $0x1508] ss:$16 sps:$4 sm:$0xff]  }
 0x2cd   :  { %5894 = vmatprep.subr.bf16.mxu1 %v8326_v24  ;;  %v8401_v11 = vld [vmem:[%s11223_s1 + $0x176c] ss:$16 sps:$4 sm:$0xff]  }
 0x2ce   :  { %v8404_v24 = vld [vmem:[%s11223_s1 + $0x186c] ss:$16 sps:$4 sm:$0xff]  }
 0x2cf   :  { %5878 = vmatpush2.bf16.msra.mxu0 %v8321_v4  ;;  %v8399_v4 = vld [vmem:[%s11223_s1 + $0x1768] ss:$16 sps:$4 sm:$0xff]  }
 0x2d0   :  { %5895 = vmatpush1.bf16.msra.mxu1 %v8324_v31  ;;  %5929 = vmatprep.subr.bf16.mxu0 %v8332_v38  ;;  %v8402_v31 = vld [vmem:[%s11223_s1 + $0x1868] ss:$16 sps:$4 sm:$0xff]   ;;  %v8410_v38 = vld [vmem:[%s11223_s1 + $0x184c] ss:$16 sps:$4 sm:$0xff]  }
 0x2d1   :  { %5896 = vmatprep.subr.bf16.mxu1 %v8329_v54  ;;  %v8407_v54 = vld [vmem:[%s11223_s1 + $0x174c] ss:$16 sps:$4 sm:$0xff]  }
 0x2d2   :  { %v5635_v0 = vpop.f32.mrf.mxu0  ;;  %5880 = vmatmul.mubr.bf16.vlgmr.msra.gmra.mxu0 %v9635_v25  ;;  %v8344_v25 = vld [vmem:[%s11223_s1 + $0x16ac] ss:$16 sps:$4 sm:$0xff]  }
 0x2d3   :  { %v10932_v28 = vadd.f32 %v5635_v0, %v5595_v30  ;;  %5930 = vmatpush1.bf16.msra.mxu0 %v8330_v20  ;;  %5961 = vmatprep.mubr.bf16.mxu0 %v9651_v33  ;;  %v8350_v33 = vld [vmem:[%s11223_s1 + $0x168c] ss:$16 sps:$4 sm:$0xff]  }
 0x2d4   :  { %5897 = vmatpush1.bf16.msra.mxu1 %v8327_v5  ;;  %v5637_v45 = vpop.f32.mrf.mxu0  ;;  %5931 = vmatprep.subr.bf16.mxu0 %v8338_v21  ;;  %v8386_v30 = vld [vmem:[%s11223_s1 + $0x17cc] ss:$16 sps:$4 sm:$0xff]   ;;  %v8408_v21 = vld [vmem:[%s11223_s1 + $0x1848] ss:$16 sps:$4 sm:$0xff]  }
 0x2d5   :  { %5898 = vmatprep.subr.bf16.mxu1 %v8335_v23  ;;  %v10946_v37 = vadd.f32 %v5637_v45, %v5597_v50  ;;  %v8390_v50 = vld [vmem:[%s11223_s1 + $0x17a8] ss:$16 sps:$4 sm:$0xff]  }
 0x2d6   :  { %v5639_v32 = vpop.f32.mrf.mxu0  ;;  %v8405_v23 = vld [vmem:[%s11223_s1 + $0x1748] ss:$16 sps:$4 sm:$0xff]  }
 0x2d7   :  { %5932 = vmatpush1.bf16.msra.mxu0 %v8336_v26  ;;  %v8411_v45 = vld [vmem:[%s11223_s1 + $0x1728] ss:$16 sps:$4 sm:$0xff]  }
 0x2d8   :  { %5899 = vmatpush1.bf16.msra.mxu1 %v8333_v29  ;;  %v5640_v47 = vpop.f32.mrf.mxu0  ;;  %5933 = vmatprep.subr.bf16.mxu0 %v8344_v25  ;;  %v8413_v29 = vld [vmem:[%s11223_s1 + $0x172c] ss:$16 sps:$4 sm:$0xff]   ;;  %v8417_v32 = vld [vmem:[%s11223_s1 + $0x1708] ss:$16 sps:$4 sm:$0xff]  }
 0x2d9   :  { %5900 = vmatprep.subr.bf16.mxu1 %v8341_v36  ;;  %v8414_v36 = vld [vmem:[%s11223_s1 + $0x1828] ss:$16 sps:$4 sm:$0xff]   ;;  %v6012_v47 = vmax.f32 %v10539_v44, 0.0  ;;  %v8426_v44 = vld [vmem:[%s11225_s3 + $0x30] sm:$0xff]  }
 0x2db   :  { %5934 = vmatpush1.bf16.msra.mxu0 %v8342_v35  ;;  %v8423_v35 = vld [vmem:[%s11225_s3 + $0x78] sm:$0xff]  }
 0x2dc   :  { %5901 = vmatpush1.bf16.msra.mxu1 %v8339_v40  ;;  %5935 = vmatprep.subr.bf16.mxu0 %v8350_v33  ;;  %v8420_v40 = vld [vmem:[%s11223_s1 + $0x1808] ss:$16 sps:$4 sm:$0xff]   ;;  %v8425_v33 = vld [vmem:[%s11225_s3 + $0x70] sm:$0xff]  }
 0x2dd   :  { %5902 = vmatprep.subr.bf16.mxu1 %v8347_v41  ;;  %v8424_v41 = vld [vmem:[%s11225_s3 + $0x38] sm:$0xff]  }
 0x2df   :  { %5936 = vmatpush1.bf16.msra.mxu0 %v8348_v53 }
 0x2e0   :  { %5903 = vmatpush1.bf16.msra.mxu1 %v8345_v15  ;;  %5937 = vmatprep.subr.bf16.mxu0 %v8356_v13  ;;  %v6016_v15 = vpack.c.bf16 %v6012_v47, %v6012_v47 }
 0x2e1   :  { %5904 = vmatprep.subr.bf16.mxu1 %v8353_v48 }
 0x2e3   :  { %5938 = vmatpush1.bf16.msra.mxu0 %v8354_v46 }
 0x2e4   :  { %5905 = vmatpush2.bf16.msra.mxu1 %v8351_v59  ;;  %5939 = vmatprep.subr.bf16.mxu0 %v8362_v51  ;;  %v8427_v59 = vld [vmem:[%s11225_s3 + $0x68] sm:$0xff]   ;;  %v8429_v51 = vld [vmem:[%s11225_s3 + $0x60] sm:$0xff]  }
 0x2e5   :  { %5906 = vmatprep.subr.bf16.mxu1 %v8359_v22 }
 0x2e7   :  { %5940 = vmatpush1.bf16.msra.mxu0 %v8360_v55  ;;  %v8440_v55 = vld [vmem:[%s11225_s3 + $0xb8] sm:$0xff]  }
 0x2e8   :  { %5907 = vmatpush2.bf16.msra.mxu1 %v8357_v56  ;;  %5941 = vmatprep.subr.bf16.mxu0 %v8368_v61  ;;  %v8439_v56 = vld [vmem:[%s11225_s3 + $0xf8] sm:$0xff]  }
 0x2e9   :  { %5908 = vmatprep.subr.bf16.mxu1 %v8365_v58  ;;  %v8430_v58 = vld [vmem:[%s11225_s3 + $0x20] sm:$0xff]   ;;  %v8431_v61 = vld [vmem:[%s11225_s3 + $0x58] sm:$0xff]  }
 0x2eb   :  { %5942 = vmatpush1.bf16.msra.mxu0 %v8366_v57  ;;  %v8433_v57 = vld [vmem:[%s11225_s3 + $0x50] sm:$0xff]  }
 0x2ec   :  { %5909 = vmatpush2.bf16.msra.mxu1 %v8363_v42  ;;  %5943 = vmatprep.subr.bf16.mxu0 %v8374_v17  ;;  %v8432_v42 = vld [vmem:[%s11225_s3 + $0x18] sm:$0xff]   ;;  %v8435_v17 = vld [vmem:[%s11225_s3 + $0x48] sm:$0xff]  }
 0x2ed   :  { %5910 = vmatprep.subr.bf16.mxu1 %v8371_v62  ;;  %v8434_v62 = vld [vmem:[%s11225_s3 + $0x10] sm:$0xff]  }
 0x2ef   :  { %5944 = vmatpush1.bf16.msra.mxu0 %v8372_v60  ;;  %v8437_v60 = vld [vmem:[%s11225_s3 + $0x40] sm:$0xff]  }
 0x2f0   :  { %5911 = vmatpush2.bf16.msra.mxu1 %v8369_v6  ;;  %5945 = vmatprep.subr.bf16.mxu0 %v8380_v2  ;;  %v8436_v6 = vld [vmem:[%s11225_s3 + $0x8] sm:$0xff]   ;;  %v6011_v2 = vmax.f32 %v10525_v34, 0.0 }
 0x2f1   :  { %5912 = vmatprep.subr.bf16.mxu1 %v8377_v63  ;;  %v8438_v63 = vld [vmem:[%s11225_s3] sm:$0xff]   ;;  %v8443_v34 = vld [vmem:[%s11225_s3 + $0xe8] sm:$0xff]  }
 0x2f3   :  { %5946 = vmatpush2.bf16.msra.mxu0 %v8378_v3  ;;  %v8441_v3 = vld [vmem:[%s11225_s3 + $0xf0] sm:$0xff]  }
 0x2f4   :  { %5913 = vmatpush2.bf16.msra.mxu1 %v8375_v43  ;;  %5947 = vmatprep.subr.bf16.mxu0 %v8386_v30  ;;  %v6015_v43 = vpack.c.bf16 %v6011_v2, %v6011_v2 }
 0x2f5   :  { %5914 = vmatprep.subr.bf16.mxu1 %v8383_v1  ;;  %v8442_v1 = vld [vmem:[%s11225_s3 + $0xb0] sm:$0xff]  }
 0x2f7   :  { %5948 = vmatpush2.bf16.msra.mxu0 %v8384_v8 }
 0x2f8   :  { %5915 = vmatpush2.bf16.msra.mxu1 %v8381_v7  ;;  %5949 = vmatprep.subr.bf16.mxu0 %v8392_v10  ;;  %v8444_v10 = vld [vmem:[%s11225_s3 + $0xa8] sm:$0xff]  }
 0x2f9   :  { %5916 = vmatprep.subr.bf16.mxu1 %v8389_v39 }
 0x2fb   :  { %5950 = vmatpush2.bf16.msra.mxu0 %v8390_v50 }
 0x2fc   :  { %5917 = vmatpush2.bf16.msra.mxu1 %v8387_v12  ;;  %5951 = vmatprep.subr.bf16.mxu0 %v8398_v16  ;;  %v8446_v16 = vld [vmem:[%s11225_s3 + $0xa0] sm:$0xff]  }
 0x2fd   :  { %5918 = vmatprep.subr.bf16.mxu1 %v8395_v49  ;;  %v8445_v49 = vld [vmem:[%s11225_s3 + $0xe0] sm:$0xff]  }
 0x2ff   :  { %5952 = vmatpush2.bf16.msra.mxu0 %v8396_v18  ;;  %v8448_v18 = vld [vmem:[%s11225_s3 + $0x98] sm:$0xff]  }
 0x300   :  { %5919 = vmatpush2.bf16.msra.mxu1 %v8393_v19  ;;  %5953 = vmatprep.subr.bf16.mxu0 %v8401_v11  ;;  %v8447_v19 = vld [vmem:[%s11225_s3 + $0xd8] sm:$0xff]   ;;  %v8449_v11 = vld [vmem:[%s11225_s3 + $0xd0] sm:$0xff]  }
 0x301   :  { %5978 = vmatprep.subr.bf16.mxu1 %v8404_v24  ;;  %v8450_v24 = vld [vmem:[%s11225_s3 + $0x90] sm:$0xff]  }
 0x303   :  { %v5676_v5 = vpop.f32.mrf.mxu1  ;;  %5921 = vmatmul.mubr.bf16.vlgmr.msra.gmra.mxu1 %v9827_v14  ;;  %5954 = vmatpush2.bf16.msra.mxu0 %v8399_v4  ;;  %v8416_v14 = vld [vmem:[%s11223_s1 + $0x182c] ss:$16 sps:$4 sm:$0xff]  }
 0x304   :  { %v5677_v20 = vadd.f32 %v5676_v5, %v10932_v28  ;;  %5979 = vmatpush1.bf16.msra.mxu1 %v8402_v31  ;;  %5955 = vmatprep.subr.bf16.mxu0 %v8407_v54 }
 0x305   :  { %v5678_v0 = vpop.f32.mrf.mxu1  ;;  %5980 = vmatprep.subr.bf16.mxu1 %v8410_v38  ;;  %6002 = vmatprep.mubr.bf16.mxu1 %v8479_v52  ;;  %v8422_v52 = vld [vmem:[%s11223_s1 + $0x180c] ss:$16 sps:$4 sm:$0xff]  }
 0x306   :  { %v5679_v28 = vadd.f32 %v5678_v0, %v10946_v37  ;;  %v8419_v37 = vld [vmem:[%s11223_s1 + $0x170c] ss:$16 sps:$4 sm:$0xff]   ;;  %v8453_v0 = vld [vmem:[%s11225_s3 + $0xc0] sm:$0xff]  }
 0x307   :  { %v5680_v26 = vpop.f32.mrf.mxu1  ;;  %5956 = vmatpush2.bf16.msra.mxu0 %v8405_v23  ;;  %v8451_v38 = vld [vmem:[%s11225_s3 + $0xc8] sm:$0xff]  }
 0x308   :  { %5981 = vmatpush1.bf16.msra.mxu1 %v8408_v21  ;;  %5957 = vmatprep.subr.bf16.mxu0 %v8413_v29  ;;  %v8454_v29 = vld [vmem:[%s11225_s3 + $0x80] sm:$0xff]  }
 0x309   :  { %v5681_v25 = vpop.f32.mrf.mxu1  ;;  %5982 = vmatprep.subr.bf16.mxu1 %v8416_v14 }
 0x30b   :  { %5958 = vmatpush2.bf16.msra.mxu0 %v8411_v45 }
 0x30c   :  { %5983 = vmatpush1.bf16.msra.mxu1 %v8414_v36  ;;  %5959 = vmatprep.subr.bf16.mxu0 %v8419_v37 }
 0x30d   :  { %5984 = vmatprep.subr.bf16.mxu1 %v8422_v52 }
 0x30f   :  { %5960 = vmatpush2.bf16.msra.mxu0 %v8417_v32 }
 0x310   :  { %5985 = vmatpush1.bf16.msra.mxu1 %v8420_v40  ;;  %7197 = vmatprep.subr.bf16.mxu0 %v8423_v35 }
 0x311   :  { %7219 = vmatprep.subr.bf16.mxu1 %v8439_v56 }
 0x312   :  { %v5717_v53 = vpop.f32.mrf.mxu0  ;;  %5962 = vmatmul.mubr.bf16.vlgmr.msra.gmra.mxu0 %v9849_v27  ;;  %v8428_v27 = vld [vmem:[%s11225_s3 + $0x28] sm:$0xff]  }
 0x313   :  { %7163 = vmatmul.mubr.msk.bf16.vlgmr.msra.gmra.mxu1 %vm4941_vm0, %v9913_v9  ;;  %v5718_v48 = vadd.f32 %v5717_v53, %v5677_v20  ;;  %7198 = vmatpush3.bf16.msra.mxu0 %v8424_v41  ;;  %v8452_v20 = vld [vmem:[%s11225_s3 + $0x88] sm:$0xff]  }
 0x314   :  { %6314 = vmatprep.mubr.bf16.mxu0 %v6016_v15  ;;  %v5719_v13 = vpop.f32.mrf.mxu0  ;;  %7199 = vmatprep.subr.bf16.mxu0 %v8425_v33 }
 0x315   :  { %v5720_v46 = vadd.f32 %v5719_v13, %v5679_v28  ;;  %7220 = vmatpush3.bf16.msra.mxu1 %v8440_v55 }
 0x316   :  { %v5721_v22 = vpop.f32.mrf.mxu0  ;;  %7221 = vmatprep.subr.bf16.mxu1 %v8441_v3 }
 0x317   :  { %7200 = vmatpush3.bf16.msra.mxu0 %v8426_v44 }
 0x318   :  { %v5722_v9 = vpop.f32.mrf.mxu0  ;;  %7201 = vmatprep.subr.bf16.mxu0 %v8427_v59 }
 0x319   :  { %7222 = vmatpush3.bf16.msra.mxu1 %v8442_v1  ;;  %v7164_v1 = vld [vmem:[%s11226_s4] ss:$0 sm:$0xff] }
 0x31a   :  { %7223 = vmatprep.subr.bf16.mxu1 %v8443_v34 }
 0x31b   :  { %7202 = vmatpush3.bf16.msra.mxu0 %v8428_v27 }
 0x31c   :  { %7203 = vmatprep.subr.bf16.mxu0 %v8429_v51 }
 0x31d   :  { %7224 = vmatpush3.bf16.msra.mxu1 %v8444_v10 }
 0x31e   :  { %7225 = vmatprep.subr.bf16.mxu1 %v8445_v49 }
 0x31f   :  { %7204 = vmatpush3.bf16.msra.mxu0 %v8430_v58 }
 0x320   :  { %7205 = vmatprep.subr.bf16.mxu0 %v8431_v61 }
 0x321   :  { %7226 = vmatpush3.bf16.msra.mxu1 %v8446_v16 }
 0x322   :  { %7227 = vmatprep.subr.bf16.mxu1 %v8447_v19 }
 0x323   :  { %7206 = vmatpush3.bf16.msra.mxu0 %v8432_v42 }
 0x324   :  { %7207 = vmatprep.subr.bf16.mxu0 %v8433_v57 }
 0x325   :  { %7228 = vmatpush3.bf16.msra.mxu1 %v8448_v18 }
 0x326   :  { %7229 = vmatprep.subr.bf16.mxu1 %v8449_v11 }
 0x327   :  { %7208 = vmatpush3.bf16.msra.mxu0 %v8434_v62 }
 0x328   :  { %7209 = vmatprep.subr.bf16.mxu0 %v8435_v17 }
 0x329   :  { %7230 = vmatpush3.bf16.msra.mxu1 %v8450_v24 }
 0x32a   :  { %7231 = vmatprep.subr.bf16.mxu1 %v8451_v38 }
 0x32b   :  { %7210 = vmatpush3.bf16.msra.mxu0 %v8436_v6 }
 0x32c   :  { %7211 = vmatprep.subr.bf16.mxu0 %v8437_v60 }
 0x32d   :  { %7232 = vmatpush3.bf16.msra.mxu1 %v8452_v20 }
 0x32e   :  { %7233 = vmatprep.subr.bf16.mxu1 %v8453_v0 }
 0x32f   :  { %7212 = vmatpush3.bf16.msra.mxu0 %v8438_v63 }
 0x331   :  { %7234 = vmatpush3.bf16.msra.mxu1 %v8454_v29 }
 0x332   :  { %6315 = vmatmul.mubr.bf16.vlgmr.msra.gmra.mxu0 %v6015_v43 }
 0x343   :  { %v5758_v30 = vpop.f32.mrf.mxu1 }
 0x344   :  { %v5759_v7 = vadd.f32 %v5758_v30, %v5718_v48 }
 0x345   :  { %v5760_v8 = vpop.f32.mrf.mxu1 }
 0x346   :  { %v5761_v39 = vadd.f32 %v5760_v8, %v5720_v46 }
 0x347   :  { %v5762_v12 = vpop.f32.mrf.mxu1 }
 0x349   :  { %v5763_v50 = vpop.f32.mrf.mxu1 }
 0x352   :  { %v5799_v4 = vpop.f32.mrf.mxu0 }
 0x353   :  { %v5800_v31 = vadd.f32 %v5799_v4, %v5759_v7 }
 0x354   :  { %v5801_v54 = vpop.f32.mrf.mxu0 }
 0x355   :  { %v5802_v5 = vadd.f32 %v5801_v54, %v5761_v39 }
 0x356   :  { %v5803_v23 = vpop.f32.mrf.mxu0 }
 0x358   :  { %v5804_v21 = vpop.f32.mrf.mxu0 }
 0x383   :  { %v5840_v14 = vpop.f32.mrf.mxu1 }
 0x384   :  { %v5841_v28 = vadd.f32 %v5840_v14, %v5800_v31 }
 0x385   :  { %v5842_v26 = vpop.f32.mrf.mxu1 }
 0x386   :  { %v5843_v45 = vadd.f32 %v5842_v26, %v5802_v5 }
 0x387   :  { %v5844_v36 = vpop.f32.mrf.mxu1 }
 0x389   :  { %v5845_v25 = vpop.f32.mrf.mxu1 }
 0x392   :  { %v5881_v37 = vpop.f32.mrf.mxu0 }
 0x393   :  { %v5882_v15 = vadd.f32 %v5881_v37, %v5841_v28 }
 0x394   :  { %v5883_v52 = vpop.f32.mrf.mxu0 }
 0x395   :  { %v5884_v53 = vadd.f32 %v5883_v52, %v5843_v45 }
 0x396   :  { %v5885_v32 = vpop.f32.mrf.mxu0 }
 0x398   :  { %v5886_v40 = vpop.f32.mrf.mxu0 }
 0x3c3   :  { %v5922_v35 = vpop.f32.mrf.mxu1 }
 0x3c4   :  { %v5923_v48 = vadd.f32 %v5922_v35, %v5882_v15 }
 0x3c5   :  { %v5924_v47 = vpop.f32.mrf.mxu1 }
 0x3c6   :  { %v5925_v59 = vadd.f32 %v5924_v47, %v5884_v53 }
 0x3c7   :  { %v5926_v41 = vpop.f32.mrf.mxu1 }
 0x3c9   :  { %v5927_v33 = vpop.f32.mrf.mxu1 }
 0x3d2   :  { %v5963_v44 = vpop.f32.mrf.mxu0 }
 0x3d3   :  { %v6004_v13 = vpop.f32.mrf.mxu1  ;;  %v5964_v46 = vadd.f32 %v5963_v44, %v5923_v48 }
 0x3d4   :  { %v5965_v22 = vpop.f32.mrf.mxu0 }
 0x3d5   :  { %v6006_v27 = vpop.f32.mrf.mxu1  ;;  %v6005_v9 = vadd.f32 %v6004_v13, %v5964_v46  ;;  %v5966_v51 = vadd.f32 %v5965_v22, %v5925_v59 }
 0x3d6   :  { %v5967_v56 = vpop.f32.mrf.mxu0 }
 0x3d7   :  { %v6008_v55 = vpop.f32.mrf.mxu1  ;;  %v6007_v58 = vadd.f32 %v6006_v27, %v5966_v51  ;;  %v6013_v61 = vmax.f32 %v6005_v9, 0.0 }
 0x3d8   :  { %v5968_v42 = vpop.f32.mrf.mxu0 }
 0x3d9   :  { %v6009_v57 = vpop.f32.mrf.mxu1  ;;  %v6014_v62 = vmax.f32 %v6007_v58, 0.0  ;;  %v6017_v6 = vpack.c.bf16 %v6013_v61, %v6013_v61 }
 0x3db   :  { %v6018_v17 = vpack.c.bf16 %v6014_v62, %v6014_v62 }
 0x3dd   :  { %6354 = vmatprep.mubr.bf16.mxu1 %v6018_v17 }
 0x3de   :  { %6355 = vmatmul.mubr.bf16.vlgmr.msra.gmra.mxu1 %v6017_v6 }
 0x3f2   :  { %v7213_v60 = vpop.f32.mrf.mxu0 }
 0x3f4   :  { %v7214_v63 = vpop.f32.mrf.mxu0 }
 0x3f5   :  { %v7215_v2 = vadd.f32 %v7214_v63, %v7213_v60 }
 0x3f6   :  { %v7216_v43 = vpop.f32.mrf.mxu0 }
 0x3f7   :  { %v6317_v8 = vadd.f32 %v7215_v2, %v7164_v1 }
 0x3f8   :  { %v7217_v3 = vpop.f32.mrf.mxu0 }
 0x49e   :  { %v7235_v30 = vpop.f32.mrf.mxu1 }
 0x4a0   :  { %v7236_v7 = vpop.f32.mrf.mxu1 }
 0x4a1   :  { %v7237_v34 = vadd.f32 %v7236_v7, %v7235_v30 }
 0x4a2   :  { %v7238_v39 = vpop.f32.mrf.mxu1 }
 0x4a3   :  { %v6357_v10 = vadd.f32 %v7237_v34, %v6317_v8 }
 0x4a4   :  { %v7239_v12 = vpop.f32.mrf.mxu1 }
 0x4a5   :  { %6362 = vst [vmem:[#allocation2] sm:$0x3] %v6357_v10 }
 0x4a6   :  { %8467 = shalt.err (!%p8464_p4)
}
 0x4a7   :  { %6372 = dma.vmem_to_hbm [thread:$0]  %s6370_s17, 32, %s11227_s5, [#allocation3]  }
 0x4a8   :  { %8476 = dma.done.wait [#allocation3], 32  }
 0x4a9   :  { %8477 = vsyncadd [#allocation3], 4294967264 }
 0x4aa   :  { %6376 = vsyncpa [#allocation3], 1 }

</bundles_post_ra>
